<compile_context>
chip_gen: v5e
topology: v5e:2x2
jax: 0.10.0
libtpu: 0.0.40
codegen_flags: <defaults>
</compile_context>

<pallas_src>
import functools

import jax
import jax.numpy as jnp
from jax import lax
from jax.experimental import pallas as pl
from jax.experimental.pallas import tpu as pltpu

NUM_CLASSES = 3
HIDDEN = 16
BACKBONE_CH = (8, 16, 32)   # synthetic FPN channels (3 levels, like YOLOPAFPN)
STRIDES = (2, 4, 8)         # downsample strides of the 3 FPN levels
NUM_OUT = 5 + NUM_CLASSES   # reg(4) + obj(1) + cls(3) = 8
LANE = 128                  # lane-dense padded output width


def _round_up(x, m):
    return (x + m - 1) // m * m


# ----------------------- backbone conv stage (Pallas) -----------------------
def _conv_s2d_kernel(x_ref, w_ref, b_ref, o_ref, *, wq):
    # x_ref: [R, 4*Cin]  space-to-depth, spatially flattened, zero-padded rows
    # w_ref: [4, 4*Cin, 128]  one weight block per 2x2 window tap
    # b_ref: [1, 128] f32 ; o_ref: [Mp, 128] (row m = ho*Wq + wo, lane-dense)
    m = o_ref.shape[0]
    acc = jnp.zeros((m, LANE), jnp.float32)
    # stride-2 3x3 conv == 2x2/stride-1 conv over the parity-plane layout:
    # 4 contiguous shifted reads, accumulated on the MXU in f32.
    for t, (wi, wj) in enumerate(((0, 0), (0, 1), (1, 0), (1, 1))):
        s = wi * wq + wj                      # static shift per tap
        acc += jnp.dot(x_ref[pl.ds(s, m), :], w_ref[t],
                       preferred_element_type=jnp.float32)
    y = acc + b_ref[...]
    y = y * jax.nn.sigmoid(y)                 # SiLU in f32
    o_ref[...] = y.astype(o_ref.dtype)


def conv3x3_s2_silu(xs_flat, w_taps, bias, *, wq, mp):
    """One fused conv+bias+SiLU stage.  xs_flat: [B, R, 4*Cin] bf16."""
    B, R, KC = xs_flat.shape
    kern = functools.partial(_conv_s2d_kernel, wq=wq)
    return pl.pallas_call(
        kern,
        out_shape=jax.ShapeDtypeStruct((B, mp, LANE), jnp.bfloat16),
        grid=(B,),
        in_specs=[
            pl.BlockSpec((None, R, KC), lambda b: (b, 0, 0)),
            pl.BlockSpec((4, KC, LANE), lambda b: (0, 0, 0)),
            pl.BlockSpec((1, LANE), lambda b: (0, 0)),
        ],
        out_specs=pl.BlockSpec((None, mp, LANE), lambda b: (b, 0, 0)),
        compiler_params=pltpu.CompilerParams(
            dimension_semantics=("parallel",),
            vmem_limit_bytes=32 * 1024 * 1024),
    )(xs_flat, w_taps, bias)


# --------------------------- XLA glue (1x data) ------------------------------
def space_to_depth_pad(x_nhwc):
    """Pad by 1, split into 2x2 parity planes, flatten spatial dims.

    Replaces the 9x-duplicating im2col with a ~1x rearrangement; the conv
    kernel does the tap accumulation in VMEM.
    """
    B, H, W, C = x_nhwc.shape
    ho, wo = H // 2, W // 2
    hq, wq = ho + 1, wo + 1
    xp = jnp.pad(x_nhwc, ((0, 0), (1, 1), (1, 1), (0, 0)))
    planes = [xp[:, pi::2, pj::2, :] for pi in (0, 1) for pj in (0, 1)]
    xs = jnp.concatenate(planes, axis=-1)                 # [B, hq, wq, 4C]
    xs = xs.reshape(B, hq * wq, 4 * C)
    mp = _round_up(ho * wq, 8)                            # padded output rows
    rows = _round_up(max(hq * wq, wq + 1 + mp), 8)        # cover shifted reads
    xs = jnp.pad(xs, ((0, 0), (0, rows - hq * wq), (0, 0)))
    return xs.astype(jnp.bfloat16), (ho, wo, wq, mp)


def _to_nhwc(out, ho, wo, wq, cout):
    """Drop the garbage column / padded rows / padded lanes of a stage output."""
    B = out.shape[0]
    f = out[:, :ho * wq, :cout].reshape(B, ho, wq, cout)
    return f[:, :, :wo, :]                                # [B, ho, wo, cout]


def backbone(packed, x_nhwc):
    """Synthetic YOLOPAFPN-like backbone: 3 stride-2 conv+SiLU stages."""
    f = x_nhwc
    feats = []
    for i, cout in enumerate(BACKBONE_CH):
        xs, (ho, wo, wq, mp) = space_to_depth_pad(f)
        out = conv3x3_s2_silu(xs, packed[f"bb{i}_w"], packed[f"bb{i}_b"],
                              wq=wq, mp=mp)
        f = _to_nhwc(out, ho, wo, wq, cout)
        feats.append(f)
    return feats


# -------- fused head: stem + reg/obj/cls + decode, level grid axis ----------
def _head_kernel(info_ref, x_ref, w1_ref, b1_ref, w2_ref, b2_ref, o_ref):
    l = pl.program_id(0)
    # stem 1x1 conv + SiLU (f32 accumulation, f32 epilogue)
    h = jnp.dot(x_ref[...], w1_ref[...], preferred_element_type=jnp.float32)
    h = h + b1_ref[...]
    h = h * jax.nn.sigmoid(h)
    # fused reg/obj/cls 1x1 convs, lane-dense 128-wide output
    y = jnp.dot(h.astype(jnp.bfloat16), w2_ref[...],
                preferred_element_type=jnp.float32)
    y = y + b2_ref[...]
    # decode constants generated in-kernel from iota + per-level SMEM scalars
    hf = info_ref[l, 0].astype(jnp.float32)
    wf = info_ref[l, 1].astype(jnp.float32)
    sf = info_ref[l, 2].astype(jnp.float32)
    m, n = y.shape
    row = lax.broadcasted_iota(jnp.int32, (m, n), 0).astype(jnp.float32)
    q1 = jnp.floor((row + 0.5) / wf)       # == row // W (exact at these sizes)
    xv = row - q1 * wf                     # w (x) grid coordinate
    q2 = jnp.floor((q1 + 0.5) / hf)
    yv = q1 - q2 * hf                      # h (y) grid coordinate
    lane = lax.broadcasted_iota(jnp.int32, (m, n), 1)
    grid_xy = jnp.where(lane == 0, xv, jnp.where(lane == 1, yv, 0.0))
    lin = (y + grid_xy) * sf               # xy decode
    ex = jnp.exp(y) * sf                   # wh decode
    sg = jax.nn.sigmoid(y)                 # obj / cls decode
    o_ref[...] = jnp.where(lane < 2, lin, jnp.where(lane < 4, ex, sg))


def fused_head(packed, feats):
    L = len(feats)
    B = feats[0].shape[0]
    m_sizes = [f.shape[0] * f.shape[1] * f.shape[2] for f in feats]
    m_max = _round_up(max(m_sizes), 8)
    c_max = max(BACKBONE_CH)

    xl = []
    for f, c in zip(feats, BACKBONE_CH):
        m = f.shape[0] * f.shape[1] * f.shape[2]
        xi = f.reshape(m, c)
        xi = jnp.pad(xi, ((0, m_max - m), (0, c_max - c)))
        xl.append(xi)
    x_lvl = jnp.stack(xl, axis=0).astype(jnp.bfloat16)     # [L, m_max, c_max]

    lvl_info = jnp.array(
        [[f.shape[1], f.shape[2], s] for f, s in zip(feats, STRIDES)],
        jnp.int32)                                         # (H, W, stride)

    grid_spec = pltpu.PrefetchScalarGridSpec(
        num_scalar_prefetch=1, grid=(L,),
        in_specs=[
            pl.BlockSpec((None, m_max, c_max), lambda l, info: (l, 0, 0)),
            pl.BlockSpec((None, c_max, LANE), lambda l, info: (l, 0, 0)),
            pl.BlockSpec((None, 1, LANE), lambda l, info: (l, 0, 0)),
            pl.BlockSpec((None, LANE, LANE), lambda l, info: (l, 0, 0)),
            pl.BlockSpec((None, 1, LANE), lambda l, info: (l, 0, 0)),
        ],
        out_specs=pl.BlockSpec((None, m_max, LANE), lambda l, info: (l, 0, 0)),
    )
    out = pl.pallas_call(
        _head_kernel,
        out_shape=jax.ShapeDtypeStruct((L, m_max, LANE), jnp.float32),
        grid_spec=grid_spec,
        compiler_params=pltpu.CompilerParams(
            dimension_semantics=("parallel",),
            vmem_limit_bytes=32 * 1024 * 1024),
    )(lvl_info, x_lvl, packed["w1"], packed["b1"], packed["w2"], packed["b2"])

    res = []
    for i, f in enumerate(feats):
        _, H, W, _ = f.shape
        m = B * H * W
        res.append(out[i, :m, :NUM_OUT].reshape(B, H * W, NUM_OUT))
    return jnp.concatenate(res, axis=1)


# ----------------------------- params (synthetic) ---------------------------
def init_params(key, in_ch=4):
    keys = jax.random.split(key, 32)
    kit = iter(keys)

    def dense(k_in, k_out):
        w = 0.05 * jax.random.normal(next(kit), (k_in, k_out), jnp.float32)
        b = 0.05 * jax.random.normal(next(kit), (k_out,), jnp.float32)
        return w, b

    p = {}
    cin = in_ch
    for i, cout in enumerate(BACKBONE_CH):
        p[f"bb{i}_w"], p[f"bb{i}_b"] = dense(9 * cin, cout)
        cin = cout
    for i, cout in enumerate(BACKBONE_CH):
        p[f"stem{i}_w"], p[f"stem{i}_b"] = dense(cout, HIDDEN)
        p[f"cls{i}_w"], p[f"cls{i}_b"] = dense(HIDDEN, NUM_CLASSES)
        p[f"reg{i}_w"], p[f"reg{i}_b"] = dense(HIDDEN, 4)
        p[f"obj{i}_w"], p[f"obj{i}_b"] = dense(HIDDEN, 1)
    return p


def _pack_conv(w, b, cin, cout):
    """3x3 conv weight (rows ordered kh,kw,cin) -> 4 space-to-depth tap blocks."""
    w3 = w.reshape(3, 3, cin, cout)
    taps = []
    for wi in (0, 1):
        for wj in (0, 1):
            blocks = []
            for pi in (0, 1):
                for pj in (0, 1):
                    di, dj = 2 * wi + pi, 2 * wj + pj
                    if di <= 2 and dj <= 2:
                        blocks.append(w3[di, dj])
                    else:
                        blocks.append(jnp.zeros((cin, cout), jnp.float32))
            wt = jnp.concatenate(blocks, axis=0)              # [4*cin, cout]
            taps.append(jnp.pad(wt, ((0, 0), (0, LANE - cout))))
    w_taps = jnp.stack(taps, axis=0).astype(jnp.bfloat16)     # [4, 4*cin, 128]
    bias = jnp.pad(b, (0, LANE - cout)).reshape(1, LANE).astype(jnp.float32)
    return w_taps, bias


def prepare_weights(p, in_ch=4):
    """Pack all weights ONCE, outside the jitted forward (no per-call scatter)."""
    packed = {}
    cin = in_ch
    for i, cout in enumerate(BACKBONE_CH):
        packed[f"bb{i}_w"], packed[f"bb{i}_b"] = _pack_conv(
            p[f"bb{i}_w"], p[f"bb{i}_b"], cin, cout)
        cin = cout

    L = len(BACKBONE_CH)
    c_max = max(BACKBONE_CH)
    w1 = jnp.zeros((L, c_max, LANE), jnp.float32)
    b1 = jnp.zeros((L, 1, LANE), jnp.float32)
    w2 = jnp.zeros((L, LANE, LANE), jnp.float32)
    b2 = jnp.zeros((L, 1, LANE), jnp.float32)
    for i, c in enumerate(BACKBONE_CH):
        w1 = w1.at[i, :c, :HIDDEN].set(p[f"stem{i}_w"])
        b1 = b1.at[i, 0, :HIDDEN].set(p[f"stem{i}_b"])
        hw = jnp.concatenate(
            [p[f"reg{i}_w"], p[f"obj{i}_w"], p[f"cls{i}_w"]], axis=1)
        hb = jnp.concatenate([p[f"reg{i}_b"], p[f"obj{i}_b"], p[f"cls{i}_b"]])
        w2 = w2.at[i, :HIDDEN, :NUM_OUT].set(hw)
        b2 = b2.at[i, 0, :NUM_OUT].set(hb)
    packed["w1"] = w1.astype(jnp.bfloat16)
    packed["b1"] = b1
    packed["w2"] = w2.astype(jnp.bfloat16)
    packed["b2"] = b2
    return packed


# --------------------------------- forward ----------------------------------
def yolox_mask_forward(packed, x_nchw):
    """YOLOXMask.forward, eval branch: fpn_outs = backbone(x); head(fpn_outs)."""
    x = jnp.transpose(x_nchw, (0, 2, 3, 1))   # NCHW -> NHWC
    feats = backbone(packed, x)
    return fused_head(packed, feats)


# ----------------------------------- main ------------------------------------
if __name__ == "__main__":
    key = jax.random.PRNGKey(0)
    kx, kp = jax.random.split(key)
    x = jax.random.normal(kx, (2, 4, 16, 16), jnp.float32)   # NCHW, like PyTorch
    params = init_params(kp, in_ch=4)
    packed = prepare_weights(params, in_ch=4)   # hoisted out of the jitted fwd

    fwd = jax.jit(yolox_mask_forward)
    out = jax.block_until_ready(fwd(packed, x))

    n_anchors = 8 * 8 + 4 * 4 + 2 * 2
    assert out.shape == (2, n_anchors, 5 + NUM_CLASSES), out.shape
    assert bool(jnp.all(jnp.isfinite(out)))
    print("KERNEL_OK")
</pallas_src>

<mosaic_0001>
module attributes {stable_mosaic.version = 11 : i64} {
  func.func @_conv_s2d_kernel(%arg0: i32, %arg1: memref<1x88x16xbf16, #tpu.memory_space<vmem>>, %arg2: memref<4x16x128xbf16, #tpu.memory_space<vmem>>, %arg3: memref<1x128xf32, #tpu.memory_space<vmem>>, %arg4: memref<1x72x128xbf16, #tpu.memory_space<vmem>>) attributes {dimension_semantics = [#tpu.dimension_semantics<parallel>], iteration_bounds = array<i64: 2>, scalar_prefetch = 0 : i64, scratch_operands = 0 : i64, tpu.core_type = #tpu.core_type<tc>, window_params = [{transform_indices = @transform_0, window_bounds = array<i64: 1, 88, 16>}, {pipeline_mode = #tpu.pipeline_mode<synchronous>, transform_indices = @transform_1, window_bounds = array<i64: 4, 16, 128>}, {pipeline_mode = #tpu.pipeline_mode<synchronous>, transform_indices = @transform_2, window_bounds = array<i64: 1, 128>}, {transform_indices = @transform_3, window_bounds = array<i64: 1, 72, 128>}]} {
    %cst = arith.constant 0.000000e+00 : f32
    %0 = vector.broadcast %cst : f32 to vector<72x128xf32>
    %c0 = arith.constant 0 : index
    %c0_0 = arith.constant 0 : index
    %c0_1 = arith.constant 0 : index
    %1 = vector.load %arg1[%c0, %c0_0, %c0_1] : memref<1x88x16xbf16, #tpu.memory_space<vmem>>, vector<1x72x16xbf16>
    %2 = vector.shape_cast %1 : vector<1x72x16xbf16> to vector<72x16xbf16>
    %c0_2 = arith.constant 0 : index
    %c0_3 = arith.constant 0 : index
    %c0_4 = arith.constant 0 : index
    %3 = vector.load %arg2[%c0_2, %c0_3, %c0_4] : memref<4x16x128xbf16, #tpu.memory_space<vmem>>, vector<1x16x128xbf16>
    %4 = vector.shape_cast %3 : vector<1x16x128xbf16> to vector<16x128xbf16>
    %cst_5 = arith.constant dense<0.000000e+00> : vector<72x128xf32>
    %5 = tpu.matmul %2, %4, %cst_5 {dimension_numbers = #tpu.dot_dimension_numbers<[1], [0], [0], [1], [0, 0, 1, 1], [], []>} : vector<72x16xbf16>, vector<16x128xbf16>, vector<72x128xf32> -> vector<72x128xf32>
    %6 = arith.addf %0, %5 : vector<72x128xf32>
    %c0_6 = arith.constant 0 : index
    %c1 = arith.constant 1 : index
    %c0_7 = arith.constant 0 : index
    %7 = vector.load %arg1[%c0_6, %c1, %c0_7] : memref<1x88x16xbf16, #tpu.memory_space<vmem>>, vector<1x72x16xbf16>
    %8 = vector.shape_cast %7 : vector<1x72x16xbf16> to vector<72x16xbf16>
    %c1_8 = arith.constant 1 : index
    %c0_9 = arith.constant 0 : index
    %c0_10 = arith.constant 0 : index
    %9 = vector.load %arg2[%c1_8, %c0_9, %c0_10] : memref<4x16x128xbf16, #tpu.memory_space<vmem>>, vector<1x16x128xbf16>
    %10 = vector.shape_cast %9 : vector<1x16x128xbf16> to vector<16x128xbf16>
    %cst_11 = arith.constant dense<0.000000e+00> : vector<72x128xf32>
    %11 = tpu.matmul %8, %10, %cst_11 {dimension_numbers = #tpu.dot_dimension_numbers<[1], [0], [0], [1], [0, 0, 1, 1], [], []>} : vector<72x16xbf16>, vector<16x128xbf16>, vector<72x128xf32> -> vector<72x128xf32>
    %12 = arith.addf %6, %11 : vector<72x128xf32>
    %c0_12 = arith.constant 0 : index
    %c9 = arith.constant 9 : index
    %c0_13 = arith.constant 0 : index
    %13 = vector.load %arg1[%c0_12, %c9, %c0_13] : memref<1x88x16xbf16, #tpu.memory_space<vmem>>, vector<1x72x16xbf16>
    %14 = vector.shape_cast %13 : vector<1x72x16xbf16> to vector<72x16xbf16>
    %c2 = arith.constant 2 : index
    %c0_14 = arith.constant 0 : index
    %c0_15 = arith.constant 0 : index
    %15 = vector.load %arg2[%c2, %c0_14, %c0_15] : memref<4x16x128xbf16, #tpu.memory_space<vmem>>, vector<1x16x128xbf16>
    %16 = vector.shape_cast %15 : vector<1x16x128xbf16> to vector<16x128xbf16>
    %cst_16 = arith.constant dense<0.000000e+00> : vector<72x128xf32>
    %17 = tpu.matmul %14, %16, %cst_16 {dimension_numbers = #tpu.dot_dimension_numbers<[1], [0], [0], [1], [0, 0, 1, 1], [], []>} : vector<72x16xbf16>, vector<16x128xbf16>, vector<72x128xf32> -> vector<72x128xf32>
    %18 = arith.addf %12, %17 : vector<72x128xf32>
    %c0_17 = arith.constant 0 : index
    %c10 = arith.constant 10 : index
    %c0_18 = arith.constant 0 : index
    %19 = vector.load %arg1[%c0_17, %c10, %c0_18] : memref<1x88x16xbf16, #tpu.memory_space<vmem>>, vector<1x72x16xbf16>
    %20 = vector.shape_cast %19 : vector<1x72x16xbf16> to vector<72x16xbf16>
    %c3 = arith.constant 3 : index
    %c0_19 = arith.constant 0 : index
    %c0_20 = arith.constant 0 : index
    %21 = vector.load %arg2[%c3, %c0_19, %c0_20] : memref<4x16x128xbf16, #tpu.memory_space<vmem>>, vector<1x16x128xbf16>
    %22 = vector.shape_cast %21 : vector<1x16x128xbf16> to vector<16x128xbf16>
    %cst_21 = arith.constant dense<0.000000e+00> : vector<72x128xf32>
    %23 = tpu.matmul %20, %22, %cst_21 {dimension_numbers = #tpu.dot_dimension_numbers<[1], [0], [0], [1], [0, 0, 1, 1], [], []>} : vector<72x16xbf16>, vector<16x128xbf16>, vector<72x128xf32> -> vector<72x128xf32>
    %24 = arith.addf %18, %23 : vector<72x128xf32>
    %c0_22 = arith.constant 0 : index
    %c0_23 = arith.constant 0 : index
    %25 = vector.load %arg3[%c0_22, %c0_23] : memref<1x128xf32, #tpu.memory_space<vmem>>, vector<1x128xf32>
    %26 = vector.broadcast %25 : vector<1x128xf32> to vector<72x128xf32>
    %27 = arith.addf %24, %26 : vector<72x128xf32>
    %28 = arith.negf %27 : vector<72x128xf32>
    %29 = math.exp %28 : vector<72x128xf32>
    %cst_24 = arith.constant 1.000000e+00 : f32
    %30 = vector.broadcast %cst_24 : f32 to vector<72x128xf32>
    %31 = arith.addf %30, %29 : vector<72x128xf32>
    %32 = arith.divf %30, %31 : vector<72x128xf32>
    %33 = arith.mulf %27, %32 : vector<72x128xf32>
    %34 = arith.truncf %33 : vector<72x128xf32> to vector<72x128xbf16>
    %c0_25 = arith.constant 0 : index
    %c0_26 = arith.constant 0 : index
    %c0_27 = arith.constant 0 : index
    %35 = vector.load %arg4[%c0_25, %c0_26, %c0_27] : memref<1x72x128xbf16, #tpu.memory_space<vmem>>, vector<1x72x128xbf16>
    %36 = vector.shape_cast %35 : vector<1x72x128xbf16> to vector<72x128xbf16>
    %37 = vector.shape_cast %34 : vector<72x128xbf16> to vector<1x72x128xbf16>
    tpu.vector_store %arg4[%c0_25, %c0_26, %c0_27], %37 {strides = array<i32>} : memref<1x72x128xbf16, #tpu.memory_space<vmem>>, vector<1x72x128xbf16>,
    return
  }
  func.func @transform_0(%arg0: i32) -> (i32, i32, i32) {
    %c0_i32 = arith.constant 0 : i32
    %c0_i32_0 = arith.constant 0 : i32
    %c0_i32_1 = arith.constant 0 : i32
    return %arg0, %c0_i32, %c0_i32_0 : i32, i32, i32
  }
  func.func @transform_1(%arg0: i32) -> (i32, i32, i32) {
    %c0_i32 = arith.constant 0 : i32
    %c0_i32_0 = arith.constant 0 : i32
    %c0_i32_1 = arith.constant 0 : i32
    %c0_i32_2 = arith.constant 0 : i32
    return %c0_i32, %c0_i32_0, %c0_i32_1 : i32, i32, i32
  }
  func.func @transform_2(%arg0: i32) -> (i32, i32) {
    %c0_i32 = arith.constant 0 : i32
    %c0_i32_0 = arith.constant 0 : i32
    %c0_i32_1 = arith.constant 0 : i32
    return %c0_i32, %c0_i32_0 : i32, i32
  }
  func.func @transform_3(%arg0: i32) -> (i32, i32, i32) {
    %c0_i32 = arith.constant 0 : i32
    %c0_i32_0 = arith.constant 0 : i32
    %c0_i32_1 = arith.constant 0 : i32
    return %arg0, %c0_i32, %c0_i32_0 : i32, i32, i32
  }
}

module attributes {stable_mosaic.version = 11 : i64} {
  func.func @_conv_s2d_kernel(%arg0: i32, %arg1: memref<1x32x32xbf16, #tpu.memory_space<vmem>>, %arg2: memref<4x32x128xbf16, #tpu.memory_space<vmem>>, %arg3: memref<1x128xf32, #tpu.memory_space<vmem>>, %arg4: memref<1x24x128xbf16, #tpu.memory_space<vmem>>) attributes {dimension_semantics = [#tpu.dimension_semantics<parallel>], iteration_bounds = array<i64: 2>, scalar_prefetch = 0 : i64, scratch_operands = 0 : i64, tpu.core_type = #tpu.core_type<tc>, window_params = [{transform_indices = @transform_0, window_bounds = array<i64: 1, 32, 32>}, {pipeline_mode = #tpu.pipeline_mode<synchronous>, transform_indices = @transform_1, window_bounds = array<i64: 4, 32, 128>}, {pipeline_mode = #tpu.pipeline_mode<synchronous>, transform_indices = @transform_2, window_bounds = array<i64: 1, 128>}, {transform_indices = @transform_3, window_bounds = array<i64: 1, 24, 128>}]} {
    %cst = arith.constant 0.000000e+00 : f32
    %0 = vector.broadcast %cst : f32 to vector<24x128xf32>
    %c0 = arith.constant 0 : index
    %c0_0 = arith.constant 0 : index
    %c0_1 = arith.constant 0 : index
    %1 = vector.load %arg1[%c0, %c0_0, %c0_1] : memref<1x32x32xbf16, #tpu.memory_space<vmem>>, vector<1x24x32xbf16>
    %2 = vector.shape_cast %1 : vector<1x24x32xbf16> to vector<24x32xbf16>
    %c0_2 = arith.constant 0 : index
    %c0_3 = arith.constant 0 : index
    %c0_4 = arith.constant 0 : index
    %3 = vector.load %arg2[%c0_2, %c0_3, %c0_4] : memref<4x32x128xbf16, #tpu.memory_space<vmem>>, vector<1x32x128xbf16>
    %4 = vector.shape_cast %3 : vector<1x32x128xbf16> to vector<32x128xbf16>
    %cst_5 = arith.constant dense<0.000000e+00> : vector<24x128xf32>
    %5 = tpu.matmul %2, %4, %cst_5 {dimension_numbers = #tpu.dot_dimension_numbers<[1], [0], [0], [1], [0, 0, 1, 1], [], []>} : vector<24x32xbf16>, vector<32x128xbf16>, vector<24x128xf32> -> vector<24x128xf32>
    %6 = arith.addf %0, %5 : vector<24x128xf32>
    %c0_6 = arith.constant 0 : index
    %c1 = arith.constant 1 : index
    %c0_7 = arith.constant 0 : index
    %7 = vector.load %arg1[%c0_6, %c1, %c0_7] : memref<1x32x32xbf16, #tpu.memory_space<vmem>>, vector<1x24x32xbf16>
    %8 = vector.shape_cast %7 : vector<1x24x32xbf16> to vector<24x32xbf16>
    %c1_8 = arith.constant 1 : index
    %c0_9 = arith.constant 0 : index
    %c0_10 = arith.constant 0 : index
    %9 = vector.load %arg2[%c1_8, %c0_9, %c0_10] : memref<4x32x128xbf16, #tpu.memory_space<vmem>>, vector<1x32x128xbf16>
    %10 = vector.shape_cast %9 : vector<1x32x128xbf16> to vector<32x128xbf16>
    %cst_11 = arith.constant dense<0.000000e+00> : vector<24x128xf32>
    %11 = tpu.matmul %8, %10, %cst_11 {dimension_numbers = #tpu.dot_dimension_numbers<[1], [0], [0], [1], [0, 0, 1, 1], [], []>} : vector<24x32xbf16>, vector<32x128xbf16>, vector<24x128xf32> -> vector<24x128xf32>
    %12 = arith.addf %6, %11 : vector<24x128xf32>
    %c0_12 = arith.constant 0 : index
    %c5 = arith.constant 5 : index
    %c0_13 = arith.constant 0 : index
    %13 = vector.load %arg1[%c0_12, %c5, %c0_13] : memref<1x32x32xbf16, #tpu.memory_space<vmem>>, vector<1x24x32xbf16>
    %14 = vector.shape_cast %13 : vector<1x24x32xbf16> to vector<24x32xbf16>
    %c2 = arith.constant 2 : index
    %c0_14 = arith.constant 0 : index
    %c0_15 = arith.constant 0 : index
    %15 = vector.load %arg2[%c2, %c0_14, %c0_15] : memref<4x32x128xbf16, #tpu.memory_space<vmem>>, vector<1x32x128xbf16>
    %16 = vector.shape_cast %15 : vector<1x32x128xbf16> to vector<32x128xbf16>
    %cst_16 = arith.constant dense<0.000000e+00> : vector<24x128xf32>
    %17 = tpu.matmul %14, %16, %cst_16 {dimension_numbers = #tpu.dot_dimension_numbers<[1], [0], [0], [1], [0, 0, 1, 1], [], []>} : vector<24x32xbf16>, vector<32x128xbf16>, vector<24x128xf32> -> vector<24x128xf32>
    %18 = arith.addf %12, %17 : vector<24x128xf32>
    %c0_17 = arith.constant 0 : index
    %c6 = arith.constant 6 : index
    %c0_18 = arith.constant 0 : index
    %19 = vector.load %arg1[%c0_17, %c6, %c0_18] : memref<1x32x32xbf16, #tpu.memory_space<vmem>>, vector<1x24x32xbf16>
    %20 = vector.shape_cast %19 : vector<1x24x32xbf16> to vector<24x32xbf16>
    %c3 = arith.constant 3 : index
    %c0_19 = arith.constant 0 : index
    %c0_20 = arith.constant 0 : index
    %21 = vector.load %arg2[%c3, %c0_19, %c0_20] : memref<4x32x128xbf16, #tpu.memory_space<vmem>>, vector<1x32x128xbf16>
    %22 = vector.shape_cast %21 : vector<1x32x128xbf16> to vector<32x128xbf16>
    %cst_21 = arith.constant dense<0.000000e+00> : vector<24x128xf32>
    %23 = tpu.matmul %20, %22, %cst_21 {dimension_numbers = #tpu.dot_dimension_numbers<[1], [0], [0], [1], [0, 0, 1, 1], [], []>} : vector<24x32xbf16>, vector<32x128xbf16>, vector<24x128xf32> -> vector<24x128xf32>
    %24 = arith.addf %18, %23 : vector<24x128xf32>
    %c0_22 = arith.constant 0 : index
    %c0_23 = arith.constant 0 : index
    %25 = vector.load %arg3[%c0_22, %c0_23] : memref<1x128xf32, #tpu.memory_space<vmem>>, vector<1x128xf32>
    %26 = vector.broadcast %25 : vector<1x128xf32> to vector<24x128xf32>
    %27 = arith.addf %24, %26 : vector<24x128xf32>
    %28 = arith.negf %27 : vector<24x128xf32>
    %29 = math.exp %28 : vector<24x128xf32>
    %cst_24 = arith.constant 1.000000e+00 : f32
    %30 = vector.broadcast %cst_24 : f32 to vector<24x128xf32>
    %31 = arith.addf %30, %29 : vector<24x128xf32>
    %32 = arith.divf %30, %31 : vector<24x128xf32>
    %33 = arith.mulf %27, %32 : vector<24x128xf32>
    %34 = arith.truncf %33 : vector<24x128xf32> to vector<24x128xbf16>
    %c0_25 = arith.constant 0 : index
    %c0_26 = arith.constant 0 : index
    %c0_27 = arith.constant 0 : index
    %35 = vector.load %arg4[%c0_25, %c0_26, %c0_27] : memref<1x24x128xbf16, #tpu.memory_space<vmem>>, vector<1x24x128xbf16>
    %36 = vector.shape_cast %35 : vector<1x24x128xbf16> to vector<24x128xbf16>
    %37 = vector.shape_cast %34 : vector<24x128xbf16> to vector<1x24x128xbf16>
    tpu.vector_store %arg4[%c0_25, %c0_26, %c0_27], %37 {strides = array<i32>} : memref<1x24x128xbf16, #tpu.memory_space<vmem>>, vector<1x24x128xbf16>,
    return
  }
  func.func @transform_0(%arg0: i32) -> (i32, i32, i32) {
    %c0_i32 = arith.constant 0 : i32
    %c0_i32_0 = arith.constant 0 : i32
    %c0_i32_1 = arith.constant 0 : i32
    return %arg0, %c0_i32, %c0_i32_0 : i32, i32, i32
  }
  func.func @transform_1(%arg0: i32) -> (i32, i32, i32) {
    %c0_i32 = arith.constant 0 : i32
    %c0_i32_0 = arith.constant 0 : i32
    %c0_i32_1 = arith.constant 0 : i32
    %c0_i32_2 = arith.constant 0 : i32
    return %c0_i32, %c0_i32_0, %c0_i32_1 : i32, i32, i32
  }
  func.func @transform_2(%arg0: i32) -> (i32, i32) {
    %c0_i32 = arith.constant 0 : i32
    %c0_i32_0 = arith.constant 0 : i32
    %c0_i32_1 = arith.constant 0 : i32
    return %c0_i32, %c0_i32_0 : i32, i32
  }
  func.func @transform_3(%arg0: i32) -> (i32, i32, i32) {
    %c0_i32 = arith.constant 0 : i32
    %c0_i32_0 = arith.constant 0 : i32
    %c0_i32_1 = arith.constant 0 : i32
    return %arg0, %c0_i32, %c0_i32_0 : i32, i32, i32
  }
}

module attributes {stable_mosaic.version = 11 : i64} {
  func.func @_conv_s2d_kernel(%arg0: i32, %arg1: memref<1x16x64xbf16, #tpu.memory_space<vmem>>, %arg2: memref<4x64x128xbf16, #tpu.memory_space<vmem>>, %arg3: memref<1x128xf32, #tpu.memory_space<vmem>>, %arg4: memref<1x8x128xbf16, #tpu.memory_space<vmem>>) attributes {dimension_semantics = [#tpu.dimension_semantics<parallel>], iteration_bounds = array<i64: 2>, scalar_prefetch = 0 : i64, scratch_operands = 0 : i64, tpu.core_type = #tpu.core_type<tc>, window_params = [{transform_indices = @transform_0, window_bounds = array<i64: 1, 16, 64>}, {pipeline_mode = #tpu.pipeline_mode<synchronous>, transform_indices = @transform_1, window_bounds = array<i64: 4, 64, 128>}, {pipeline_mode = #tpu.pipeline_mode<synchronous>, transform_indices = @transform_2, window_bounds = array<i64: 1, 128>}, {transform_indices = @transform_3, window_bounds = array<i64: 1, 8, 128>}]} {
    %cst = arith.constant 0.000000e+00 : f32
    %0 = vector.broadcast %cst : f32 to vector<8x128xf32>
    %c0 = arith.constant 0 : index
    %c0_0 = arith.constant 0 : index
    %c0_1 = arith.constant 0 : index
    %1 = vector.load %arg1[%c0, %c0_0, %c0_1] : memref<1x16x64xbf16, #tpu.memory_space<vmem>>, vector<1x8x64xbf16>
    %2 = vector.shape_cast %1 : vector<1x8x64xbf16> to vector<8x64xbf16>
    %c0_2 = arith.constant 0 : index
    %c0_3 = arith.constant 0 : index
    %c0_4 = arith.constant 0 : index
    %3 = vector.load %arg2[%c0_2, %c0_3, %c0_4] : memref<4x64x128xbf16, #tpu.memory_space<vmem>>, vector<1x64x128xbf16>
    %4 = vector.shape_cast %3 : vector<1x64x128xbf16> to vector<64x128xbf16>
    %cst_5 = arith.constant dense<0.000000e+00> : vector<8x128xf32>
    %5 = tpu.matmul %2, %4, %cst_5 {dimension_numbers = #tpu.dot_dimension_numbers<[1], [0], [0], [1], [0, 0, 1, 1], [], []>} : vector<8x64xbf16>, vector<64x128xbf16>, vector<8x128xf32> -> vector<8x128xf32>
    %6 = arith.addf %0, %5 : vector<8x128xf32>
    %c0_6 = arith.constant 0 : index
    %c1 = arith.constant 1 : index
    %c0_7 = arith.constant 0 : index
    %7 = vector.load %arg1[%c0_6, %c1, %c0_7] : memref<1x16x64xbf16, #tpu.memory_space<vmem>>, vector<1x8x64xbf16>
    %8 = vector.shape_cast %7 : vector<1x8x64xbf16> to vector<8x64xbf16>
    %c1_8 = arith.constant 1 : index
    %c0_9 = arith.constant 0 : index
    %c0_10 = arith.constant 0 : index
    %9 = vector.load %arg2[%c1_8, %c0_9, %c0_10] : memref<4x64x128xbf16, #tpu.memory_space<vmem>>, vector<1x64x128xbf16>
    %10 = vector.shape_cast %9 : vector<1x64x128xbf16> to vector<64x128xbf16>
    %cst_11 = arith.constant dense<0.000000e+00> : vector<8x128xf32>
    %11 = tpu.matmul %8, %10, %cst_11 {dimension_numbers = #tpu.dot_dimension_numbers<[1], [0], [0], [1], [0, 0, 1, 1], [], []>} : vector<8x64xbf16>, vector<64x128xbf16>, vector<8x128xf32> -> vector<8x128xf32>
    %12 = arith.addf %6, %11 : vector<8x128xf32>
    %c0_12 = arith.constant 0 : index
    %c3 = arith.constant 3 : index
    %c0_13 = arith.constant 0 : index
    %13 = vector.load %arg1[%c0_12, %c3, %c0_13] : memref<1x16x64xbf16, #tpu.memory_space<vmem>>, vector<1x8x64xbf16>
    %14 = vector.shape_cast %13 : vector<1x8x64xbf16> to vector<8x64xbf16>
    %c2 = arith.constant 2 : index
    %c0_14 = arith.constant 0 : index
    %c0_15 = arith.constant 0 : index
    %15 = vector.load %arg2[%c2, %c0_14, %c0_15] : memref<4x64x128xbf16, #tpu.memory_space<vmem>>, vector<1x64x128xbf16>
    %16 = vector.shape_cast %15 : vector<1x64x128xbf16> to vector<64x128xbf16>
    %cst_16 = arith.constant dense<0.000000e+00> : vector<8x128xf32>
    %17 = tpu.matmul %14, %16, %cst_16 {dimension_numbers = #tpu.dot_dimension_numbers<[1], [0], [0], [1], [0, 0, 1, 1], [], []>} : vector<8x64xbf16>, vector<64x128xbf16>, vector<8x128xf32> -> vector<8x128xf32>
    %18 = arith.addf %12, %17 : vector<8x128xf32>
    %c0_17 = arith.constant 0 : index
    %c4 = arith.constant 4 : index
    %c0_18 = arith.constant 0 : index
    %19 = vector.load %arg1[%c0_17, %c4, %c0_18] : memref<1x16x64xbf16, #tpu.memory_space<vmem>>, vector<1x8x64xbf16>
    %20 = vector.shape_cast %19 : vector<1x8x64xbf16> to vector<8x64xbf16>
    %c3_19 = arith.constant 3 : index
    %c0_20 = arith.constant 0 : index
    %c0_21 = arith.constant 0 : index
    %21 = vector.load %arg2[%c3_19, %c0_20, %c0_21] : memref<4x64x128xbf16, #tpu.memory_space<vmem>>, vector<1x64x128xbf16>
    %22 = vector.shape_cast %21 : vector<1x64x128xbf16> to vector<64x128xbf16>
    %cst_22 = arith.constant dense<0.000000e+00> : vector<8x128xf32>
    %23 = tpu.matmul %20, %22, %cst_22 {dimension_numbers = #tpu.dot_dimension_numbers<[1], [0], [0], [1], [0, 0, 1, 1], [], []>} : vector<8x64xbf16>, vector<64x128xbf16>, vector<8x128xf32> -> vector<8x128xf32>
    %24 = arith.addf %18, %23 : vector<8x128xf32>
    %c0_23 = arith.constant 0 : index
    %c0_24 = arith.constant 0 : index
    %25 = vector.load %arg3[%c0_23, %c0_24] : memref<1x128xf32, #tpu.memory_space<vmem>>, vector<1x128xf32>
    %26 = vector.broadcast %25 : vector<1x128xf32> to vector<8x128xf32>
    %27 = arith.addf %24, %26 : vector<8x128xf32>
    %28 = arith.negf %27 : vector<8x128xf32>
    %29 = math.exp %28 : vector<8x128xf32>
    %cst_25 = arith.constant 1.000000e+00 : f32
    %30 = vector.broadcast %cst_25 : f32 to vector<8x128xf32>
    %31 = arith.addf %30, %29 : vector<8x128xf32>
    %32 = arith.divf %30, %31 : vector<8x128xf32>
    %33 = arith.mulf %27, %32 : vector<8x128xf32>
    %34 = arith.truncf %33 : vector<8x128xf32> to vector<8x128xbf16>
    %c0_26 = arith.constant 0 : index
    %c0_27 = arith.constant 0 : index
    %c0_28 = arith.constant 0 : index
    %35 = vector.load %arg4[%c0_26, %c0_27, %c0_28] : memref<1x8x128xbf16, #tpu.memory_space<vmem>>, vector<1x8x128xbf16>
    %36 = vector.shape_cast %35 : vector<1x8x128xbf16> to vector<8x128xbf16>
    %37 = vector.shape_cast %34 : vector<8x128xbf16> to vector<1x8x128xbf16>
    tpu.vector_store %arg4[%c0_26, %c0_27, %c0_28], %37 {strides = array<i32>} : memref<1x8x128xbf16, #tpu.memory_space<vmem>>, vector<1x8x128xbf16>,
    return
  }
  func.func @transform_0(%arg0: i32) -> (i32, i32, i32) {
    %c0_i32 = arith.constant 0 : i32
    %c0_i32_0 = arith.constant 0 : i32
    %c0_i32_1 = arith.constant 0 : i32
    return %arg0, %c0_i32, %c0_i32_0 : i32, i32, i32
  }
  func.func @transform_1(%arg0: i32) -> (i32, i32, i32) {
    %c0_i32 = arith.constant 0 : i32
    %c0_i32_0 = arith.constant 0 : i32
    %c0_i32_1 = arith.constant 0 : i32
    %c0_i32_2 = arith.constant 0 : i32
    return %c0_i32, %c0_i32_0, %c0_i32_1 : i32, i32, i32
  }
  func.func @transform_2(%arg0: i32) -> (i32, i32) {
    %c0_i32 = arith.constant 0 : i32
    %c0_i32_0 = arith.constant 0 : i32
    %c0_i32_1 = arith.constant 0 : i32
    return %c0_i32, %c0_i32_0 : i32, i32
  }
  func.func @transform_3(%arg0: i32) -> (i32, i32, i32) {
    %c0_i32 = arith.constant 0 : i32
    %c0_i32_0 = arith.constant 0 : i32
    %c0_i32_1 = arith.constant 0 : i32
    return %arg0, %c0_i32, %c0_i32_0 : i32, i32, i32
  }
}

module attributes {stable_mosaic.version = 11 : i64} {
  func.func @_head_kernel(%arg0: i32, %arg1: memref<3x3xi32, #tpu.memory_space<smem>>, %arg2: memref<1x128x32xbf16, #tpu.memory_space<vmem>>, %arg3: memref<1x32x128xbf16, #tpu.memory_space<vmem>>, %arg4: memref<1x1x128xf32, #tpu.memory_space<vmem>>, %arg5: memref<1x128x128xbf16, #tpu.memory_space<vmem>>, %arg6: memref<1x1x128xf32, #tpu.memory_space<vmem>>, %arg7: memref<1x128x128xf32, #tpu.memory_space<vmem>>) attributes {dimension_semantics = [#tpu.dimension_semantics<parallel>], iteration_bounds = array<i64: 3>, scalar_prefetch = 1 : i64, scratch_operands = 0 : i64, tpu.core_type = #tpu.core_type<tc>, window_params = [{transform_indices = @transform_0, window_bounds = array<i64: 1, 128, 32>}, {transform_indices = @transform_1, window_bounds = array<i64: 1, 32, 128>}, {transform_indices = @transform_2, window_bounds = array<i64: 1, 1, 128>}, {transform_indices = @transform_3, window_bounds = array<i64: 1, 128, 128>}, {transform_indices = @transform_4, window_bounds = array<i64: 1, 1, 128>}, {transform_indices = @transform_5, window_bounds = array<i64: 1, 128, 128>}]} {
    %c0 = arith.constant 0 : index
    %c0_0 = arith.constant 0 : index
    %c0_1 = arith.constant 0 : index
    %0 = vector.load %arg2[%c0, %c0_0, %c0_1] : memref<1x128x32xbf16, #tpu.memory_space<vmem>>, vector<1x128x32xbf16>
    %1 = vector.shape_cast %0 : vector<1x128x32xbf16> to vector<128x32xbf16>
    %c0_2 = arith.constant 0 : index
    %c0_3 = arith.constant 0 : index
    %c0_4 = arith.constant 0 : index
    %2 = vector.load %arg3[%c0_2, %c0_3, %c0_4] : memref<1x32x128xbf16, #tpu.memory_space<vmem>>, vector<1x32x128xbf16>
    %3 = vector.shape_cast %2 : vector<1x32x128xbf16> to vector<32x128xbf16>
    %cst = arith.constant dense<0.000000e+00> : vector<128x128xf32>
    %4 = tpu.matmul %1, %3, %cst {dimension_numbers = #tpu.dot_dimension_numbers<[1], [0], [0], [1], [0, 0, 1, 1], [], []>} : vector<128x32xbf16>, vector<32x128xbf16>, vector<128x128xf32> -> vector<128x128xf32>
    %c0_5 = arith.constant 0 : index
    %c0_6 = arith.constant 0 : index
    %c0_7 = arith.constant 0 : index
    %5 = vector.load %arg4[%c0_5, %c0_6, %c0_7] : memref<1x1x128xf32, #tpu.memory_space<vmem>>, vector<1x1x128xf32>
    %6 = vector.shape_cast %5 : vector<1x1x128xf32> to vector<1x128xf32>
    %7 = vector.broadcast %6 : vector<1x128xf32> to vector<128x128xf32>
    %8 = arith.addf %4, %7 : vector<128x128xf32>
    %9 = arith.negf %8 : vector<128x128xf32>
    %10 = math.exp %9 : vector<128x128xf32>
    %cst_8 = arith.constant 1.000000e+00 : f32
    %11 = vector.broadcast %cst_8 : f32 to vector<128x128xf32>
    %12 = arith.addf %11, %10 : vector<128x128xf32>
    %13 = arith.divf %11, %12 : vector<128x128xf32>
    %14 = arith.mulf %8, %13 : vector<128x128xf32>
    %15 = arith.truncf %14 : vector<128x128xf32> to vector<128x128xbf16>
    %c0_9 = arith.constant 0 : index
    %c0_10 = arith.constant 0 : index
    %c0_11 = arith.constant 0 : index
    %16 = vector.load %arg5[%c0_9, %c0_10, %c0_11] : memref<1x128x128xbf16, #tpu.memory_space<vmem>>, vector<1x128x128xbf16>
    %17 = vector.shape_cast %16 : vector<1x128x128xbf16> to vector<128x128xbf16>
    %cst_12 = arith.constant dense<0.000000e+00> : vector<128x128xf32>
    %18 = tpu.matmul %15, %17, %cst_12 {dimension_numbers = #tpu.dot_dimension_numbers<[1], [0], [0], [1], [0, 0, 1, 1], [], []>} : vector<128x128xbf16>, vector<128x128xbf16>, vector<128x128xf32> -> vector<128x128xf32>
    %c0_13 = arith.constant 0 : index
    %c0_14 = arith.constant 0 : index
    %c0_15 = arith.constant 0 : index
    %19 = vector.load %arg6[%c0_13, %c0_14, %c0_15] : memref<1x1x128xf32, #tpu.memory_space<vmem>>, vector<1x1x128xf32>
    %20 = vector.shape_cast %19 : vector<1x1x128xf32> to vector<1x128xf32>
    %21 = vector.broadcast %20 : vector<1x128xf32> to vector<128x128xf32>
    %22 = arith.addf %18, %21 : vector<128x128xf32>
    %23 = arith.index_cast %arg0 : i32 to index
    %c0_16 = arith.constant 0 : index
    %24 = memref.load %arg1[%23, %c0_16] : memref<3x3xi32, #tpu.memory_space<smem>>
    %25 = arith.sitofp %24 : i32 to f32
    %26 = arith.index_cast %arg0 : i32 to index
    %c1 = arith.constant 1 : index
    %27 = memref.load %arg1[%26, %c1] : memref<3x3xi32, #tpu.memory_space<smem>>
    %28 = arith.sitofp %27 : i32 to f32
    %29 = arith.index_cast %arg0 : i32 to index
    %c2 = arith.constant 2 : index
    %30 = memref.load %arg1[%29, %c2] : memref<3x3xi32, #tpu.memory_space<smem>>
    %31 = arith.sitofp %30 : i32 to f32
    %32 = tpu.iota {dimensions = array<i32: 0>} : vector<128x128xi32>
    %33 = arith.sitofp %32 : vector<128x128xi32> to vector<128x128xf32>
    %cst_17 = arith.constant 5.000000e-01 : f32
    %34 = vector.broadcast %cst_17 : f32 to vector<128x128xf32>
    %35 = arith.addf %33, %34 : vector<128x128xf32>
    %36 = vector.broadcast %28 : f32 to vector<128x128xf32>
    %37 = arith.divf %35, %36 : vector<128x128xf32>
    %38 = math.floor %37 : vector<128x128xf32>
    %39 = vector.broadcast %28 : f32 to vector<128x128xf32>
    %40 = arith.mulf %38, %39 : vector<128x128xf32>
    %41 = arith.subf %33, %40 : vector<128x128xf32>
    %cst_18 = arith.constant 5.000000e-01 : f32
    %42 = vector.broadcast %cst_18 : f32 to vector<128x128xf32>
    %43 = arith.addf %38, %42 : vector<128x128xf32>
    %44 = vector.broadcast %25 : f32 to vector<128x128xf32>
    %45 = arith.divf %43, %44 : vector<128x128xf32>
    %46 = math.floor %45 : vector<128x128xf32>
    %47 = vector.broadcast %25 : f32 to vector<128x128xf32>
    %48 = arith.mulf %46, %47 : vector<128x128xf32>
    %49 = arith.subf %38, %48 : vector<128x128xf32>
    %50 = tpu.iota {dimensions = array<i32: 1>} : vector<128x128xi32>
    %c0_i32 = arith.constant 0 : i32
    %51 = vector.broadcast %c0_i32 : i32 to vector<128x128xi32>
    %52 = arith.cmpi eq, %50, %51 : vector<128x128xi32>
    %c1_i32 = arith.constant 1 : i32
    %53 = vector.broadcast %c1_i32 : i32 to vector<128x128xi32>
    %54 = arith.cmpi eq, %50, %53 : vector<128x128xi32>
    %cst_19 = arith.constant 0.000000e+00 : f32
    %55 = vector.broadcast %cst_19 : f32 to vector<128x128xf32>
    %56 = arith.select %54, %49, %55 : vector<128x128xi1>, vector<128x128xf32>
    %57 = arith.select %52, %41, %56 : vector<128x128xi1>, vector<128x128xf32>
    %58 = arith.addf %22, %57 : vector<128x128xf32>
    %59 = vector.broadcast %31 : f32 to vector<128x128xf32>
    %60 = arith.mulf %58, %59 : vector<128x128xf32>
    %61 = math.exp %22 : vector<128x128xf32>
    %62 = vector.broadcast %31 : f32 to vector<128x128xf32>
    %63 = arith.mulf %61, %62 : vector<128x128xf32>
    %64 = arith.negf %22 : vector<128x128xf32>
    %65 = math.exp %64 : vector<128x128xf32>
    %cst_20 = arith.constant 1.000000e+00 : f32
    %66 = vector.broadcast %cst_20 : f32 to vector<128x128xf32>
    %67 = arith.addf %66, %65 : vector<128x128xf32>
    %68 = arith.divf %66, %67 : vector<128x128xf32>
    %c2_i32 = arith.constant 2 : i32
    %69 = vector.broadcast %c2_i32 : i32 to vector<128x128xi32>
    %70 = arith.cmpi slt, %50, %69 : vector<128x128xi32>
    %c4_i32 = arith.constant 4 : i32
    %71 = vector.broadcast %c4_i32 : i32 to vector<128x128xi32>
    %72 = arith.cmpi slt, %50, %71 : vector<128x128xi32>
    %73 = arith.select %72, %63, %68 : vector<128x128xi1>, vector<128x128xf32>
    %74 = arith.select %70, %60, %73 : vector<128x128xi1>, vector<128x128xf32>
    %c0_21 = arith.constant 0 : index
    %c0_22 = arith.constant 0 : index
    %c0_23 = arith.constant 0 : index
    %75 = vector.load %arg7[%c0_21, %c0_22, %c0_23] : memref<1x128x128xf32, #tpu.memory_space<vmem>>, vector<1x128x128xf32>
    %76 = vector.shape_cast %75 : vector<1x128x128xf32> to vector<128x128xf32>
    %77 = vector.shape_cast %74 : vector<128x128xf32> to vector<1x128x128xf32>
    tpu.vector_store %arg7[%c0_21, %c0_22, %c0_23], %77 {strides = array<i32>} : memref<1x128x128xf32, #tpu.memory_space<vmem>>, vector<1x128x128xf32>,
    return
  }
  func.func @transform_0(%arg0: i32, %arg1: memref<3x3xi32, #tpu.memory_space<smem>>) -> (i32, i32, i32) {
    %c0_i32 = arith.constant 0 : i32
    %c0_i32_0 = arith.constant 0 : i32
    %c0_i32_1 = arith.constant 0 : i32
    return %arg0, %c0_i32, %c0_i32_0 : i32, i32, i32
  }
  func.func @transform_1(%arg0: i32, %arg1: memref<3x3xi32, #tpu.memory_space<smem>>) -> (i32, i32, i32) {
    %c0_i32 = arith.constant 0 : i32
    %c0_i32_0 = arith.constant 0 : i32
    %c0_i32_1 = arith.constant 0 : i32
    return %arg0, %c0_i32, %c0_i32_0 : i32, i32, i32
  }
  func.func @transform_2(%arg0: i32, %arg1: memref<3x3xi32, #tpu.memory_space<smem>>) -> (i32, i32, i32) {
    %c0_i32 = arith.constant 0 : i32
    %c0_i32_0 = arith.constant 0 : i32
    %c0_i32_1 = arith.constant 0 : i32
    return %arg0, %c0_i32, %c0_i32_0 : i32, i32, i32
  }
  func.func @transform_3(%arg0: i32, %arg1: memref<3x3xi32, #tpu.memory_space<smem>>) -> (i32, i32, i32) {
    %c0_i32 = arith.constant 0 : i32
    %c0_i32_0 = arith.constant 0 : i32
    %c0_i32_1 = arith.constant 0 : i32
    return %arg0, %c0_i32, %c0_i32_0 : i32, i32, i32
  }
  func.func @transform_4(%arg0: i32, %arg1: memref<3x3xi32, #tpu.memory_space<smem>>) -> (i32, i32, i32) {
    %c0_i32 = arith.constant 0 : i32
    %c0_i32_0 = arith.constant 0 : i32
    %c0_i32_1 = arith.constant 0 : i32
    return %arg0, %c0_i32, %c0_i32_0 : i32, i32, i32
  }
  func.func @transform_5(%arg0: i32, %arg1: memref<3x3xi32, #tpu.memory_space<smem>>) -> (i32, i32, i32) {
    %c0_i32 = arith.constant 0 : i32
    %c0_i32_0 = arith.constant 0 : i32
    %c0_i32_1 = arith.constant 0 : i32
    return %arg0, %c0_i32, %c0_i32_0 : i32, i32, i32
  }
}

</mosaic_0001>

<bundles_post_ra>
// kernel: yolox_mask_forward.4
= control target key start
LH: loop header
LB: loop body
LE: loop exit
PB: predicated region body
PF: predicated region fallthrough
CT: control target
= control target key end

     0   :  { %s1049_s12 = smov 0   ;;  %s1240_s0 = inlined_call_operand.vmem [shape: bf16[2,88,16], index: 0, kind: input, shape index: {}]   ;;  %s1241_s1 = inlined_call_operand.vmem [shape: bf16[4,16,128], index: 1, kind: input, shape index: {}]   ;;  %s1242_s2 = inlined_call_operand.vmem [shape: f32[1,128], index: 2, kind: input, shape index: {}]   ;;  %s1243_s3 = inlined_call_operand.vmem [shape: bf16[2,72,128], index: 3, kind: output, shape index: {}]  }
   0x1 LB: > { %s844_s13 = sadd.s32 4294967295, %s1027_s12   ;;  %p848_p0 = scmp.ge.s32.totalorder %s1027_s12, 1  ;;  %s1027_s12 = sphi %s1049_s12, %s13_s12  }
   0x2   : > { %p137_p1 = scmp.lt.s32.totalorder %s1027_s12, 3 }
   0x4   : > { %p138_p2 = pnand %p848_p0, %p137_p1 }
   0x5   : > { %p161_p3 = scmp.lt.s32.totalorder (!%p138_p2), %s844_s13, 1 }
   0x6   : > { %141 = sbr.rel (%p138_p2) target bundleno = 259 (0x103), region = 32 }
   0xb   : > { %v940_v0 = vld [vmem:[%s1241_s1] sm:$0xff]  ;;  %v947_v1 = vld [vmem:[%s1241_s1 + $0x18] sm:$0xff]  ;;  %v941_v2 = vld [vmem:[%s1241_s1 + $0x8] sm:$0xff]  ;;  %s1251_s13 = smov (!%p161_p3, %s844_s13), 1  ;;  %vm258_vm0 = vcmask 130048   ;;  %vm505_vm1 = vcmask 1046528  }
   0xc   : > { %v946_v3 = vld [vmem:[%s1241_s1 + $0x10] sm:$0xff]  ;;  %332 = vmatpush.bf16.msra.mxu1 %v940_v0  ;;  %543 = vmatpush.bf16.msra.mxu3 %v947_v1  ;;  %s971_s22 = smul.u32 44, %s1251_s13  ;;  %vm212_vm2 = vsmask.f32 7424 }
   0xd   : > { %281 = vmatpush.bf16.msra.mxu0 %v941_v2  ;;  %463 = vmatpush.bf16.msra.mxu2 %v946_v3  ;;  %s972_s28 = smul.u32 36, %s1251_s13 }
   0xe   : > { %s1075_s25 = scalar_lea.vmem %s1240_s0, %s971_s22 }
   0xf   : > { %v936_v4 = vld [vmem:[%s1075_s25] sm:$0xff]  ;;  %v1018_v6 = vld [vmem:[%s1075_s25 + $0x4] sm:$0xf0]  ;;  %v942_v7 = vld [vmem:[%s1075_s25 + $0xc] sm:$0xff]  ;;  %s1170_s4 = scalar_lea.vmem %s1243_s3, %s972_s28 }
  0x10   : > { %v359_v5 = vld [vmem:[%s1075_s25 + $0x4] sm:$0xff]   ;;  %v216_v10 = vshll.u32 %v936_v4, 16  ;;  %882 = vmatmul.msk.bf16.vlgmr.msra.gmra.mxu1 %vm258_vm0, %v936_v4  ;;  %v214_v11 = vshrl.u32 %v936_v4, 16  ;;  %v404_v13 = vshll.u32 %v942_v7, 16  ;;  %v507_v15 = vrot.slane %v942_v7, 1  ;;  %v938_v27 = vld [vmem:[%s1075_s25 + $0x10] sm:$0xff] }
  0x11   : > { %v1019_v8 = vld [vmem:[%s1075_s25 + $0x4] sm:$0xe]  ;;  %v937_v9 = vld [vmem:[%s1075_s25 + $0x8] sm:$0xff]  ;;  %v397_v18 = vshrl.u32 %v359_v5, 16  ;;  %v399_v19 = vshll.u32 %v359_v5, 16  ;;  %v943_v29 = vld [vmem:[%s1075_s25 + $0x14] sm:$0xff] }
  0x12   : > { %v221_v12 = vshll.u32 %v937_v9, 16  ;;  %v1020_v14 = vor.u32 %v1019_v8, %v1018_v6  ;;  %v218_v16 = vrot.slane %v216_v10, 1  ;;  %v406_v23 = vrot.slane %v404_v13, 1  ;;  %v939_v42 = vld [vmem:[%s1075_s25 + $0x18] sm:$0xff]  ;;  %v180_v51 = vld [vmem:[%s1075_s25 + $0x20] sm:$0xf] }
  0x13   : > { %v401_v22 = vrot.slane %v399_v19, 1  ;;  %v225_v30 = vshrl.u32 %v937_v9, 16  ;;  %v229_v31 = vshll.u32 %v938_v27, 16  ;;  %v408_v32 = vshrl.u32 %v942_v7, 16  ;;  %v944_v43 = vld [vmem:[%s1075_s25 + $0x1c] sm:$0xff] }
  0x14   : > { %v223_v17 = vrot.slane %v221_v12, 1  ;;  %v506_v20 = vrot.slane %v1020_v14, 1  ;;  %v219_v21 = vor.u32 %v218_v16, %v214_v11  ;;  %v412_v33 = vshll.u32 %v943_v29, 16  ;;  %v183_v52 = vld [vmem:[%s1075_s25 + $0x24] sm:$0x1] }
  0x15   : > { %v402_v26 = vor.u32 %v401_v22, %v397_v18  ;;  %v509_v34 = vrot.slane %v943_v29, 1  ;;  %v231_v36 = vrot.slane %v229_v31, 1  ;;  %v410_v37 = vor.u32 %v408_v32, %v406_v23  ;;  %v903_v61 = vld [vmem:[%s1075_s25 + $0x24] sm:$0xf]  ;;  %v945_v62 = vld [vmem:[%s1075_s25 + $0x24] sm:$0x10] }
  0x16   : > { %v508_v24 = vsel %vm505_vm1, %v506_v20, %v507_v15  ;;  %v224_v25 = vsel %vm212_vm2, %v219_v21, %v223_v17  ;;  %v227_v35 = vor.u32 %v225_v30, %v223_v17  ;;  %v414_v38 = vrot.slane %v412_v33, 1 }
  0x17   : > { %920 = vmatmul.msk.bf16.vlgmr.msra.gmra.mxu3 %vm258_vm0, %v508_v24  ;;  %873 = vmatmul.msk.bf16.vlgmr.msra.gmra.mxu0 %vm258_vm0, %v224_v25  ;;  %v407_v28 = vsel %vm212_vm2, %v402_v26, %v406_v23  ;;  %v510_v39 = vsel %vm505_vm1, %v507_v15, %v509_v34  ;;  %v233_v44 = vshrl.u32 %v938_v27, 16  ;;  %v237_v45 = vshll.u32 %v939_v42, 16  ;;  %v1126_v26 = vld [vmem:[%s1242_s2] ss:$0 sm:$0xff] }
  0x18   : > { %909 = vmatmul.msk.bf16.vlgmr.msra.gmra.mxu2 %vm258_vm0, %v407_v28  ;;  %v232_v40 = vsel %vm212_vm2, %v227_v35, %v231_v36  ;;  %v415_v41 = vsel %vm212_vm2, %v410_v37, %v414_v38  ;;  %v416_v46 = vshrl.u32 %v943_v29, 16  ;;  %v420_v47 = vshll.u32 %v944_v43, 16 }
  0x19   : > { %v511_v48 = vrot.slane %v944_v43, 1  ;;  %v235_v49 = vor.u32 %v233_v44, %v231_v36  ;;  %v239_v50 = vrot.slane %v237_v45, 1  ;;  %v205_v57 = vunpack.c.l.b16 %v180_v51 }
  0x1a   : > { %v418_v53 = vor.u32 %v416_v46, %v414_v38  ;;  %v422_v54 = vrot.slane %v420_v47, 1  ;;  %v206_v58 = vunpack.c.l.b16 %v183_v52  ;;  %v904_v63 = vor.u32 %v945_v62, %v903_v61 }
  0x1b   : > { %v512_v55 = vsel %vm505_vm1, %v509_v34, %v511_v48  ;;  %v240_v56 = vsel %vm212_vm2, %v235_v49, %v239_v50  ;;  %v241_v0 = vshrl.u32 %v939_v42, 16  ;;  %v424_v2 = vshrl.u32 %v944_v43, 16 }
  0x1c   : > { %v423_v59 = vsel %vm212_vm2, %v418_v53, %v422_v54  ;;  %v211_v60 = vpack.c.b16 %v206_v58, %v205_v57  ;;  %v428_v3 = vshll.u32 %v904_v63, 16  ;;  %v513_v4 = vrot.slane %v904_v63, 1 }
  0x1d   : > { %v243_v5 = vor.u32 %v241_v0, %v239_v50  ;;  %v426_v7 = vor.u32 %v424_v2, %v422_v54  ;;  %v307_v12 = vpack.c.b16 %v205_v57, %v205_v57  ;;  %v432_v14 = vshrl.u32 %v904_v63, 16 }
  0x1e   : > { %v245_v1 = vshll.u32 %v211_v60, 16  ;;  %v430_v8 = vrot.slane %v428_v3, 1  ;;  %v249_v13 = vshrl.u32 %v211_v60, 16 }
  0x20   : > { %883 = vmatmul.msk.bf16.gmra.mxu1 %vm258_vm0, %v937_v9  ;;  %v247_v6 = vrot.slane %v245_v1, 1  ;;  %v514_v9 = vsel %vm505_vm1, %v511_v48, %v513_v4  ;;  %v431_v11 = vsel %vm212_vm2, %v426_v7, %v430_v8  ;;  %v434_v16 = vor.u32 %v432_v14, %v430_v8 }
  0x22   : > { %v248_v10 = vsel %vm212_vm2, %v243_v5, %v247_v6  ;;  %v251_v15 = vor.u32 %v249_v13, %v247_v6 }
  0x27   : > { %921 = vmatmul.msk.bf16.gmra.mxu3 %vm258_vm0, %v510_v39  ;;  %874 = vmatmul.msk.bf16.gmra.mxu0 %vm258_vm0, %v232_v40 }
  0x28   : > { %910 = vmatmul.msk.bf16.gmra.mxu2 %vm258_vm0, %v415_v41 }
  0x30   : > { %884 = vmatmul.msk.bf16.gmra.mxu1 %vm258_vm0, %v938_v27 }
  0x37   : > { %922 = vmatmul.msk.bf16.gmra.mxu3 %vm258_vm0, %v512_v55  ;;  %875 = vmatmul.msk.bf16.gmra.mxu0 %vm258_vm0, %v240_v56 }
  0x38   : > { %911 = vmatmul.msk.bf16.gmra.mxu2 %vm258_vm0, %v423_v59 }
  0x40   : > { %885 = vmatmul.msk.bf16.gmra.mxu1 %vm258_vm0, %v939_v42 }
  0x47   : > { %923 = vmatmul.msk.bf16.gmra.mxu3 %vm258_vm0, %v514_v9  ;;  %876 = vmatmul.msk.bf16.gmra.mxu0 %vm258_vm0, %v248_v10 }
  0x48   : > { %912 = vmatmul.msk.bf16.gmra.mxu2 %vm258_vm0, %v431_v11 }
  0x50   : > { %886 = vmatmul.msk.bf16.gmra.mxu1 %vm258_vm0, %v307_v12 }
  0x57   : > { %924 = vmatmul.msk.bf16.gmra.mxu3 %vm258_vm0, %v513_v4  ;;  %877 = vmatmul.msk.bf16.gmra.mxu0 %vm258_vm0, %v251_v15 }
  0x58   : > { %913 = vmatmul.msk.bf16.gmra.mxu2 %vm258_vm0, %v434_v16 }
  0x8d   : > { %v334_v17 = vpop.f32.mrf.mxu1 }
  0x94   : > { %v283_v18 = vpop.f32.mrf.mxu0 }
  0x95   : > { %v336_v19 = vpop.f32.mrf.mxu1  ;;  %v335_v20 = vadd.f32 %v334_v17, %v283_v18 }
  0x9a   : > { %v545_v21 = vpop.f32.mrf.mxu3 }
  0x9b   : > { %v465_v23 = vpop.f32.mrf.mxu2 }
  0x9c   : > { %v285_v22 = vpop.f32.mrf.mxu0  ;;  %v489_v25 = vadd.f32 %v465_v23, %v335_v20 }
  0x9d   : > { %v339_v24 = vpop.f32.mrf.mxu1  ;;  %v337_v30 = vadd.f32 %v336_v19, %v285_v22 }
  0x9e   : > { %v569_v27 = vadd.f32 %v545_v21, %v489_v25 }
  0xa0   : > { %v1129_v28 = vadd.f32 %v1126_v26, %v569_v27 }
  0xa2   : > { %v547_v29 = vpop.f32.mrf.mxu3  ;;  %v925_v31 = vmul.f32 -1.442695, %v1129_v28 }
  0xa3   : > { %v467_v33 = vpop.f32.mrf.mxu2 }
  0xa4   : > { %v288_v32 = vpop.f32.mrf.mxu0  ;;  %982 = vpow2.f32 %v925_v31  ;;  %v490_v35 = vadd.f32 %v467_v33, %v337_v30 }
  0xa5   : > { %v341_v34 = vpop.f32.mrf.mxu1  ;;  %v340_v37 = vadd.f32 %v339_v24, %v288_v32 }
  0xa6   : > { %v570_v36 = vadd.f32 %v547_v29, %v490_v35 }
  0xa8   : > { %v1133_v38 = vadd.f32 %v1126_v26, %v570_v36 }
  0xaa   : > { %v550_v39 = vpop.f32.mrf.mxu3  ;;  %v983_v40 = vpop.eup %982  ;;  %v926_v41 = vmul.f32 -1.442695, %v1133_v38 }
  0xab   : > { %v618_v43 = vadd.f32 1.0, %v983_v40  ;;  %v470_v44 = vpop.f32.mrf.mxu2 }
  0xac   : > { %v290_v42 = vpop.f32.mrf.mxu0  ;;  %984 = vpow2.f32 %v926_v41  ;;  %v491_v46 = vadd.f32 %v470_v44, %v340_v37 }
  0xad   : > { %v344_v45 = vpop.f32.mrf.mxu1  ;;  %986 = vrcp.f32 %v618_v43  ;;  %v342_v51 = vadd.f32 %v341_v34, %v290_v42  ;;  %v638_v11 = vand.u32 2147483648, %v618_v43  ;;  %vm632_vm4 = vweird.f32 %v618_v43 }
  0xae   : > { %v571_v47 = vadd.f32 %v550_v39, %v491_v46  ;;  %v636_v12 = vand.u32 2147483647, %v618_v43 }
  0xaf   : > { %v639_v22 = vor.u32 1.1754944e-38, %v638_v11 }
  0xb0   : > { %v1137_v48 = vadd.f32 %v1126_v26, %v571_v47  ;;  %vm637_vm7 = vcmp.eq.f32.partialorder %v636_v12, 8.507059e+37 }
  0xb2   : > { %v552_v49 = vpop.f32.mrf.mxu3  ;;  %v985_v50 = vpop.eup %984  ;;  %v927_v52 = vmul.f32 -1.442695, %v1137_v48 }
  0xb3   : > { %v987_v54 = vpop.eup %986  ;;  %v619_v55 = vadd.f32 1.0, %v985_v50  ;;  %v472_v56 = vpop.f32.mrf.mxu2 }
  0xb4   : > { %v293_v53 = vpop.f32.mrf.mxu0  ;;  %v628_v58 = vmul.f32 %v987_v54, %v618_v43  ;;  %988 = vpow2.f32 %v927_v52  ;;  %v492_v59 = vadd.f32 %v472_v56, %v342_v51  ;;  %vm633_vm3 = vweird.f32 %v987_v54 }
  0xb5   : > { %v346_v57 = vpop.f32.mrf.mxu1  ;;  %990 = vrcp.f32 %v619_v55  ;;  %v345_v2 = vadd.f32 %v344_v45, %v293_v53  ;;  %vm1147_vm5 = vmor %vm632_vm4, %vm633_vm3  ;;  %v651_v16 = vand.u32 2147483647, %v619_v55  ;;  %v653_v17 = vand.u32 2147483648, %v619_v55 }
  0xb6   : > { %v629_v60 = vsub.f32 1.0, %v628_v58  ;;  %v572_v61 = vadd.f32 %v552_v49, %v492_v59  ;;  %vm647_vm8 = vweird.f32 %v619_v55 }
  0xb7   : > { %v654_v31 = vor.u32 1.1754944e-38, %v653_v17  ;;  %vm652_vm10 = vcmp.eq.f32.partialorder %v651_v16, 8.507059e+37 }
  0xb8   : > { %v630_v62 = vmul.f32 %v987_v54, %v629_v60  ;;  %v1141_v63 = vadd.f32 %v1126_v26, %v572_v61 }
  0xba   : > { %v555_v0 = vpop.f32.mrf.mxu3  ;;  %v989_v1 = vpop.eup %988  ;;  %v928_v3 = vmul.f32 -1.442695, %v1141_v63  ;;  %v631_v9 = vadd.f32 %v987_v54, %v630_v62 }
  0xbb   : > { %v991_v5 = vpop.eup %990  ;;  %v1144_v6 = vadd.f32 1.0, %v989_v1  ;;  %v475_v7 = vpop.f32.mrf.mxu2 }
  0xbc   : > { %v295_v4 = vpop.f32.mrf.mxu0  ;;  %v643_v10 = vmul.f32 %v991_v5, %v619_v55  ;;  %992 = vpow2.f32 %v928_v3  ;;  %v493_v14 = vadd.f32 %v475_v7, %v345_v2  ;;  %v635_v18 = vsel %vm1147_vm5, %v987_v54, %v631_v9 }
  0xbd   : > { %v349_v8 = vpop.f32.mrf.mxu1  ;;  %994 = vrcp.f32 %v1144_v6  ;;  %vm648_vm6 = vweird.f32 %v991_v5  ;;  %v640_v30 = vsel %vm637_vm7, %v639_v22, %v635_v18  ;;  %v347_v40 = vadd.f32 %v346_v57, %v295_v4 }
  0xbe   : > { %v644_v13 = vsub.f32 1.0, %v643_v10  ;;  %v573_v20 = vadd.f32 %v555_v0, %v493_v14  ;;  %vm649_vm9 = vmor %vm647_vm8, %vm648_vm6  ;;  %v762_v41 = vmul.f32 %v640_v30, %v1129_v28  ;;  %vm662_vm12 = vweird.f32 %v1144_v6 }
  0xbf   : > { %v666_v58 = vand.u32 2147483647, %v1144_v6  ;;  %v668_v59 = vand.u32 2147483648, %v1144_v6 }
  0xc0   : > { %v645_v19 = vmul.f32 %v991_v5, %v644_v13  ;;  %v1154_v25 = vadd.f32 %v1126_v26, %v573_v20 }
  0xc1   : > { %vm667_vm15 = vcmp.eq.f32.partialorder %v666_v58, 8.507059e+37 }
  0xc2   : > { %v557_v21 = vpop.f32.mrf.mxu3  ;;  %v993_v23 = vpop.eup %992  ;;  %v646_v24 = vadd.f32 %v991_v5, %v645_v19  ;;  %v929_v37 = vmul.f32 -1.442695, %v1154_v25 }
  0xc3   : > { %v1156_v29 = vpop.eup %994  ;;  %v1159_v32 = vadd.f32 1.0, %v993_v23  ;;  %v477_v33 = vpop.f32.mrf.mxu2 }
  0xc4   : > { %v298_v27 = vpop.f32.mrf.mxu0  ;;  %v650_v35 = vsel %vm649_vm9, %v991_v5, %v646_v24  ;;  %v658_v36 = vmul.f32 %v1156_v29, %v1144_v6  ;;  %v494_v44 = vadd.f32 %v477_v33, %v347_v40  ;;  %vm663_vm11 = vweird.f32 %v1156_v29 }
  0xc5   : > { %v351_v34 = vpop.f32.mrf.mxu1  ;;  %v655_v39 = vsel %vm652_vm10, %v654_v31, %v650_v35  ;;  %996 = vrcp.f32 %v1159_v32  ;;  %v350_v47 = vadd.f32 %v349_v8, %v298_v27  ;;  %vm1186_vm13 = vmor %vm662_vm12, %vm663_vm11  ;;  %v681_v3 = vand.u32 2147483647, %v1159_v32 }
  0xc6   : > { %v763_v42 = vmul.f32 %v655_v39, %v1133_v38  ;;  %v659_v43 = vsub.f32 1.0, %v658_v36  ;;  %998 = vpow2.f32 %v929_v37  ;;  %v574_v50 = vadd.f32 %v557_v21, %v494_v44 }
  0xc7   : > { %v683_v4 = vand.u32 2147483648, %v1159_v32  ;;  %v669_v8 = vor.u32 1.1754944e-38, %v668_v59  ;;  %vm677_vm0 = vweird.f32 %v1159_v32  ;;  %vm682_vm2 = vcmp.eq.f32.partialorder %v681_v3, 8.507059e+37 }
  0xc8   : > { %v951_v45 = vpack.c.bf16 %v763_v42, %v762_v41  ;;  %v660_v46 = vmul.f32 %v1156_v29, %v659_v43  ;;  %v1177_v52 = vadd.f32 %v1126_v26, %v574_v50 }
  0xc9   : > { %v684_v14 = vor.u32 1.1754944e-38, %v683_v4 }
  0xca   : > { %v560_v49 = vpop.f32.mrf.mxu3  ;;  %952 = vst [vmem:[%s1170_s4] sm:$0xff] %v951_v45   ;;  %v661_v38 = vadd.f32 %v1156_v29, %v660_v46  ;;  %v930_v61 = vmul.f32 -1.442695, %v1177_v52 }
  0xcb   : > { %v997_v28 = vpop.eup %996  ;;  %v480_v53 = vpop.f32.mrf.mxu2 }
  0xcc   : > { %v300_v51 = vpop.f32.mrf.mxu0  ;;  %v999_v55 = vpop.eup %998  ;;  %v673_v56 = vmul.f32 %v997_v28, %v1159_v32  ;;  %v495_v57 = vadd.f32 %v480_v53, %v350_v47  ;;  %v665_v2 = vsel %vm1186_vm13, %v1156_v29, %v661_v38  ;;  %vm678_vm14 = vweird.f32 %v997_v28 }
  0xcd   : > { %v354_v54 = vpop.f32.mrf.mxu1  ;;  %v1183_v60 = vadd.f32 1.0, %v999_v55  ;;  %v352_v10 = vadd.f32 %v351_v34, %v300_v51  ;;  %v670_v13 = vsel %vm667_vm15, %v669_v8, %v665_v2  ;;  %vm679_vm1 = vmor %vm677_vm0, %vm678_vm14 }
  0xce   : > { %v674_v0 = vsub.f32 1.0, %v673_v56  ;;  %v575_v1 = vadd.f32 %v560_v49, %v495_v57  ;;  %v764_v22 = vmul.f32 %v670_v13, %v1137_v48 }
  0xcf   : > { %1000 = vrcp.f32 %v1183_v60  ;;  %vm692_vm4 = vweird.f32 %v1183_v60  ;;  %v698_v47 = vand.u32 2147483648, %v1183_v60  ;;  %v696_v51 = vand.u32 2147483647, %v1183_v60 }
  0xd0   : > { %v675_v5 = vmul.f32 %v997_v28, %v674_v0  ;;  %1002 = vpow2.f32 %v930_v61  ;;  %v1197_v6 = vadd.f32 %v1126_v26, %v575_v1 }
  0xd1   : > { %v699_v61 = vor.u32 1.1754944e-38, %v698_v47  ;;  %vm697_vm7 = vcmp.eq.f32.partialorder %v696_v51, 8.507059e+37 }
  0xd2   : > { %v562_v7 = vpop.f32.mrf.mxu3  ;;  %v676_v9 = vadd.f32 %v997_v28, %v675_v5  ;;  %v931_v11 = vmul.f32 -1.442695, %v1197_v6 }
  0xd3   : > { %v482_v15 = vpop.f32.mrf.mxu2 }
  0xd4   : > { %v303_v12 = vpop.f32.mrf.mxu0  ;;  %v680_v17 = vsel %vm679_vm1, %v997_v28, %v676_v9  ;;  %1004 = vpow2.f32 %v931_v11  ;;  %v496_v18 = vadd.f32 %v482_v15, %v352_v10 }
  0xd5   : > { %v356_v16 = vpop.f32.mrf.mxu1  ;;  %v1001_v19 = vpop.eup %1000  ;;  %v685_v20 = vsel %vm682_vm2, %v684_v14, %v680_v17  ;;  %v355_v32 = vadd.f32 %v354_v54, %v303_v12 }
  0xd6   : > { %v1003_v21 = vpop.eup %1002  ;;  %v765_v23 = vmul.f32 %v685_v20, %v1141_v63  ;;  %v688_v24 = vmul.f32 %v1001_v19, %v1183_v60  ;;  %v576_v27 = vadd.f32 %v562_v7, %v496_v18  ;;  %vm693_vm3 = vweird.f32 %v1001_v19 }
  0xd7   : > { %v623_v29 = vadd.f32 1.0, %v1003_v21  ;;  %vm1217_vm5 = vmor %vm692_vm4, %vm693_vm3 }
  0xd8   : > { %v956_v30 = vpack.c.bf16 %v765_v23, %v764_v22  ;;  %v689_v31 = vsub.f32 1.0, %v688_v24  ;;  %v1205_v33 = vadd.f32 %v1126_v26, %v576_v27 }
  0xd9   : > { %1006 = vrcp.f32 %v623_v29  ;;  %v711_v54 = vand.u32 2147483647, %v623_v29  ;;  %v713_v55 = vand.u32 2147483648, %v623_v29  ;;  %vm707_vm8 = vweird.f32 %v623_v29 }
  0xda   : > { %v565_v34 = vpop.f32.mrf.mxu3  ;;  %v1005_v35 = vpop.eup %1004  ;;  %968 = vst [vmem:[%s1170_s4 + $0x8] sm:$0xff] %v956_v30   ;;  %v932_v36 = vmul.f32 -1.442695, %v1205_v33  ;;  %v690_v48 = vmul.f32 %v1001_v19, %v689_v31 }
  0xdb   : > { %v1209_v39 = vadd.f32 1.0, %v1005_v35  ;;  %v485_v63 = vpop.f32.mrf.mxu2  ;;  %v714_v1 = vor.u32 1.1754944e-38, %v713_v55  ;;  %vm712_vm10 = vcmp.eq.f32.partialorder %v711_v54, 8.507059e+37 }
  0xdc   : > { %v305_v37 = vpop.f32.mrf.mxu0  ;;  %1008 = vpow2.f32 %v932_v36  ;;  %v497_v40 = vadd.f32 %v485_v63, %v355_v32  ;;  %v691_v43 = vadd.f32 %v1001_v19, %v690_v48 }
  0xdd   : > { %1010 = vrcp.f32 %v1209_v39  ;;  %v728_v14 = vand.u32 2147483648, %v1209_v39  ;;  %vm722_vm12 = vweird.f32 %v1209_v39  ;;  %v726_v15 = vand.u32 2147483647, %v1209_v39 }
  0xde   : > { %v577_v41 = vadd.f32 %v565_v34, %v497_v40 }
  0xdf   : > { %v1007_v42 = vpop.eup %1006  ;;  %vm727_vm15 = vcmp.eq.f32.partialorder %v726_v15, 8.507059e+37 }
  0xe0   : > { %v703_v44 = vmul.f32 %v1007_v42, %v623_v29  ;;  %v1213_v45 = vadd.f32 %v1126_v26, %v577_v41  ;;  %v695_v26 = vsel %vm1217_vm5, %v1001_v19, %v691_v43  ;;  %vm708_vm6 = vweird.f32 %v1007_v42 }
  0xe1   : > { %v700_v0 = vsel %vm697_vm7, %v699_v61, %v695_v26  ;;  %vm709_vm9 = vmor %vm707_vm8, %vm708_vm6  ;;  %v729_v19 = vor.u32 1.1754944e-38, %v728_v14 }
  0xe2   : > { %v567_v46 = vpop.f32.mrf.mxu3  ;;  %v1009_v49 = vpop.eup %1008  ;;  %v704_v28 = vsub.f32 1.0, %v703_v44  ;;  %v933_v38 = vmul.f32 -1.442695, %v1213_v45  ;;  %v766_v7 = vmul.f32 %v700_v0, %v1154_v25 }
  0xe3   : > { %v1011_v53 = vpop.eup %1010  ;;  %v625_v56 = vadd.f32 1.0, %v1009_v49  ;;  %v487_v57 = vpop.f32.mrf.mxu2 }
  0xe4   : > { %v705_v58 = vmul.f32 %v1007_v42, %v704_v28  ;;  %v718_v59 = vmul.f32 %v1011_v53, %v1209_v39  ;;  %1012 = vpow2.f32 %v933_v38  ;;  %vm723_vm11 = vweird.f32 %v1011_v53 }
  0xe5   : > { %1014 = vrcp.f32 %v625_v56  ;;  %vm724_vm13 = vmor %vm722_vm12, %vm723_vm11  ;;  %v743_v17 = vand.u32 2147483648, %v625_v56  ;;  %vm737_vm0 = vweird.f32 %v625_v56 }
  0xe6   : > { %v706_v60 = vadd.f32 %v1007_v42, %v705_v58  ;;  %v719_v62 = vsub.f32 1.0, %v718_v59 }
  0xe7   : > { %v744_v23 = vor.u32 1.1754944e-38, %v743_v17 }
  0xe8   : > { %v710_v2 = vsel %vm709_vm9, %v1007_v42, %v706_v60  ;;  %v720_v3 = vmul.f32 %v1011_v53, %v719_v62 }
  0xe9   : > { %v715_v4 = vsel %vm712_vm10, %v714_v1, %v710_v2 }
  0xea   : > { %v1013_v5 = vpop.eup %1012  ;;  %v767_v8 = vmul.f32 %v715_v4, %v1177_v52  ;;  %v721_v12 = vadd.f32 %v1011_v53, %v720_v3  ;;  %v741_v52 = vand.u32 2147483647, %v625_v56 }
  0xeb   : > { %v1015_v9 = vpop.eup %1014  ;;  %v626_v10 = vadd.f32 1.0, %v1013_v5 }
  0xec   : > { %v961_v11 = vpack.c.bf16 %v767_v8, %v766_v7  ;;  %v733_v13 = vmul.f32 %v1015_v9, %v625_v56  ;;  %v725_v25 = vsel %vm724_vm13, %v1011_v53, %v721_v12  ;;  %vm738_vm14 = vweird.f32 %v1015_v9 }
  0xed   : > { %1016 = vrcp.f32 %v626_v10  ;;  %v730_v22 = vsel %vm727_vm15, %v729_v19, %v725_v25  ;;  %vm739_vm1 = vmor %vm737_vm0, %vm738_vm14  ;;  %vm742_vm2 = vcmp.eq.f32.partialorder %v741_v52, 8.507059e+37  ;;  %v758_v34 = vand.u32 2147483648, %v626_v10 }
  0xee   : > { %969 = vst [vmem:[%s1170_s4 + $0x10] sm:$0xff] %v961_v11   ;;  %v734_v16 = vsub.f32 1.0, %v733_v13  ;;  %v768_v30 = vmul.f32 %v730_v22, %v1197_v6  ;;  %v756_v37 = vand.u32 2147483647, %v626_v10  ;;  %vm752_vm4 = vweird.f32 %v626_v10 }
  0xef   : > { %v759_v39 = vor.u32 1.1754944e-38, %v758_v34 }
  0xf0   : > { %v735_v18 = vmul.f32 %v1015_v9, %v734_v16  ;;  %vm757_vm6 = vcmp.eq.f32.partialorder %v756_v37, 8.507059e+37 }
  0xf2   : > { %v736_v20 = vadd.f32 %v1015_v9, %v735_v18 }
  0xf3   : > { %v1017_v21 = vpop.eup %1016 }
  0xf4   : > { %v740_v24 = vsel %vm739_vm1, %v1015_v9, %v736_v20  ;;  %v748_v27 = vmul.f32 %v1017_v21, %v626_v10  ;;  %vm753_vm3 = vweird.f32 %v1017_v21 }
  0xf5   : > { %v745_v29 = vsel %vm742_vm2, %v744_v23, %v740_v24  ;;  %vm754_vm5 = vmor %vm752_vm4, %vm753_vm3 }
  0xf6   : > { %v769_v31 = vmul.f32 %v745_v29, %v1205_v33  ;;  %v749_v32 = vsub.f32 1.0, %v748_v27 }
  0xf8   : > { %v966_v35 = vpack.c.bf16 %v769_v31, %v768_v30  ;;  %v750_v36 = vmul.f32 %v1017_v21, %v749_v32 }
  0xfa   : > { %970 = vst [vmem:[%s1170_s4 + $0x18] sm:$0xff] %v966_v35   ;;  %v751_v48 = vadd.f32 %v1017_v21, %v750_v36 }
  0xfc   : > { %v755_v63 = vsel %vm754_vm5, %v1017_v21, %v751_v48 }
  0xfd   : > { %v760_v40 = vsel %vm757_vm6, %v759_v39, %v755_v63 }
  0xfe   : > { %v770_v41 = vmul.f32 %v760_v40, %v1213_v45 }
 0x100   : > { %v779_v6 = vpack.c.bf16 %v770_v41, %v770_v41 }
 0x102   : > { %788 = vst [vmem:[%s1170_s4 + $0x20] sm:$0xf] %v779_v6 }
 0x103 PF: > { %s13_s12 = sadd.s32 1, %s1027_s12  }
 0x104   : > { %p10_p4 = scmp.ge.s32.totalorder %s13_s12, 4  }
 0x106   :  { %12 = sbr.rel (!%p10_p4) target bundleno = 1 (0x1), region = 65 }

// kernel: yolox_mask_forward.5
= control target key start
LH: loop header
LB: loop body
LE: loop exit
PB: predicated region body
PF: predicated region fallthrough
CT: control target
= control target key end

     0   :  { %s667_s12 = smov 0   ;;  %s727_s0 = inlined_call_operand.vmem [shape: bf16[2,32,32], index: 0, kind: input, shape index: {}]   ;;  %s728_s1 = inlined_call_operand.vmem [shape: bf16[4,32,128], index: 1, kind: input, shape index: {}]   ;;  %s729_s2 = inlined_call_operand.vmem [shape: f32[1,128], index: 2, kind: input, shape index: {}]   ;;  %s730_s3 = inlined_call_operand.vmem [shape: bf16[2,24,128], index: 3, kind: output, shape index: {}]  }
   0x1 LB: > { %s534_s13 = sadd.s32 4294967295, %s645_s12   ;;  %p538_p0 = scmp.ge.s32.totalorder %s645_s12, 1  ;;  %s645_s12 = sphi %s667_s12, %s13_s12  }
   0x2   : > { %p137_p1 = scmp.lt.s32.totalorder %s645_s12, 3 }
   0x4   : > { %p138_p2 = pnand %p538_p0, %p137_p1 }
   0x5   : > { %p161_p3 = scmp.lt.s32.totalorder (!%p138_p2), %s534_s13, 1 }
   0x6   : > { %141 = sbr.rel (%p138_p2) target bundleno = 214 (0xd6), region = 32 }
   0xb   : > { %v601_v0 = vld [vmem:[%s728_s1 + $0x8] sm:$0xff]  ;;  %v607_v1 = vld [vmem:[%s728_s1 + $0x38] sm:$0xff]  ;;  %v600_v4 = vld [vmem:[%s728_s1] sm:$0xff]  ;;  %s732_s13 = smov (!%p161_p3, %s534_s13), 1  ;;  %vm223_vm0 = vcmask 261120   ;;  %vm363_vm1 = vcmask 1044480  }
   0xc   : > { %v603_v2 = vld [vmem:[%s728_s1 + $0x18] sm:$0xff]  ;;  %v605_v3 = vld [vmem:[%s728_s1 + $0x28] sm:$0xff]  ;;  %272 = vmatpush.bf16.msra.mxu1 %v601_v0  ;;  %391 = vmatpush.bf16.msra.mxu3 %v607_v1  ;;  %v606_v5 = vld [vmem:[%s728_s1 + $0x30] sm:$0xff]  ;;  %s599_s30 = sshll.u32 %s732_s13, 4  ;;  %vm195_vm2 = vsmask.f32 7424 }
   0xd   : > { %236 = vmatpush.bf16.msra.mxu0 %v603_v2  ;;  %339 = vmatpush.bf16.msra.mxu2 %v605_v3  ;;  %v602_v6 = vld [vmem:[%s728_s1 + $0x10] sm:$0xff]  ;;  %v604_v7 = vld [vmem:[%s728_s1 + $0x20] sm:$0xff]  ;;  %s165_s6 = scalar_lea.vmem %s727_s0, %s599_s30  ;;  %vm297_vm3 = vsmask.f32 5376  ;;  %s617_s9 = smul.u32 12, %s732_s13 }
   0xe   : > { %v609_v8 = vld [vmem:[%s165_s6] sm:$0xff]   ;;  %v174_v10 = vld [vmem:[%s165_s6 + $0x8] sm:$0xf]  ;;  %v285_v14 = vld [vmem:[%s165_s6 + $0xc] sm:$0x7] }
   0xf   : > { %v284_v9 = vld [vmem:[%s165_s6] sm:$0xc]  ;;  %v611_v11 = vunpack.c.h.b16 %v609_v8  ;;  %v199_v12 = vshll.u32 %v609_v8, 16  ;;  %v191_v16 = vunpack.c.l.b16 %v174_v10  ;;  %v294_v17 = vunpack.c.l.b16 %v285_v14  ;;  %v179_v19 = vld [vmem:[%s165_s6 + $0xc] sm:$0x1]  ;;  %s170_s14 = scalar_lea.vmem %s730_s3, %s617_s9 }
  0x10   : > { %273 = vmatpush.bf16.msra.mxu1 %v600_v4  ;;  %392 = vmatpush.bf16.msra.mxu3 %v606_v5  ;;  %v293_v13 = vunpack.c.l.b16 %v284_v9  ;;  %v354_v15 = vld [vmem:[%s165_s6] sm:$0x8]  ;;  %v197_v20 = vshrl.u32 %v609_v8, 16  ;;  %v192_v23 = vunpack.c.l.b16 %v179_v19  ;;  %v626_v57 = vld [vmem:[%s729_s2] ss:$0 sm:$0xff] }
  0x11   : > { %237 = vmatpush.bf16.msra.mxu0 %v602_v6  ;;  %340 = vmatpush.bf16.msra.mxu2 %v604_v7  ;;  %v361_v18 = vunpack.c.l.b16 %v354_v15  ;;  %v201_v21 = vrot.slane %v199_v12, 1  ;;  %v296_v24 = vpack.c.b16 %v294_v17, %v191_v16  ;;  %v248_v45 = vpack.c.b16 %v191_v16, %v191_v16 }
  0x12   : > { %v295_v22 = vpack.c.b16 %v611_v11, %v293_v13  ;;  %v194_v26 = vpack.c.b16 %v192_v23, %v191_v16 }
  0x13   : > { %564 = vmatmul.msk.bf16.vlgmr.msra.gmra.mxu1 %vm223_vm0, %v609_v8  ;;  %v362_v25 = vpack.c.b16 %v611_v11, %v361_v18  ;;  %v365_v30 = vrot.slane %v296_v24, 3  ;;  %v307_v31 = vshrl.u32 %v296_v24, 16  ;;  %v310_v32 = vshll.u32 %v296_v24, 16 }
  0x14   : > { %v299_v27 = vshrl.u32 %v295_v22, 16  ;;  %v302_v28 = vshll.u32 %v295_v22, 16  ;;  %v202_v33 = vor.u32 %v201_v21, %v197_v20  ;;  %v204_v34 = vshll.u32 %v194_v26, 16 }
  0x15   : > { %v364_v29 = vrot.slane %v362_v25, 3  ;;  %v309_v38 = vrot.slane %v307_v31, 2  ;;  %v312_v39 = vrot.slane %v310_v32, 3  ;;  %v208_v46 = vshrl.u32 %v194_v26, 16 }
  0x16   : > { %v301_v35 = vrot.slane %v299_v27, 2  ;;  %v304_v36 = vrot.slane %v302_v28, 3  ;;  %v206_v40 = vrot.slane %v204_v34, 1 }
  0x17   : > { %v366_v37 = vsel %vm363_vm1, %v364_v29, %v365_v30  ;;  %v313_v42 = vor.u32 %v312_v39, %v309_v38 }
  0x18   : > { %592 = vmatmul.msk.bf16.vlgmr.msra.gmra.mxu3 %vm223_vm0, %v366_v37  ;;  %v305_v41 = vor.u32 %v304_v36, %v301_v35  ;;  %v207_v43 = vsel %vm195_vm2, %v202_v33, %v206_v40  ;;  %v210_v47 = vor.u32 %v208_v46, %v206_v40 }
  0x19   : > { %554 = vmatmul.msk.bf16.vlgmr.msra.gmra.mxu0 %vm223_vm0, %v207_v43 }
  0x1a   : > { %v314_v44 = vsel %vm297_vm3, %v305_v41, %v313_v42 }
  0x1b   : > { %578 = vmatmul.msk.bf16.vlgmr.msra.gmra.mxu2 %vm223_vm0, %v314_v44 }
  0x23   : > { %565 = vmatmul.msk.bf16.gmra.mxu1 %vm223_vm0, %v248_v45 }
  0x28   : > { %593 = vmatmul.msk.bf16.gmra.mxu3 %vm223_vm0, %v365_v30 }
  0x29   : > { %555 = vmatmul.msk.bf16.gmra.mxu0 %vm223_vm0, %v210_v47 }
  0x2b   : > { %579 = vmatmul.msk.bf16.gmra.mxu2 %vm223_vm0, %v313_v42 }
  0x90   : > { %v275_v48 = vpop.f32.mrf.mxu1 }
  0x96   : > { %v239_v50 = vpop.f32.mrf.mxu0 }
  0x97   : > { %v276_v52 = vadd.f32 %v275_v48, %v239_v50 }
  0x98   : > { %v277_v49 = vpop.f32.mrf.mxu1 }
  0x9b   : > { %v394_v51 = vpop.f32.mrf.mxu3 }
  0x9e   : > { %v342_v53 = vpop.f32.mrf.mxu2  ;;  %v241_v55 = vpop.f32.mrf.mxu0 }
  0x9f   : > { %v351_v56 = vadd.f32 %v342_v53, %v276_v52  ;;  %v278_v61 = vadd.f32 %v277_v49, %v241_v55 }
  0xa0   : > { %v280_v54 = vpop.f32.mrf.mxu1 }
  0xa1   : > { %v403_v58 = vadd.f32 %v394_v51, %v351_v56 }
  0xa3   : > { %v396_v59 = vpop.f32.mrf.mxu3  ;;  %v716_v60 = vadd.f32 %v626_v57, %v403_v58 }
  0xa5   : > { %v594_v62 = vmul.f32 -1.442695, %v716_v60 }
  0xa6   : > { %v344_v63 = vpop.f32.mrf.mxu2  ;;  %v244_v1 = vpop.f32.mrf.mxu0 }
  0xa7   : > { %627 = vpow2.f32 %v594_v62  ;;  %v352_v2 = vadd.f32 %v344_v63, %v278_v61  ;;  %v281_v5 = vadd.f32 %v280_v54, %v244_v1 }
  0xa8   : > { %v282_v0 = vpop.f32.mrf.mxu1 }
  0xa9   : > { %v404_v3 = vadd.f32 %v396_v59, %v352_v2 }
  0xab   : > { %v399_v4 = vpop.f32.mrf.mxu3  ;;  %v411_v6 = vadd.f32 %v626_v57, %v404_v3 }
  0xad   : > { %v628_v7 = vpop.eup %627  ;;  %v595_v8 = vmul.f32 -1.442695, %v411_v6 }
  0xae   : > { %v422_v9 = vadd.f32 1.0, %v628_v7  ;;  %v347_v10 = vpop.f32.mrf.mxu2  ;;  %v246_v11 = vpop.f32.mrf.mxu0 }
  0xaf   : > { %629 = vpow2.f32 %v595_v8  ;;  %v353_v12 = vadd.f32 %v347_v10, %v281_v5 }
  0xb0   : > { %631 = vrcp.f32 %v422_v9  ;;  %v436_v29 = vand.u32 2147483648, %v422_v9  ;;  %vm430_vm5 = vweird.f32 %v422_v9  ;;  %v434_v30 = vand.u32 2147483647, %v422_v9 }
  0xb1   : > { %v405_v13 = vadd.f32 %v399_v4, %v353_v12 }
  0xb2   : > { %v437_v36 = vor.u32 1.1754944e-38, %v436_v29  ;;  %vm435_vm8 = vcmp.eq.f32.partialorder %v434_v30, 8.507059e+37 }
  0xb3   : > { %v401_v14 = vpop.f32.mrf.mxu3  ;;  %v412_v15 = vadd.f32 %v626_v57, %v405_v13 }
  0xb5   : > { %v630_v16 = vpop.eup %629  ;;  %v596_v17 = vmul.f32 -1.442695, %v412_v15 }
  0xb6   : > { %v632_v18 = vpop.eup %631  ;;  %v423_v19 = vadd.f32 1.0, %v630_v16  ;;  %v349_v20 = vpop.f32.mrf.mxu2 }
  0xb7   : > { %v426_v21 = vmul.f32 %v632_v18, %v422_v9  ;;  %633 = vpow2.f32 %v596_v17  ;;  %vm431_vm4 = vweird.f32 %v632_v18 }
  0xb8   : > { %635 = vrcp.f32 %v423_v19  ;;  %vm432_vm6 = vmor %vm430_vm5, %vm431_vm4  ;;  %v451_v32 = vand.u32 2147483648, %v423_v19  ;;  %v449_v35 = vand.u32 2147483647, %v423_v19  ;;  %vm445_vm9 = vweird.f32 %v423_v19 }
  0xb9   : > { %v427_v22 = vsub.f32 1.0, %v426_v21 }
  0xba   : > { %v452_v40 = vor.u32 1.1754944e-38, %v451_v32  ;;  %vm450_vm11 = vcmp.eq.f32.partialorder %v449_v35, 8.507059e+37 }
  0xbb   : > { %v428_v23 = vmul.f32 %v632_v18, %v427_v22 }
  0xbd   : > { %v634_v24 = vpop.eup %633  ;;  %v429_v27 = vadd.f32 %v632_v18, %v428_v23 }
  0xbe   : > { %v636_v25 = vpop.eup %635  ;;  %v424_v26 = vadd.f32 1.0, %v634_v24 }
  0xbf   : > { %v441_v28 = vmul.f32 %v636_v25, %v423_v19  ;;  %v433_v33 = vsel %vm432_vm6, %v632_v18, %v429_v27  ;;  %vm446_vm7 = vweird.f32 %v636_v25 }
  0xc0   : > { %637 = vrcp.f32 %v424_v26  ;;  %v438_v39 = vsel %vm435_vm8, %v437_v36, %v433_v33  ;;  %vm447_vm10 = vmor %vm445_vm9, %vm446_vm7  ;;  %v466_v47 = vand.u32 2147483648, %v424_v26  ;;  %v464_v50 = vand.u32 2147483647, %v424_v26 }
  0xc1   : > { %v442_v31 = vsub.f32 1.0, %v441_v28  ;;  %v470_v44 = vmul.f32 %v438_v39, %v716_v60  ;;  %vm460_vm13 = vweird.f32 %v424_v26 }
  0xc2   : > { %v467_v52 = vor.u32 1.1754944e-38, %v466_v47  ;;  %vm465_vm15 = vcmp.eq.f32.partialorder %v464_v50, 8.507059e+37 }
  0xc3   : > { %v443_v34 = vmul.f32 %v636_v25, %v442_v31 }
  0xc5   : > { %v444_v37 = vadd.f32 %v636_v25, %v443_v34 }
  0xc6   : > { %v638_v38 = vpop.eup %637 }
  0xc7   : > { %v448_v41 = vsel %vm447_vm10, %v636_v25, %v444_v37  ;;  %v456_v42 = vmul.f32 %v638_v38, %v424_v26  ;;  %vm461_vm12 = vweird.f32 %v638_v38 }
  0xc8   : > { %v453_v43 = vsel %vm450_vm11, %v452_v40, %v448_v41  ;;  %vm462_vm14 = vmor %vm460_vm13, %vm461_vm12 }
  0xc9   : > { %v471_v45 = vmul.f32 %v453_v43, %v411_v6  ;;  %v457_v46 = vsub.f32 1.0, %v456_v42 }
  0xcb   : > { %v615_v48 = vpack.c.bf16 %v471_v45, %v470_v44  ;;  %v458_v49 = vmul.f32 %v638_v38, %v457_v46 }
  0xcd   : > { %v459_v51 = vadd.f32 %v638_v38, %v458_v49  ;;  %616 = vst [vmem:[%s170_s14] sm:$0xff] %v615_v48  }
  0xcf   : > { %v463_v53 = vsel %vm462_vm14, %v638_v38, %v459_v51 }
  0xd0   : > { %v468_v54 = vsel %vm465_vm15, %v467_v52, %v463_v53 }
  0xd1   : > { %v472_v55 = vmul.f32 %v468_v54, %v412_v15 }
  0xd3   : > { %v475_v56 = vpack.c.bf16 %v472_v55, %v472_v55 }
  0xd5   : > { %478 = vst [vmem:[%s170_s14 + $0x8] sm:$0xf] %v475_v56 }
  0xd6 PF: > { %s13_s12 = sadd.s32 1, %s645_s12  }
  0xd7   : > { %p10_p4 = scmp.ge.s32.totalorder %s13_s12, 4  }
  0xd9   :  { %12 = sbr.rel (!%p10_p4) target bundleno = 1 (0x1), region = 65 }

// kernel: yolox_mask_forward.6
= control target key start
LH: loop header
LB: loop body
LE: loop exit
PB: predicated region body
PF: predicated region fallthrough
CT: control target
= control target key end

     0   :  { %s648_s12 = smov 0   ;;  %s728_s0 = inlined_call_operand.vmem [shape: bf16[2,16,64], index: 0, kind: input, shape index: {}]   ;;  %s729_s1 = inlined_call_operand.vmem [shape: bf16[4,64,128], index: 1, kind: input, shape index: {}]   ;;  %s730_s2 = inlined_call_operand.vmem [shape: f32[1,128], index: 2, kind: input, shape index: {}]   ;;  %s731_s3 = inlined_call_operand.vmem [shape: bf16[2,8,128], index: 3, kind: output, shape index: {}]  }
   0x1 LB: > { %s482_s13 = sadd.s32 4294967295, %s626_s12   ;;  %p486_p0 = scmp.ge.s32.totalorder %s626_s12, 1  ;;  %s626_s12 = sphi %s648_s12, %s13_s12  }
   0x2   : > { %p137_p1 = scmp.lt.s32.totalorder %s626_s12, 3 }
   0x4   : > { %p138_p2 = pnand %p486_p0, %p137_p1 }
   0x5   : > { %p160_p3 = scmp.lt.s32.totalorder (!%p138_p2), %s482_s13, 1 }
   0x6   : > { %141 = sbr.rel (%p138_p2) target bundleno = 200 (0xc8), region = 32 }
   0xb   : > { %v598_v0 = vld [vmem:[%s729_s1 + $0x38] sm:$0xff]  ;;  %v597_v4 = vld [vmem:[%s729_s1 + $0x30] sm:$0xff]  ;;  %s733_s13 = smov (!%p160_p3, %s482_s13), 1  ;;  %v596_v8 = vld [vmem:[%s729_s1 + $0x28] sm:$0xff]  ;;  %vm225_vm0 = vcmask 523264  }
   0xc   : > { %v593_v1 = vld [vmem:[%s729_s1 + $0x18] sm:$0xff]  ;;  %233 = vmatpush.bf16.msra.mxu0 %v598_v0  ;;  %v592_v5 = vld [vmem:[%s729_s1 + $0x10] sm:$0xff]  ;;  %s589_s5 = sshll.u32 %s733_s13, 3  ;;  %v591_v9 = vld [vmem:[%s729_s1 + $0x8] sm:$0xff]  ;;  %s489_s27 = sshll.u32 %s733_s13, 2 }
   0xd   : > { %v602_v2 = vld [vmem:[%s729_s1 + $0x58] sm:$0xff]  ;;  %273 = vmatpush.bf16.msra.mxu1 %v593_v1  ;;  %v601_v6 = vld [vmem:[%s729_s1 + $0x50] sm:$0xff]  ;;  %v600_v10 = vld [vmem:[%s729_s1 + $0x48] sm:$0xff]  ;;  %s695_s14 = scalar_lea.vmem %s728_s0, %s589_s5  ;;  %s168_s30 = scalar_lea.vmem %s731_s3, %s489_s27 }
   0xe   : > { %v606_v3 = vld [vmem:[%s729_s1 + $0x78] sm:$0xff]  ;;  %337 = vmatpush.bf16.msra.mxu2 %v602_v2  ;;  %v605_v7 = vld [vmem:[%s729_s1 + $0x70] sm:$0xff]  ;;  %v604_v11 = vld [vmem:[%s729_s1 + $0x68] sm:$0xff] }
   0xf   : > { %392 = vmatpush.bf16.msra.mxu3 %v606_v3  ;;  %v500_v12 = vld [vmem:[%s695_s14] sm:$0xf]  ;;  %v594_v13 = vld [vmem:[%s695_s14] sm:$0x10] }
  0x10   : > { %234 = vmatpush.bf16.msra.mxu0 %v597_v4  ;;  %v501_v14 = vor.u32 %v594_v13, %v500_v12  ;;  %v282_v15 = vld [vmem:[%s695_s14] sm:$0xe]  ;;  %v283_v16 = vld [vmem:[%s695_s14 + $0x4] sm:$0x3]  ;;  %v615_v44 = vld [vmem:[%s730_s2] ss:$0 sm:$0xff] }
  0x11   : > { %274 = vmatpush.bf16.msra.mxu1 %v592_v5  ;;  %v347_v17 = vld [vmem:[%s695_s14] sm:$0xc]  ;;  %v295_v18 = vunpack.c.l.b16 %v282_v15  ;;  %v296_v19 = vunpack.c.l.b16 %v283_v16 }
  0x12   : > { %338 = vmatpush.bf16.msra.mxu2 %v601_v6  ;;  %v358_v20 = vunpack.c.l.b16 %v347_v17  ;;  %v195_v21 = vshrl.u32 %v501_v14, 16  ;;  %v197_v22 = vshll.u32 %v501_v14, 16  ;;  %v595_v23 = vld [vmem:[%s729_s1 + $0x20] sm:$0xff] }
  0x13   : > { %393 = vmatpush.bf16.msra.mxu3 %v605_v7  ;;  %v590_v24 = vld [vmem:[%s729_s1] sm:$0xff]  ;;  %v297_v25 = vpack.c.b16 %v296_v19, %v295_v18 }
  0x14   : > { %235 = vmatpush.bf16.msra.mxu0 %v596_v8  ;;  %v359_v26 = vpack.c.b16 %v296_v19, %v358_v20  ;;  %v599_v27 = vld [vmem:[%s729_s1 + $0x40] sm:$0xff]  ;;  %v199_v29 = vrot.slane %v197_v22, 1 }
  0x15   : > { %275 = vmatpush.bf16.msra.mxu1 %v591_v9  ;;  %v603_v28 = vld [vmem:[%s729_s1 + $0x60] sm:$0xff]  ;;  %v299_v30 = vshrl.u32 %v297_v25, 16  ;;  %v302_v31 = vshll.u32 %v297_v25, 16 }
  0x16   : > { %339 = vmatpush.bf16.msra.mxu2 %v600_v10  ;;  %v200_v32 = vor.u32 %v199_v29, %v195_v21  ;;  %v170_v33 = vld [vmem:[%s695_s14] sm:$0xf]  ;;  %v360_v36 = vrot.slane %v359_v26, 2 }
  0x17   : > { %394 = vmatpush.bf16.msra.mxu3 %v604_v11  ;;  %v301_v34 = vrot.slane %v299_v30, 1  ;;  %v304_v35 = vrot.slane %v302_v31, 2 }
  0x18   : > { %236 = vmatpush.bf16.msra.mxu0 %v595_v23 }
  0x19   : > { %276 = vmatpush.bf16.msra.mxu1 %v590_v24  ;;  %v305_v37 = vor.u32 %v304_v35, %v301_v34 }
  0x1a   : > { %340 = vmatpush.bf16.msra.mxu2 %v599_v27 }
  0x1b   : > { %395 = vmatpush.bf16.msra.mxu3 %v603_v28  ;;  %518 = vmatmul.msk.bf16.vlgmr.msra.gmra.mxu0 %vm225_vm0, %v200_v32 }
  0x1c   : > { %535 = vmatmul.msk.bf16.vlgmr.msra.gmra.mxu1 %vm225_vm0, %v170_v33 }
  0x1d   : > { %560 = vmatmul.msk.bf16.vlgmr.msra.gmra.mxu2 %vm225_vm0, %v305_v37 }
  0x1e   : > { %585 = vmatmul.msk.bf16.vlgmr.msra.gmra.mxu3 %vm225_vm0, %v360_v36 }
  0x98   : > { %v238_v38 = vpop.f32.mrf.mxu0 }
  0x99   : > { %v278_v39 = vpop.f32.mrf.mxu1 }
  0x9a   : > { %v279_v40 = vadd.f32 %v278_v39, %v238_v38 }
  0xa0   : > { %v342_v41 = vpop.f32.mrf.mxu2  ;;  %v240_v45 = vpop.f32.mrf.mxu0 }
  0xa1   : > { %v397_v42 = vpop.f32.mrf.mxu3  ;;  %v346_v43 = vadd.f32 %v342_v41, %v279_v40  ;;  %v280_v46 = vpop.f32.mrf.mxu1 }
  0xa3   : > { %v401_v47 = vadd.f32 %v397_v42, %v346_v43 }
  0xa5   : > { %v406_v48 = vadd.f32 %v615_v44, %v401_v47 }
  0xa7   : > { %v586_v49 = vmul.f32 -1.442695, %v406_v48 }
  0xa8   : > { %v344_v50 = vpop.f32.mrf.mxu2 }
  0xa9   : > { %v399_v51 = vpop.f32.mrf.mxu3  ;;  %616 = vpow2.f32 %v586_v49 }
  0xaf   : > { %v617_v52 = vpop.eup %616 }
  0xb0   : > { %v410_v53 = vadd.f32 1.0, %v617_v52 }
  0xb2   : > { %618 = vrcp.f32 %v410_v53  ;;  %v422_v57 = vand.u32 2147483648, %v410_v53  ;;  %v420_v59 = vand.u32 2147483647, %v410_v53  ;;  %vm416_vm2 = vweird.f32 %v410_v53 }
  0xb4   : > { %v423_v61 = vor.u32 1.1754944e-38, %v422_v57  ;;  %vm421_vm4 = vcmp.eq.f32.partialorder %v420_v59, 8.507059e+37 }
  0xb8   : > { %v619_v54 = vpop.eup %618 }
  0xb9   : > { %v412_v55 = vmul.f32 %v619_v54, %v410_v53  ;;  %vm417_vm1 = vweird.f32 %v619_v54 }
  0xba   : > { %vm418_vm3 = vmor %vm416_vm2, %vm417_vm1 }
  0xbb   : > { %v413_v56 = vsub.f32 1.0, %v412_v55 }
  0xbd   : > { %v414_v58 = vmul.f32 %v619_v54, %v413_v56 }
  0xbf   : > { %v415_v60 = vadd.f32 %v619_v54, %v414_v58 }
  0xc1   : > { %v419_v62 = vsel %vm418_vm3, %v619_v54, %v415_v60 }
  0xc2   : > { %v424_v63 = vsel %vm421_vm4, %v423_v61, %v419_v62 }
  0xc3   : > { %v426_v0 = vmul.f32 %v424_v63, %v406_v48 }
  0xc5   : > { %v427_v1 = vpack.c.bf16 %v426_v0, %v426_v0 }
  0xc7   : > { %428 = vst [vmem:[%s168_s30] sm:$0xf] %v427_v1 }
  0xc8 PF: > { %s13_s12 = sadd.s32 1, %s626_s12  }
  0xc9   : > { %p10_p4 = scmp.ge.s32.totalorder %s13_s12, 4  }
  0xcb   :  { %12 = sbr.rel (!%p10_p4) target bundleno = 1 (0x1), region = 65 }

// kernel: yolox_mask_forward.7
= control target key start
LH: loop header
LB: loop body
LE: loop exit
PB: predicated region body
PF: predicated region fallthrough
CT: control target
= control target key end

     0   :  { %s2056_s24 = smov [#allocation3]   ;;  %s3102_s0 = inlined_call_operand.vmem [shape: s32[3,3], index: 0, kind: input, shape index: {}]   ;;  %s3103_s1 = inlined_call_operand.vmem [shape: bf16[3,128,32], index: 1, kind: input, shape index: {}]   ;;  %s3104_s2 = inlined_call_operand.vmem [shape: bf16[3,32,128], index: 2, kind: input, shape index: {}]   ;;  %s3105_s3 = inlined_call_operand.vmem [shape: f32[3,1,128], index: 3, kind: input, shape index: {}]   ;;  %s3106_s4 = inlined_call_operand.vmem [shape: bf16[3,128,128], index: 4, kind: input, shape index: {}]   ;;  %s3107_s5 = inlined_call_operand.vmem [shape: f32[3,1,128], index: 5, kind: input, shape index: {}]   ;;  %s3108_s6 = inlined_call_operand.vmem [shape: f32[3,128,128], index: 6, kind: output, shape index: {}]  }
   0x1   :  { %s12_s23 = sshll.u32 %s3102_s0, 4  ;;  %s13_s23 = int_to_ptr.vmem [resolvable:$true] %s12_s23 }
   0x2   :  { %15 = dma.vmem_to_smem %s13_s23, 64, %s2056_s24, [#allocation2] }
   0x3   :  { %2050 = dma.done.wait [#allocation2], 64 }
   0x4   :  { %2051 = vsyncadd [#allocation2], 4294967232 }
   0x5   :  { %18 = sfence }
   0x6   :  { %s2095_s25 = smov 0  }
   0x7 LB: > { %s2101_s26 = sadd.s32 4294967295, %s2054_s25   ;;  %p1702_p0 = scmp.ge.s32.totalorder %s2054_s25, 1  ;;  %s2054_s25 = sphi %s2095_s25, %s24_s25  }
   0x8   : > { %p232_p1 = scmp.lt.s32.totalorder %s2054_s25, 4 }
   0xa   : > { %p233_p2 = pnand %p1702_p0, %p232_p1 }
   0xb   : > { %p276_p3 = scmp.lt.s32.totalorder (!%p233_p2), %s2101_s26, 2  ;;  %s2292_s22 = sshll.u32 (!%p233_p2), %s2101_s26, 7 }
   0xc   : > { %236 = sbr.rel (%p233_p2) target bundleno = 482 (0x1e2), region = 40  ;;  %s901_s23 = sadd.s32 (!%p233_p2), 1, %s2292_s22 }
   0xd   : > { %s902_s24 = sld [smem:[#allocation3 + %s901_s23]] (!%p233_p2)  ;;  %s904_s29 = sadd.s32 (!%p233_p2), 2, %s2292_s22 }
  0x11   : > { %s2107_s0 = scalar_select %p276_p3, %s2101_s26, 2  ;;  %vm379_vm0 = vcmask 261120  }
  0x13   : > { %s1827_s27 = sshll.u32 %s2107_s0, 4  ;;  %s1826_s7 = sshll.u32 %s2107_s0, 6 }
  0x14   : > { %s285_s30 = scalar_lea.vmem %s3104_s2, %s1827_s27  ;;  %s288_s10 = scalar_lea.vmem %s3105_s3, %s2107_s0 }
  0x15   : > { %v1839_v0 = vld [vmem:[%s285_s30 + $0x8] sm:$0xff]  ;;  %v1838_v1 = vld [vmem:[%s285_s30] sm:$0xff]  ;;  %s280_s13 = scalar_lea.vmem %s3103_s1, %s1826_s7  ;;  %s293_s16 = scalar_lea.vmem %s3106_s4, %s1826_s7 }
  0x16   : > { %410 = vmatpush.bf16.msra.mxu0 %v1839_v0  ;;  %1848 = vmatpush.bf16.msra.mxu3 %v1839_v0  ;;  %v1830_v2 = vld [vmem:[%s280_s13] sm:$0xff]  ;;  %v1835_v3 = vld [vmem:[%s280_s13 + $0x28] sm:$0xff]  ;;  %v1836_v5 = vld [vmem:[%s280_s13 + $0x30] sm:$0xff]  ;;  %s2156_s21 = scalar_lea.vmem %s3107_s5, %s2107_s0  ;;  %s903_s26 = scvt.s32.f32 %s902_s24 }
  0x17   : > { %v1831_v4 = vld [vmem:[%s280_s13 + $0x8] sm:$0xff]  ;;  %v1832_v6 = vld [vmem:[%s280_s13 + $0x10] sm:$0xff]  ;;  %v1837_v7 = vld [vmem:[%s280_s13 + $0x38] sm:$0xff]  ;;  %s2331_s27 = sld [smem:[#allocation3 + %s2292_s22]]  ;;  %s1829_s8 = sshll.u32 %s2107_s0, 7 }
  0x18   : > { %v1833_v8 = vld [vmem:[%s280_s13 + $0x18] sm:$0xff]  ;;  %v1834_v9 = vld [vmem:[%s280_s13 + $0x20] sm:$0xff]  ;;  %v1846_v11 = vld [vmem:[%s293_s16 + $0x30] sm:$0xff]  ;;  %s2482_s30 = sld [smem:[#allocation3 + %s904_s29]] }
  0x19   : > { %v1847_v10 = vld [vmem:[%s293_s16 + $0x38] sm:$0xff]  ;;  %v1845_v12 = vld [vmem:[%s293_s16 + $0x28] sm:$0xff]  ;;  %v1844_v13 = vld [vmem:[%s293_s16 + $0x20] sm:$0xff] }
  0x1a   : > { %411 = vmatpush.bf16.msra.mxu0 %v1838_v1  ;;  %1849 = vmatpush.bf16.msra.mxu3 %v1838_v1  ;;  %v1843_v14 = vld [vmem:[%s293_s16 + $0x18] sm:$0xff]  ;;  %v2137_v15 = vld [vmem:[%s288_s10] ss:$0 sm:$0xff]  ;;  %v1842_v16 = vld [vmem:[%s293_s16 + $0x10] sm:$0xff]  ;;  %s2605_s10 = scalar_lea.vmem %s3108_s6, %s1829_s8 }
  0x1b   : > { %849 = vmatpush.bf16.msra.mxu1 %v1847_v10  ;;  %1850 = vmatpush.bf16.msra.mxu2 %v1847_v10  ;;  %v1841_v20 = vld [vmem:[%s293_s16 + $0x8] sm:$0xff]  ;;  %v1840_v21 = vld [vmem:[%s293_s16] sm:$0xff] }
  0x1d   : > { %1751 = vmatmul.msk.bf16.vlgmr.msra.gmra.mxu0 %vm379_vm0, %v1830_v2  ;;  %1756 = vmatmul.msk.bf16.vlgmr.msra.gmra.mxu3 %vm379_vm0, %v1835_v3  ;;  %s900_s28 = scvt.s32.f32 %s2331_s27 }
  0x1e   : > { %s906_s7 = scvt.s32.f32 %s2482_s30 }
  0x1f   : > { %850 = vmatpush.bf16.msra.mxu1 %v1846_v11  ;;  %1851 = vmatpush.bf16.msra.mxu2 %v1846_v11 }
  0x23   : > { %851 = vmatpush.bf16.msra.mxu1 %v1845_v12  ;;  %1852 = vmatpush.bf16.msra.mxu2 %v1845_v12 }
  0x27   : > { %852 = vmatpush.bf16.msra.mxu1 %v1844_v13  ;;  %1853 = vmatpush.bf16.msra.mxu2 %v1844_v13 }
  0x2b   : > { %853 = vmatpush.bf16.msra.mxu1 %v1843_v14  ;;  %1854 = vmatpush.bf16.msra.mxu2 %v1843_v14 }
  0x2d   : > { %1752 = vmatmul.msk.bf16.gmra.mxu0 %vm379_vm0, %v1831_v4  ;;  %1757 = vmatmul.msk.bf16.gmra.mxu3 %vm379_vm0, %v1836_v5 }
  0x2f   : > { %854 = vmatpush.bf16.msra.mxu1 %v1842_v16  ;;  %1855 = vmatpush.bf16.msra.mxu2 %v1842_v16 }
  0x33   : > { %855 = vmatpush.bf16.msra.mxu1 %v1841_v20  ;;  %1856 = vmatpush.bf16.msra.mxu2 %v1841_v20 }
  0x37   : > { %856 = vmatpush.bf16.msra.mxu1 %v1840_v21  ;;  %1857 = vmatpush.bf16.msra.mxu2 %v1840_v21 }
  0x3d   : > { %1753 = vmatmul.msk.bf16.gmra.mxu0 %vm379_vm0, %v1832_v6  ;;  %1758 = vmatmul.msk.bf16.gmra.mxu3 %vm379_vm0, %v1837_v7 }
  0x4d   : > { %1754 = vmatmul.msk.bf16.gmra.mxu0 %vm379_vm0, %v1833_v8 }
  0x5d   : > { %1755 = vmatmul.msk.bf16.gmra.mxu0 %vm379_vm0, %v1834_v9 }
  0x9a   : > { %v413_v17 = vpop.f32.mrf.mxu0 }
  0x9b   : > { %v2140_v18 = vadd.f32 %v2137_v15, %v413_v17 }
  0x9d   : > { %v1759_v19 = vmul.f32 -1.442695, %v2140_v18 }
  0x9f   : > { %1869 = vpow2.f32 %v1759_v19 }
  0xa0   : > { %v438_v10 = vpop.f32.mrf.mxu3 }
  0xa1   : > { %v2200_v47 = vadd.f32 %v2137_v15, %v438_v10 }
  0xa2   : > { %v415_v22 = vpop.f32.mrf.mxu0 }
  0xa3   : > { %v416_v23 = vadd.f32 %v2137_v15, %v415_v22 }
  0xa5   : > { %v1870_v24 = vpop.eup %1869  ;;  %v1760_v25 = vmul.f32 -1.442695, %v416_v23 }
  0xa6   : > { %v501_v26 = vadd.f32 1.0, %v1870_v24 }
  0xa7   : > { %1871 = vpow2.f32 %v1760_v25 }
  0xa8   : > { %1873 = vrcp.f32 %v501_v26  ;;  %v528_v44 = vand.u32 2147483648, %v501_v26  ;;  %vm522_vm2 = vweird.f32 %v501_v26  ;;  %v526_v45 = vand.u32 2147483647, %v501_v26 }
  0xaa   : > { %v418_v27 = vpop.f32.mrf.mxu0  ;;  %v529_v54 = vor.u32 1.1754944e-38, %v528_v44  ;;  %vm527_vm5 = vcmp.eq.f32.partialorder %v526_v45, 8.507059e+37 }
  0xab   : > { %v2145_v28 = vadd.f32 %v2137_v15, %v418_v27 }
  0xad   : > { %v1872_v29 = vpop.eup %1871  ;;  %v1761_v30 = vmul.f32 -1.442695, %v2145_v28 }
  0xae   : > { %v1874_v31 = vpop.eup %1873  ;;  %v502_v32 = vadd.f32 1.0, %v1872_v29 }
  0xaf   : > { %v518_v33 = vmul.f32 %v1874_v31, %v501_v26  ;;  %1875 = vpow2.f32 %v1761_v30  ;;  %vm523_vm1 = vweird.f32 %v1874_v31 }
  0xb0   : > { %1877 = vrcp.f32 %v502_v32  ;;  %vm2161_vm3 = vmor %vm522_vm2, %vm523_vm1  ;;  %v541_v48 = vand.u32 2147483647, %v502_v32  ;;  %v543_v49 = vand.u32 2147483648, %v502_v32  ;;  %vm537_vm6 = vweird.f32 %v502_v32 }
  0xb1   : > { %v519_v34 = vsub.f32 1.0, %v518_v33 }
  0xb2   : > { %v420_v35 = vpop.f32.mrf.mxu0  ;;  %v544_v60 = vor.u32 1.1754944e-38, %v543_v49  ;;  %vm542_vm8 = vcmp.eq.f32.partialorder %v541_v48, 8.507059e+37 }
  0xb3   : > { %v520_v36 = vmul.f32 %v1874_v31, %v519_v34  ;;  %v2149_v37 = vadd.f32 %v2137_v15, %v420_v35 }
  0xb5   : > { %v1876_v38 = vpop.eup %1875  ;;  %v1762_v39 = vmul.f32 -1.442695, %v2149_v37  ;;  %v521_v42 = vadd.f32 %v1874_v31, %v520_v36 }
  0xb6   : > { %v1878_v40 = vpop.eup %1877  ;;  %v2158_v41 = vadd.f32 1.0, %v1876_v38  ;;  %v440_v38 = vpop.f32.mrf.mxu3 }
  0xb7   : > { %v533_v43 = vmul.f32 %v1878_v40, %v502_v32  ;;  %1879 = vpow2.f32 %v1762_v39  ;;  %v525_v51 = vsel %vm2161_vm3, %v1874_v31, %v521_v42  ;;  %vm538_vm4 = vweird.f32 %v1878_v40 }
  0xb8   : > { %1881 = vrcp.f32 %v2158_v41  ;;  %v530_v59 = vsel %vm527_vm5, %v529_v54, %v525_v51  ;;  %vm539_vm7 = vmor %vm537_vm6, %vm538_vm4  ;;  %v558_v16 = vand.u32 2147483648, %v2158_v41  ;;  %vm552_vm10 = vweird.f32 %v2158_v41 }
  0xb9   : > { %v534_v46 = vsub.f32 1.0, %v533_v43  ;;  %v757_v1 = vmul.f32 %v530_v59, %v2140_v18  ;;  %v556_v18 = vand.u32 2147483647, %v2158_v41  ;;  %v1769_v54 = vmul.f32 -1.442695, %v2200_v47 }
  0xba   : > { %v423_v50 = vpop.f32.mrf.mxu0  ;;  %v559_v27 = vor.u32 1.1754944e-38, %v558_v16  ;;  %v2210_v59 = vadd.f32 %v2137_v15, %v440_v38 }
  0xbb   : > { %v535_v52 = vmul.f32 %v1878_v40, %v534_v46  ;;  %v2168_v53 = vadd.f32 %v2137_v15, %v423_v50  ;;  %vm557_vm14 = vcmp.eq.f32.partialorder %v556_v18, 8.507059e+37 }
  0xbd   : > { %v1880_v55 = vpop.eup %1879  ;;  %v536_v56 = vadd.f32 %v1878_v40, %v535_v52  ;;  %v1763_v57 = vmul.f32 -1.442695, %v2168_v53 }
  0xbe   : > { %v1882_v58 = vpop.eup %1881  ;;  %v504_v61 = vadd.f32 1.0, %v1880_v55 }
  0xbf   : > { %v540_v62 = vsel %vm539_vm7, %v1878_v40, %v536_v56  ;;  %v548_v63 = vmul.f32 %v1882_v58, %v2158_v41  ;;  %1883 = vpow2.f32 %v1763_v57  ;;  %vm553_vm9 = vweird.f32 %v1882_v58  ;;  %v443_v56 = vpop.f32.mrf.mxu3 }
  0xc0   : > { %v545_v0 = vsel %vm542_vm8, %v544_v60, %v540_v62  ;;  %1885 = vrcp.f32 %v504_v61  ;;  %v573_v19 = vand.u32 2147483648, %v504_v61  ;;  %vm2183_vm11 = vmor %vm552_vm10, %vm553_vm9  ;;  %vm567_vm13 = vweird.f32 %v504_v61 }
  0xc1   : > { %v758_v2 = vmul.f32 %v545_v0, %v416_v23  ;;  %v549_v3 = vsub.f32 1.0, %v548_v63  ;;  %v571_v23 = vand.u32 2147483647, %v504_v61 }
  0xc2   : > { %v425_v4 = vpop.f32.mrf.mxu0  ;;  %v574_v31 = vor.u32 1.1754944e-38, %v573_v19 }
  0xc3   : > { %v2174_v5 = vadd.f32 %v2137_v15, %v425_v4  ;;  %v773_v6 = vpack.c.bf16 %v758_v2, %v757_v1  ;;  %v550_v7 = vmul.f32 %v1882_v58, %v549_v3  ;;  %vm572_vm0 = vcmp.eq.f32.partialorder %v571_v23, 8.507059e+37 }
  0xc5   : > { %v1884_v8 = vpop.eup %1883  ;;  %v1764_v9 = vmul.f32 -1.442695, %v2174_v5  ;;  %857 = vmatmul.bf16.vlgmr.msra.gmra.mxu1 %v773_v6  ;;  %v551_v14 = vadd.f32 %v1882_v58, %v550_v7  ;;  %v1770_v7 = vmul.f32 -1.442695, %v2210_v59 }
  0xc6   : > { %v1886_v11 = vpop.eup %1885  ;;  %v2177_v12 = vadd.f32 1.0, %v1884_v8 }
  0xc7   : > { %v563_v13 = vmul.f32 %v1886_v11, %v504_v61  ;;  %1887 = vpow2.f32 %v1764_v9  ;;  %vm568_vm12 = vweird.f32 %v1886_v11  ;;  %v555_v25 = vsel %vm2183_vm11, %v1882_v58, %v551_v14 }
  0xc8   : > { %1889 = vrcp.f32 %v2177_v12  ;;  %vm569_vm15 = vmor %vm567_vm13, %vm568_vm12  ;;  %v560_v34 = vsel %vm557_vm14, %v559_v27, %v555_v25  ;;  %vm582_vm2 = vweird.f32 %v2177_v12  ;;  %v586_v57 = vand.u32 2147483647, %v2177_v12 }
  0xc9   : > { %v564_v17 = vsub.f32 1.0, %v563_v13  ;;  %v759_v42 = vmul.f32 %v560_v34, %v2145_v28  ;;  %v588_v28 = vand.u32 2147483648, %v2177_v12  ;;  %v2237_v34 = vadd.f32 %v2137_v15, %v443_v56 }
  0xca   : > { %v428_v20 = vpop.f32.mrf.mxu0  ;;  %vm587_vm6 = vcmp.eq.f32.partialorder %v586_v57, 8.507059e+37 }
  0xcb   : > { %v565_v22 = vmul.f32 %v1886_v11, %v564_v17  ;;  %v2188_v24 = vadd.f32 %v2137_v15, %v428_v20  ;;  %v589_v2 = vor.u32 1.1754944e-38, %v588_v28  ;;  %v445_v20 = vpop.f32.mrf.mxu3 }
  0xcd   : > { %v1888_v26 = vpop.eup %1887  ;;  %v566_v29 = vadd.f32 %v1886_v11, %v565_v22  ;;  %v1765_v33 = vmul.f32 -1.442695, %v2188_v24 }
  0xce   : > { %v1890_v30 = vpop.eup %1889  ;;  %v506_v32 = vadd.f32 1.0, %v1888_v26 }
  0xcf   : > { %v570_v35 = vsel %vm569_vm15, %v1886_v11, %v566_v29  ;;  %v578_v36 = vmul.f32 %v1890_v30, %v2177_v12  ;;  %vm583_vm1 = vweird.f32 %v1890_v30 }
  0xd0   : > { %v575_v39 = vsel %vm572_vm0, %v574_v31, %v570_v35  ;;  %1891 = vrcp.f32 %v506_v32  ;;  %v603_v58 = vand.u32 2147483648, %v506_v32  ;;  %vm2212_vm3 = vmor %vm582_vm2, %vm583_vm1  ;;  %v601_v63 = vand.u32 2147483647, %v506_v32 }
  0xd1   : > { %v760_v40 = vmul.f32 %v575_v39, %v2149_v37  ;;  %v579_v41 = vsub.f32 1.0, %v578_v36  ;;  %1893 = vpow2.f32 %v1765_v33  ;;  %vm597_vm5 = vweird.f32 %v506_v32 }
  0xd2   : > { %v430_v43 = vpop.f32.mrf.mxu0  ;;  %v604_v6 = vor.u32 1.1754944e-38, %v603_v58  ;;  %vm602_vm8 = vcmp.eq.f32.partialorder %v601_v63, 8.507059e+37 }
  0xd3   : > { %v2197_v44 = vadd.f32 %v2137_v15, %v430_v43  ;;  %v580_v45 = vmul.f32 %v1890_v30, %v579_v41  ;;  %v774_v46 = vpack.c.bf16 %v760_v40, %v759_v42  ;;  %v2249_v41 = vadd.f32 %v2137_v15, %v445_v20 }
  0xd5   : > { %v1766_v48 = vmul.f32 -1.442695, %v2197_v44  ;;  %862 = vmatmul.bf16.gmra.mxu1 %v774_v46  ;;  %v581_v37 = vadd.f32 %v1890_v30, %v580_v45 }
  0xd6   : > { %v1892_v49 = vpop.eup %1891 }
  0xd7   : > { %v593_v50 = vmul.f32 %v1892_v49, %v506_v32  ;;  %v1894_v51 = vpop.eup %1893  ;;  %1895 = vpow2.f32 %v1766_v48  ;;  %vm598_vm4 = vweird.f32 %v1892_v49  ;;  %v585_v0 = vsel %vm2212_vm3, %v1890_v30, %v581_v37 }
  0xd8   : > { %v2205_v55 = vadd.f32 1.0, %v1894_v51  ;;  %vm599_vm7 = vmor %vm597_vm5, %vm598_vm4  ;;  %v590_v9 = vsel %vm587_vm6, %v589_v2, %v585_v0 }
  0xd9   : > { %v594_v52 = vsub.f32 1.0, %v593_v50  ;;  %v761_v16 = vmul.f32 %v590_v9, %v2168_v53  ;;  %v448_v50 = vpop.f32.mrf.mxu3 }
  0xda   : > { %v433_v60 = vpop.f32.mrf.mxu0  ;;  %1897 = vrcp.f32 %v2205_v55  ;;  %v618_v33 = vand.u32 2147483648, %v2205_v55  ;;  %vm612_vm10 = vweird.f32 %v2205_v55  ;;  %v616_v35 = vand.u32 2147483647, %v2205_v55 }
  0xdb   : > { %v595_v62 = vmul.f32 %v1892_v49, %v594_v52  ;;  %v2220_v1 = vadd.f32 %v2137_v15, %v433_v60  ;;  %1899 = vpow2.f32 %v1769_v54 }
  0xdc   : > { %v619_v48 = vor.u32 1.1754944e-38, %v618_v33  ;;  %vm617_vm13 = vcmp.eq.f32.partialorder %v616_v35, 8.507059e+37 }
  0xdd   : > { %v596_v3 = vadd.f32 %v1892_v49, %v595_v62  ;;  %v1896_v4 = vpop.eup %1895  ;;  %v1767_v8 = vmul.f32 -1.442695, %v2220_v1 }
  0xde   : > { %v508_v11 = vadd.f32 1.0, %v1896_v4 }
  0xdf   : > { %v600_v10 = vsel %vm599_vm7, %v1892_v49, %v596_v3  ;;  %1901 = vpow2.f32 %v1767_v8  ;;  %v1771_v49 = vmul.f32 -1.442695, %v2237_v34 }
  0xe0   : > { %v605_v12 = vsel %vm602_vm8, %v604_v6, %v600_v10  ;;  %v1898_v13 = vpop.eup %1897  ;;  %1903 = vrcp.f32 %v508_v11  ;;  %v633_v40 = vand.u32 2147483648, %v508_v11  ;;  %v631_v45 = vand.u32 2147483647, %v508_v11 }
  0xe1   : > { %v762_v14 = vmul.f32 %v605_v12, %v2174_v5  ;;  %v608_v17 = vmul.f32 %v1898_v13, %v2205_v55  ;;  %1905 = vpow2.f32 %v1770_v7  ;;  %v1900_v19 = vpop.eup %1899  ;;  %vm613_vm9 = vweird.f32 %v1898_v13  ;;  %v450_v9 = vpop.f32.mrf.mxu3 }
  0xe2   : > { %v435_v18 = vpop.f32.mrf.mxu0  ;;  %v2233_v32 = vadd.f32 1.0, %v1900_v19  ;;  %vm2242_vm11 = vmor %vm612_vm10, %vm613_vm9  ;;  %vm627_vm14 = vweird.f32 %v508_v11  ;;  %v634_v54 = vor.u32 1.1754944e-38, %v633_v40  ;;  %v1772_v55 = vmul.f32 -1.442695, %v2249_v41 }
  0xe3   : > { %v2228_v21 = vadd.f32 %v2137_v15, %v435_v18  ;;  %v609_v22 = vsub.f32 1.0, %v608_v17  ;;  %v775_v23 = vpack.c.bf16 %v762_v14, %v761_v16  ;;  %vm632_vm0 = vcmp.eq.f32.partialorder %v631_v45, 8.507059e+37 }
  0xe4   : > { %v2278_v18 = vadd.f32 %v2137_v15, %v448_v50  ;;  %v2281_v19 = vadd.f32 %v2137_v15, %v450_v9  ;;  %vm672_vm9 = vweird.f32 %v2233_v32  ;;  %v676_v45 = vand.u32 2147483647, %v2233_v32 }
  0xe5   : > { %v1768_v25 = vmul.f32 -1.442695, %v2228_v21  ;;  %v1902_v26 = vpop.eup %1901  ;;  %v610_v27 = vmul.f32 %v1898_v13, %v609_v22  ;;  %867 = vmatmul.bf16.gmra.mxu1 %v775_v23 }
  0xe6   : > { %v1904_v5 = vpop.eup %1903  ;;  %v2231_v29 = vadd.f32 1.0, %v1902_v26  ;;  %v1773_v15 = vmul.f32 -1.442695, %v2278_v18  ;;  %v1774_v33 = vmul.f32 -1.442695, %v2281_v19 }
  0xe7   : > { %1907 = vpow2.f32 %v1768_v25  ;;  %v1906_v53 = vpop.eup %1905  ;;  %v611_v30 = vadd.f32 %v1898_v13, %v610_v27  ;;  %v623_v31 = vmul.f32 %v1904_v5, %v508_v11  ;;  %vm628_vm12 = vweird.f32 %v1904_v5 }
  0xe8   : > { %1909 = vrcp.f32 %v2231_v29  ;;  %v2246_v39 = vadd.f32 1.0, %v1906_v53  ;;  %vm629_vm15 = vmor %vm627_vm14, %vm628_vm12  ;;  %vm642_vm2 = vweird.f32 %v2231_v29  ;;  %v646_v12 = vand.u32 2147483647, %v2231_v29 }
  0xe9   : > { %v624_v36 = vsub.f32 1.0, %v623_v31  ;;  %v615_v42 = vsel %vm2242_vm11, %v1898_v13, %v611_v30  ;;  %1911 = vrcp.f32 %v2233_v32 }
  0xea   : > { %v620_v52 = vsel %vm617_vm13, %v619_v48, %v615_v42  ;;  %1913 = vrcp.f32 %v2246_v39  ;;  %vm647_vm5 = vcmp.eq.f32.partialorder %v646_v12, 8.507059e+37  ;;  %vm687_vm11 = vweird.f32 %v2246_v39 }
  0xeb   : > { %v625_v43 = vmul.f32 %v1904_v5, %v624_v36  ;;  %v763_v60 = vmul.f32 %v620_v52, %v2188_v24 }
  0xed   : > { %v1908_v46 = vpop.eup %1907  ;;  %v626_v51 = vadd.f32 %v1904_v5, %v625_v43 }
  0xee   : > { %v510_v37 = vadd.f32 1.0, %v1908_v46  ;;  %v1910_v28 = vpop.eup %1909  ;;  %v678_v46 = vand.u32 2147483648, %v2233_v32 }
  0xef   : > { %v630_v56 = vsel %vm629_vm15, %v1904_v5, %v626_v51  ;;  %v638_v57 = vmul.f32 %v1910_v28, %v2231_v29  ;;  %v2260_v63 = vpop.eup %1911  ;;  %vm643_vm1 = vweird.f32 %v1910_v28  ;;  %vm677_vm15 = vcmp.eq.f32.partialorder %v676_v45, 8.507059e+37 }
  0xf0   : > { %1915 = vrcp.f32 %v510_v37  ;;  %v635_v58 = vsel %vm632_vm0, %v634_v54, %v630_v56  ;;  %v2262_v3 = vpop.eup %1913  ;;  %v668_v24 = vmul.f32 %v2260_v63, %v2233_v32  ;;  %vm2273_vm3 = vmor %vm642_vm2, %vm643_vm1  ;;  %v663_v17 = vand.u32 2147483648, %v510_v37 }
  0xf1   : > { %1917 = vpow2.f32 %v1771_v49  ;;  %v764_v61 = vmul.f32 %v635_v58, %v2197_v44  ;;  %v639_v62 = vsub.f32 1.0, %v638_v57  ;;  %v648_v44 = vand.u32 2147483648, %v2231_v29 }
  0xf2   : > { %1919 = vpow2.f32 %v1772_v55  ;;  %v683_v11 = vmul.f32 %v2262_v3, %v2246_v39  ;;  %v661_v23 = vand.u32 2147483647, %v510_v37  ;;  %v669_v25 = vsub.f32 1.0, %v668_v24 }
  0xf3   : > { %v640_v0 = vmul.f32 %v1910_v28, %v639_v62  ;;  %v776_v2 = vpack.c.bf16 %v764_v61, %v763_v60  ;;  %v649_v26 = vor.u32 1.1754944e-38, %v648_v44  ;;  %vm657_vm6 = vweird.f32 %v510_v37 }
  0xf4   : > { %v684_v5 = vsub.f32 1.0, %v683_v11  ;;  %v664_v30 = vor.u32 1.1754944e-38, %v663_v17  ;;  %vm662_vm8 = vcmp.eq.f32.partialorder %v661_v23, 8.507059e+37  ;;  %v670_v36 = vmul.f32 %v2260_v63, %v669_v25 }
  0xf5   : > { %872 = vmatmul.bf16.gmra.mxu1 %v776_v2  ;;  %v641_v7 = vadd.f32 %v1910_v28, %v640_v0  ;;  %vm673_vm10 = vweird.f32 %v2260_v63  ;;  %vm688_vm12 = vweird.f32 %v2262_v3 }
  0xf6   : > { %v1916_v4 = vpop.eup %1915  ;;  %v685_v38 = vmul.f32 %v2262_v3, %v684_v5  ;;  %v671_v49 = vadd.f32 %v2260_v63, %v670_v36  ;;  %vm2308_vm13 = vmor %vm672_vm9, %vm673_vm10 }
  0xf7   : > { %v1918_v6 = vpop.eup %1917  ;;  %v653_v8 = vmul.f32 %v1916_v4, %v510_v37  ;;  %v645_v20 = vsel %vm2273_vm3, %v1910_v28, %v641_v7  ;;  %vm658_vm4 = vweird.f32 %v1916_v4  ;;  %vm689_vm14 = vmor %vm687_vm11, %vm688_vm12  ;;  %v679_v28 = vor.u32 1.1754944e-38, %v678_v46 }
  0xf8   : > { %v1920_v10 = vpop.eup %1919  ;;  %v2271_v14 = vadd.f32 1.0, %v1918_v6  ;;  %v650_v53 = vsel %vm647_vm5, %v649_v26, %v645_v20  ;;  %vm659_vm7 = vmor %vm657_vm6, %vm658_vm4  ;;  %v686_v51 = vadd.f32 %v2262_v3, %v685_v38  ;;  %v675_v55 = vsel %vm2308_vm13, %v2260_v63, %v671_v49 }
  0xf9   : > { %v654_v13 = vsub.f32 1.0, %v653_v8  ;;  %v2285_v27 = vadd.f32 1.0, %v1920_v10  ;;  %v765_v40 = vmul.f32 %v650_v53, %v2220_v1  ;;  %v691_v1 = vand.u32 2147483647, %v2246_v39 }
  0xfa   : > { %1921 = vrcp.f32 %v2271_v14  ;;  %v690_v56 = vsel %vm689_vm14, %v2262_v3, %v686_v51  ;;  %v680_v60 = vsel %vm677_vm15, %v679_v28, %v675_v55  ;;  %vm702_vm1 = vweird.f32 %v2271_v14 }
  0xfb   : > { %v655_v22 = vmul.f32 %v1916_v4, %v654_v13  ;;  %1923 = vrcp.f32 %v2285_v27  ;;  %vm692_vm0 = vcmp.eq.f32.partialorder %v691_v1, 8.507059e+37  ;;  %v2333_v7 = vstv %s903_s26 }
  0xfc   : > { %1925 = vpow2.f32 %v1773_v15  ;;  %vm717_vm3 = vweird.f32 %v2285_v27  ;;  %v721_v9 = vand.u32 2147483647, %v2285_v27  ;;  %v723_v24 = vand.u32 2147483648, %v2285_v27 }
  0xfd   : > { %v656_v29 = vadd.f32 %v1916_v4, %v655_v22  ;;  %1927 = vpow2.f32 %v1774_v33 }
  0xfe   : > { %v724_v16 = vor.u32 1.1754944e-38, %v723_v24 }
  0xff   : > { %v660_v31 = vsel %vm659_vm7, %v1916_v4, %v656_v29  ;;  %v767_v4 = vmul.f32 %v680_v60, %v2200_v47  ;;  %v706_v47 = vand.u32 2147483647, %v2271_v14 }
 0x100   : > { %v665_v35 = vsel %vm662_vm8, %v664_v30, %v660_v31  ;;  %v1922_v48 = vpop.eup %1921  ;;  %vm722_vm8 = vcmp.eq.f32.partialorder %v721_v9, 8.507059e+37  ;;  %v2354_v30 = vstv %s900_s28 }
 0x101   : > { %v766_v42 = vmul.f32 %v665_v35, %v2228_v21  ;;  %v693_v21 = vand.u32 2147483648, %v2246_v39  ;;  %v1924_v37 = vpop.eup %1923  ;;  %v698_v57 = vmul.f32 %v1922_v48, %v2271_v14  ;;  %vm703_vm2 = vweird.f32 %v1922_v48 }
 0x102   : > { %v1926_v32 = vpop.eup %1925  ;;  %v713_v58 = vmul.f32 %v1924_v37, %v2285_v27  ;;  %vm718_vm4 = vweird.f32 %v1924_v37  ;;  %vm2342_vm5 = vmor %vm702_vm1, %vm703_vm2  ;;  %vm707_vm7 = vcmp.eq.f32.partialorder %v706_v47, 8.507059e+37 }
 0x103   : > { %v777_v43 = vpack.c.bf16 %v766_v42, %v765_v40  ;;  %v694_v52 = vor.u32 1.1754944e-38, %v693_v21  ;;  %v1928_v54 = vpop.eup %1927  ;;  %v2321_v39 = vadd.f32 1.0, %v1926_v32  ;;  %v699_v0 = vsub.f32 1.0, %v698_v57  ;;  %vm719_vm6 = vmor %vm717_vm3, %vm718_vm4 }
 0x104   : > { %v2323_v62 = vadd.f32 1.0, %v1928_v54  ;;  %v714_v2 = vsub.f32 1.0, %v713_v58  ;;  %v907_v42 = vlaneseq  ;;  %v968_v54 = vand.u32 2147483648, %v2333_v7 }
 0x105   : > { %877 = vmatmul.bf16.vlgmr.msra.gmra.mxu2 %v777_v43  ;;  %v695_v61 = vsel %vm692_vm0, %v694_v52, %v690_v56  ;;  %1929 = vrcp.f32 %v2321_v39  ;;  %v700_v3 = vmul.f32 %v1922_v48, %v699_v0  ;;  %vm732_vm9 = vweird.f32 %v2321_v39 }
 0x106   : > { %v768_v63 = vmul.f32 %v695_v61, %v2210_v59  ;;  %1931 = vrcp.f32 %v2323_v62  ;;  %v715_v6 = vmul.f32 %v1924_v37, %v714_v2  ;;  %v708_v59 = vand.u32 2147483648, %v2271_v14 }
 0x107   : > { %v701_v10 = vadd.f32 %v1922_v48, %v700_v3  ;;  %1933 = vrcp.f32 %v2333_v7  ;;  %v736_v36 = vand.u32 2147483647, %v2321_v39  ;;  %v738_v40 = vand.u32 2147483648, %v2321_v39 }
 0x108   : > { %v778_v8 = vpack.c.bf16 %v768_v63, %v767_v4  ;;  %v716_v12 = vadd.f32 %v1924_v37, %v715_v6  ;;  %v709_v14 = vor.u32 1.1754944e-38, %v708_v59  ;;  %1935 = vrcp.f32 %v2354_v30 }
 0x109   : > { %v705_v17 = vsel %vm2342_vm5, %v1922_v48, %v701_v10  ;;  %vm747_vm11 = vweird.f32 %v2323_v62  ;;  %v751_v1 = vand.u32 2147483647, %v2323_v62  ;;  %vm2376_vm15 = vcmp.eq.f32.partialorder %v736_v36, 8.507059e+37 }
 0x10a   : > { %v720_v20 = vsel %vm719_vm6, %v1924_v37, %v716_v12  ;;  %v710_v26 = vsel %vm707_vm7, %v709_v14, %v705_v17  ;;  %v739_v51 = vor.u32 1.1754944e-38, %v738_v40  ;;  %v2381_v32 = vshrl.u32 %v907_v42, 7  ;;  %v2452_v40 = vld [vmem:[%s2156_s21] ss:$0 sm:$0xff] }
 0x10b   : > { %v2340_v44 = vpop.eup %1929  ;;  %v725_v27 = vsel %vm722_vm8, %v724_v16, %v720_v20  ;;  %v769_v15 = vmul.f32 %v710_v26, %v2237_v34  ;;  %vm962_vm0 = vweird.f32 %v2333_v7  ;;  %vm752_vm2 = vcmp.eq.f32.partialorder %v751_v1, 8.507059e+37 }
 0x10c   : > { %v1932_v13 = vpop.eup %1931  ;;  %v728_v22 = vmul.f32 %v2340_v44, %v2321_v39  ;;  %v770_v31 = vmul.f32 %v725_v27, %v2249_v41  ;;  %vm733_vm10 = vweird.f32 %v2340_v44  ;;  %v753_v41 = vand.u32 2147483648, %v2323_v62 }
 0x10d   : > { %v743_v23 = vmul.f32 %v1932_v13, %v2323_v62  ;;  %v1934_v25 = vpop.eup %1933  ;;  %vm748_vm12 = vweird.f32 %v1932_v13  ;;  %vm2367_vm13 = vmor %vm732_vm9, %vm733_vm10  ;;  %v966_v56 = vand.u32 2147483647, %v2333_v7  ;;  %v2393_v58 = vadd.s32 8, %v2381_v32 }
 0x10e   : > { %v729_v5 = vsub.f32 1.0, %v728_v22  ;;  %v958_v53 = vmul.f32 %v1934_v25, %v2333_v7  ;;  %v779_v34 = vpack.c.bf16 %v770_v31, %v769_v15  ;;  %vm2372_vm14 = vmor %vm747_vm11, %vm748_vm12  ;;  %v1936_v49 = vpop.eup %1935  ;;  %v754_v37 = vor.u32 1.1754944e-38, %v753_v41 }
 0x10f   : > { %v744_v29 = vsub.f32 1.0, %v743_v23  ;;  %vm963_vm1 = vweird.f32 %v1934_v25  ;;  %v1053_v57 = vmul.f32 %v1936_v49, %v2354_v30  ;;  %v2400_v60 = vadd.s32 16, %v2381_v32 }
 0x110   : > { %v730_v33 = vmul.f32 %v2340_v44, %v729_v5  ;;  %v959_v38 = vsub.f32 1.0, %v958_v53  ;;  %vm2395_vm3 = vmor %vm962_vm0, %vm963_vm1  ;;  %v924_v0 = vcvt.s32.f32 %v2381_v32  ;;  %v969_v2 = vor.u32 1.1754944e-38, %v968_v54 }
 0x111   : > { %v745_v35 = vmul.f32 %v1932_v13, %v744_v29  ;;  %vm967_vm4 = vcmp.eq.f32.partialorder %v966_v56, 8.507059e+37  ;;  %v1054_v63 = vsub.f32 1.0, %v1053_v57  ;;  %v925_v3 = vcvt.s32.f32 %v2393_v58 }
 0x112   : > { %v731_v43 = vadd.f32 %v2340_v44, %v730_v33  ;;  %v960_v48 = vmul.f32 %v1934_v25, %v959_v38  ;;  %v926_v47 = vcvt.s32.f32 %v2400_v60  ;;  %v940_v59 = vadd.f32 0.5, %v924_v0 }
 0x113   : > { %v746_v46 = vadd.f32 %v1932_v13, %v745_v35  ;;  %v2414_v9 = vadd.s32 24, %v2381_v32  ;;  %v941_v10 = vadd.f32 0.5, %v925_v3  ;;  %vm1057_vm5 = vweird.f32 %v2354_v30 }
 0x114   : > { %v735_v28 = vsel %vm2367_vm13, %v2340_v44, %v731_v43  ;;  %v961_v55 = vadd.f32 %v1934_v25, %v960_v48  ;;  %v1055_v44 = vmul.f32 %v1936_v49, %v1054_v63  ;;  %vm1058_vm6 = vweird.f32 %v1936_v49 }
 0x115   : > { %882 = vmatmul.bf16.gmra.mxu2 %v778_v8  ;;  %v750_v52 = vsel %vm2372_vm14, %v1932_v13, %v746_v46  ;;  %v740_v61 = vsel %vm2376_vm15, %v739_v51, %v735_v28  ;;  %v927_v12 = vcvt.s32.f32 %v2414_v9  ;;  %v1063_v13 = vand.u32 2147483648, %v2354_v30  ;;  %vm1059_vm7 = vmor %vm1057_vm5, %vm1058_vm6 }
 0x116   : > { %v755_v62 = vsel %vm752_vm2, %v754_v37, %v750_v52  ;;  %v965_v4 = vsel %vm2395_vm3, %v1934_v25, %v961_v55  ;;  %v771_v6 = vmul.f32 %v740_v61, %v2278_v18  ;;  %v942_v18 = vadd.f32 0.5, %v926_v47 }
 0x117   : > { %v772_v8 = vmul.f32 %v755_v62, %v2281_v19  ;;  %v2416_v24 = vsel %vm967_vm4, %v969_v2, %v965_v4  ;;  %v2427_v14 = vadd.s32 32, %v2381_v32  ;;  %v1056_v16 = vadd.f32 %v1936_v49, %v1055_v44 }
 0x118   : > { %v971_v19 = vmul.f32 %v2416_v24, %v940_v59  ;;  %v1061_v17 = vand.u32 2147483647, %v2354_v30  ;;  %v972_v20 = vmul.f32 %v2416_v24, %v941_v10  ;;  %v973_v22 = vmul.f32 %v2416_v24, %v942_v18 }
 0x119   : > { %v780_v11 = vpack.c.bf16 %v772_v8, %v771_v6  ;;  %v943_v25 = vadd.f32 0.5, %v927_v12  ;;  %v1064_v26 = vor.u32 1.1754944e-38, %v1063_v13  ;;  %v928_v27 = vcvt.s32.f32 %v2427_v14 }
 0x11a   : > { %v2432_v23 = vfloor.f32 %v971_v19  ;;  %v1060_v5 = vsel %vm1059_vm7, %v1936_v49, %v1056_v16  ;;  %vm1062_vm8 = vcmp.eq.f32.partialorder %v1061_v17, 8.507059e+37  ;;  %v2437_v29 = vfloor.f32 %v972_v20 }
 0x11b   : > { %v2439_v53 = vfloor.f32 %v973_v22  ;;  %v2442_v15 = vadd.s32 40, %v2381_v32  ;;  %v974_v33 = vmul.f32 %v2416_v24, %v943_v25  ;;  %v2446_v35 = vsel %vm1062_vm8, %v1064_v26, %v1060_v5 }
 0x11c   : > { %v1035_v31 = vadd.f32 0.5, %v2432_v23  ;;  %v944_v36 = vadd.f32 0.5, %v928_v27  ;;  %v1036_v38 = vadd.f32 0.5, %v2437_v29  ;;  %v2468_v51 = vadd.s32 48, %v2381_v32 }
 0x11d   : > { %v929_v41 = vcvt.s32.f32 %v2442_v15  ;;  %v2457_v45 = vfloor.f32 %v974_v33  ;;  %v2479_v62 = vand.u32 127, %v907_v42  ;;  %v1003_v59 = vmul.f32 %v2432_v23, %v2333_v7 }
 0x11e   : > { %v1066_v43 = vmul.f32 %v2446_v35, %v1035_v31  ;;  %v975_v46 = vmul.f32 %v2416_v24, %v944_v36  ;;  %v1067_v21 = vmul.f32 %v2446_v35, %v1036_v38  ;;  %v930_v56 = vcvt.s32.f32 %v2468_v51 }
 0x11f   : > { %v945_v50 = vadd.f32 0.5, %v929_v41  ;;  %v1038_v28 = vadd.f32 0.5, %v2457_v45  ;;  %vm1133_vm9 = vcmp.eq.s32.totalorder %v2479_v62, 1  ;;  %v1004_v19 = vmul.f32 %v2437_v29, %v2333_v7 }
 0x120   : > { %v1082_v37 = vfloor.f32 %v1066_v43  ;;  %v2472_v54 = vfloor.f32 %v975_v46  ;;  %v1083_v55 = vfloor.f32 %v1067_v21  ;;  %v946_v63 = vadd.f32 0.5, %v930_v56 }
 0x121   : > { %v976_v39 = vmul.f32 %v2416_v24, %v945_v50  ;;  %v1069_v2 = vmul.f32 %v2446_v35, %v1038_v28  ;;  %v1005_v25 = vmul.f32 %v2439_v53, %v2333_v7  ;;  %vm1132_vm10 = vcmp.eq.s32.totalorder %v2479_v62, 0 }
 0x122   : > { %v1098_v61 = vmul.f32 %v1082_v37, %v2354_v30  ;;  %v1039_v4 = vadd.f32 0.5, %v2472_v54  ;;  %v1099_v8 = vmul.f32 %v1083_v55, %v2354_v30  ;;  %v977_v17 = vmul.f32 %v2416_v24, %v946_v63 }
 0x123   : > { %v2494_v10 = vfloor.f32 %v976_v39  ;;  %v1085_v18 = vfloor.f32 %v1069_v2  ;;  %v1021_v43 = vsub.f32 %v926_v47, %v1005_v25  ;;  %v2528_v46 = vadd.s32 56, %v2381_v32 }
 0x124   : > { %v1070_v16 = vmul.f32 %v2446_v35, %v1039_v4  ;;  %v1115_v22 = vsub.f32 %v2437_v29, %v1099_v8  ;;  %v2520_v38 = vfloor.f32 %v977_v17  ;;  %v1006_v50 = vmul.f32 %v2457_v45, %v2333_v7 }
 0x125   : > { %887 = vmatmul.bf16.gmra.mxu2 %v779_v34  ;;  %v1037_v34 = vadd.f32 0.5, %v2439_v53  ;;  %v1040_v31 = vadd.f32 0.5, %v2494_v10  ;;  %v1101_v29 = vmul.f32 %v1085_v18, %v2354_v30  ;;  %v2541_v47 = vstv %s906_s7 }
 0x126   : > { %v1086_v36 = vfloor.f32 %v1070_v16  ;;  %v1007_v63 = vmul.f32 %v2472_v54, %v2333_v7  ;;  %vm1551_vm11 = vcmp.lt.s32.totalorder %v2479_v62, 2  ;;  %vm1552_vm12 = vcmp.lt.s32.totalorder %v2479_v62, 4 }
 0x127   : > { %v1068_v49 = vmul.f32 %v2446_v35, %v1037_v34  ;;  %v1135_v34 = vsel %vm1133_vm9, %v1115_v22, 0.0  ;;  %v1071_v58 = vmul.f32 %v2446_v35, %v1040_v31  ;;  %v1117_v60 = vsub.f32 %v2457_v45, %v1101_v29 }
 0x128   : > { %v1102_v28 = vmul.f32 %v1086_v36, %v2354_v30  ;;  %v2579_v17 = vsub.f32 %v928_v27, %v1007_v63  ;;  %v1008_v14 = vmul.f32 %v2494_v10, %v2333_v7 }
 0x129   : > { %v1084_v57 = vfloor.f32 %v1068_v49 }
 0x12b   : > { %v1100_v42 = vmul.f32 %v1084_v57, %v2354_v30 }
 0x12d   : > { %v1116_v5 = vsub.f32 %v2439_v53, %v1100_v42  ;;  %v2566_v42 = vsel %vm1133_vm9, %v1117_v60, 0.0 }
 0x12f   : > { %v1136_v21 = vsel %vm1133_vm9, %v1116_v5, 0.0 }
 0x130   : > { %v2549_v57 = vsel %vm1132_vm10, %v1021_v43, %v1136_v21 }
 0x135   : > { %892 = vmatmul.bf16.gmra.mxu2 %v780_v11  ;;  %v1114_v11 = vsub.f32 %v2432_v23, %v1098_v61  ;;  %v1019_v23 = vsub.f32 %v924_v0, %v1003_v59  ;;  %v1020_v0 = vsub.f32 %v925_v3, %v1004_v19  ;;  %v931_v61 = vcvt.s32.f32 %v2528_v46 }
 0x136   : > { %v2562_v59 = vsub.f32 %v927_v12, %v1006_v50 }
 0x137   : > { %v1134_v33 = vsel %vm1133_vm9, %v1114_v11, 0.0  ;;  %v1151_v37 = vsel %vm1132_vm10, %v1020_v0, %v1135_v34  ;;  %v1118_v11 = vsub.f32 %v2472_v54, %v1102_v28  ;;  %v947_v9 = vadd.f32 0.5, %v931_v61 }
 0x138   : > { %v1150_v3 = vsel %vm1132_vm10, %v1019_v23, %v1134_v33  ;;  %v1153_v51 = vsel %vm1132_vm10, %v2562_v59, %v2566_v42 }
 0x139   : > { %v2588_v5 = vsel %vm1133_vm9, %v1118_v11, 0.0  ;;  %v978_v29 = vmul.f32 %v2416_v24, %v947_v9  ;;  %v1024_v11 = vsub.f32 %v929_v41, %v1008_v14 }
 0x13b   : > { %v2615_v28 = vfloor.f32 %v978_v29 }
 0x13d   : > { %v1042_v41 = vadd.f32 0.5, %v2615_v28 }
 0x142   : > { %v858_v1 = vpop.f32.mrf.mxu1 }
 0x143   : > { %v2462_v48 = vadd.f32 %v2452_v40, %v858_v1 }
 0x145   : > { %v1808_v52 = vmul.f32 -1.442695, %v2462_v48  ;;  %v1199_v53 = vmul.f32 1.442695, %v2462_v48  ;;  %v1166_v2 = vadd.f32 %v1150_v3, %v2462_v48 }
 0x147   : > { %1937 = vpow2.f32 %v1808_v52  ;;  %v1041_v52 = vadd.f32 0.5, %v2520_v38  ;;  %v1183_v12 = vmul.f32 %v2541_v47, %v1166_v2 }
 0x149   : > { %v1072_v18 = vmul.f32 %v2446_v35, %v1041_v52 }
 0x14a   : > { %v860_v6 = vpop.f32.mrf.mxu1 }
 0x14b   : > { %v2491_v44 = vadd.f32 %v2452_v40, %v860_v6  ;;  %v1087_v6 = vfloor.f32 %v1071_v58  ;;  %v1088_v27 = vfloor.f32 %v1072_v18 }
 0x14d   : > { %v1809_v13 = vmul.f32 -1.442695, %v2491_v44  ;;  %v1938_v20 = vpop.eup %1937  ;;  %v1201_v48 = vmul.f32 1.442695, %v2491_v44  ;;  %v1103_v54 = vmul.f32 %v1087_v6, %v2354_v30  ;;  %v1167_v34 = vadd.f32 %v1151_v37, %v2491_v44 }
 0x14e   : > { %v2508_v26 = vadd.f32 1.0, %v1938_v20  ;;  %v1104_v44 = vmul.f32 %v1088_v27, %v2354_v30 }
 0x14f   : > { %1939 = vpow2.f32 %v1809_v13  ;;  %v1119_v43 = vsub.f32 %v2494_v10, %v1103_v54  ;;  %v2611_v10 = vadd.s32 64, %v2381_v32 }
 0x150   : > { %1941 = vrcp.f32 %v2508_v26  ;;  %v1322_v13 = vand.u32 2147483648, %v2508_v26  ;;  %v1320_v25 = vand.u32 2147483647, %v2508_v26  ;;  %vm1316_vm14 = vweird.f32 %v2508_v26 }
 0x151   : > { %1943 = vpow2.f32 %v1199_v53  ;;  %v1139_v18 = vsel %vm1133_vm9, %v1119_v43, 0.0 }
 0x152   : > { %v863_v1 = vpop.f32.mrf.mxu1  ;;  %v1323_v53 = vor.u32 1.1754944e-38, %v1322_v13  ;;  %vm1321_vm0 = vcmp.eq.f32.partialorder %v1320_v25, 8.507059e+37  ;;  %v1120_v13 = vsub.f32 %v2520_v38, %v1104_v44 }
 0x153   : > { %v2536_v49 = vadd.f32 %v2452_v40, %v863_v1 }
 0x155   : > { %v1940_v55 = vpop.eup %1939  ;;  %v1810_v39 = vmul.f32 -1.442695, %v2536_v49  ;;  %v1168_v54 = vadd.f32 %v2549_v57, %v2536_v49 }
 0x156   : > { %v1942_v45 = vpop.eup %1941  ;;  %v2554_v4 = vadd.f32 1.0, %v1940_v55 }
 0x157   : > { %v1312_v8 = vmul.f32 %v1942_v45, %v2508_v26  ;;  %v1944_v20 = vpop.eup %1943  ;;  %vm1317_vm13 = vweird.f32 %v1942_v45  ;;  %v1009_v26 = vmul.f32 %v2520_v38, %v2333_v7 }
 0x158   : > { %1945 = vrcp.f32 %v2554_v4  ;;  %v1231_v36 = vmul.f32 %v1944_v20, %v2541_v47  ;;  %vm1318_vm15 = vmor %vm1316_vm14, %vm1317_vm13  ;;  %v1335_v6 = vand.u32 2147483647, %v2554_v4  ;;  %vm1331_vm2 = vweird.f32 %v2554_v4 }
 0x159   : > { %v1313_v19 = vsub.f32 1.0, %v1312_v8  ;;  %1947 = vpow2.f32 %v1810_v39  ;;  %v1337_v39 = vand.u32 2147483648, %v2554_v4  ;;  %v1025_v25 = vsub.f32 %v930_v56, %v1009_v26 }
 0x15a   : > { %v865_v16 = vpop.f32.mrf.mxu1  ;;  %1949 = vpow2.f32 %v1201_v48  ;;  %v1184_v48 = vmul.f32 %v2541_v47, %v1167_v34  ;;  %vm1336_vm4 = vcmp.eq.f32.partialorder %v1335_v6, 8.507059e+37  ;;  %v1140_v56 = vsel %vm1133_vm9, %v1120_v13, 0.0 }
 0x15b   : > { %v1314_v22 = vmul.f32 %v1942_v45, %v1313_v19  ;;  %v2584_v23 = vadd.f32 %v2452_v40, %v865_v16  ;;  %v932_v19 = vcvt.s32.f32 %v2611_v10  ;;  %v1338_v16 = vor.u32 1.1754944e-38, %v1337_v39 }
 0x15c   : > { %v1185_v34 = vmul.f32 %v2541_v47, %v1168_v54  ;;  %v1010_v26 = vmul.f32 %v2615_v28, %v2333_v7 }
 0x15d   : > { %v1315_v31 = vadd.f32 %v1942_v45, %v1314_v22  ;;  %v1811_v33 = vmul.f32 -1.442695, %v2584_v23  ;;  %v1205_v59 = vmul.f32 1.442695, %v2584_v23  ;;  %v1169_v44 = vadd.f32 %v1153_v51, %v2584_v23 }
 0x15e   : > { %v1946_v0 = vpop.eup %1945 }
 0x15f   : > { %v1948_v1 = vpop.eup %1947  ;;  %v1319_v21 = vsel %vm1318_vm15, %v1942_v45, %v1315_v31  ;;  %v1327_v58 = vmul.f32 %v1946_v0, %v2554_v4  ;;  %1951 = vpow2.f32 %v1811_v33  ;;  %v1203_v45 = vmul.f32 1.442695, %v2536_v49 }
 0x160   : > { %v1324_v3 = vsel %vm1321_vm0, %v1323_v53, %v1319_v21  ;;  %v2607_v50 = vadd.f32 1.0, %v1948_v1  ;;  %v1950_v52 = vpop.eup %1949  ;;  %vm1332_vm1 = vweird.f32 %v1946_v0  ;;  %v948_v49 = vadd.f32 0.5, %v932_v19 }
 0x161   : > { %v1553_v60 = vsel %vm1552_vm12, %v1231_v36, %v1324_v3  ;;  %v1328_v37 = vsub.f32 1.0, %v1327_v58  ;;  %v1232_v9 = vmul.f32 %v1950_v52, %v2541_v47  ;;  %vm1333_vm3 = vmor %vm1331_vm2, %vm1332_vm1  ;;  %v1154_v33 = vsel %vm1132_vm10, %v2579_v17, %v2588_v5 }
 0x162   : > { %v1569_v55 = vsel %vm1551_vm11, %v1183_v12, %v1553_v60  ;;  %1953 = vrcp.f32 %v2607_v50  ;;  %v868_v2 = vpop.f32.mrf.mxu1  ;;  %v2670_v53 = vsel %vm1132_vm10, %v1024_v11, %v1139_v18  ;;  %v1352_v43 = vand.u32 2147483648, %v2607_v50 }
 0x163   : > { %1585 = vst [vmem:[%s2605_s10] sm:$0xff] %v1569_v55  ;;  %v1329_v63 = vmul.f32 %v1946_v0, %v1328_v37  ;;  %v2625_v8 = vadd.f32 %v2452_v40, %v868_v2  ;;  %1955 = vpow2.f32 %v1203_v45  ;;  %v2676_v17 = vsel %vm1132_vm10, %v1025_v25, %v1140_v56 }
 0x164   : > { %v979_v5 = vmul.f32 %v2416_v24, %v948_v49  ;;  %v1350_v58 = vand.u32 2147483647, %v2607_v50  ;;  %v2685_v52 = vadd.s32 72, %v2381_v32  ;;  %vm1346_vm6 = vweird.f32 %v2607_v50 }
 0x165   : > { %v1330_v12 = vadd.f32 %v1946_v0, %v1329_v63  ;;  %v1812_v15 = vmul.f32 -1.442695, %v2625_v8  ;;  %v1952_v20 = vpop.eup %1951  ;;  %v1353_v63 = vor.u32 1.1754944e-38, %v1352_v43 }
 0x166   : > { %v2642_v38 = vadd.f32 1.0, %v1952_v20  ;;  %v2691_v6 = vfloor.f32 %v979_v5  ;;  %vm1351_vm8 = vcmp.eq.f32.partialorder %v1350_v58, 8.507059e+37  ;;  %v1186_v20 = vmul.f32 %v2541_v47, %v1169_v44 }
 0x167   : > { %v1334_v22 = vsel %vm1333_vm3, %v1946_v0, %v1330_v12  ;;  %1957 = vpow2.f32 %v1812_v15  ;;  %v1073_v0 = vmul.f32 %v2446_v35, %v1042_v41  ;;  %v933_v12 = vcvt.s32.f32 %v2685_v52 }
 0x168   : > { %v1954_v4 = vpop.eup %1953  ;;  %v1339_v14 = vsel %vm1336_vm4, %v1338_v16, %v1334_v22  ;;  %1959 = vrcp.f32 %v2642_v38  ;;  %v1367_v46 = vand.u32 2147483648, %v2642_v38  ;;  %vm1361_vm14 = vweird.f32 %v2642_v38 }
 0x169   : > { %v1554_v57 = vsel %vm1552_vm12, %v1232_v9, %v1339_v14  ;;  %v1342_v27 = vmul.f32 %v1954_v4, %v2607_v50  ;;  %v1956_v1 = vpop.eup %1955  ;;  %vm1347_vm5 = vweird.f32 %v1954_v4  ;;  %v1089_v37 = vfloor.f32 %v1073_v0 }
 0x16a   : > { %v1570_v31 = vsel %vm1551_vm11, %v1184_v48, %v1554_v57  ;;  %v870_v29 = vpop.f32.mrf.mxu1  ;;  %1961 = vpow2.f32 %v1205_v59  ;;  %v1233_v2 = vmul.f32 %v1956_v1, %v2541_v47  ;;  %vm1348_vm7 = vmor %vm1346_vm6, %vm1347_vm5  ;;  %v1207_v50 = vmul.f32 1.442695, %v2625_v8 }
 0x16b   : > { %1586 = vst [vmem:[%s2605_s10 + $0x8] sm:$0xff] %v1570_v31  ;;  %v1343_v36 = vsub.f32 1.0, %v1342_v27  ;;  %v2666_v42 = vadd.f32 %v2452_v40, %v870_v29  ;;  %v2698_v9 = vsub.f32 %v931_v61, %v1010_v26  ;;  %v2707_v15 = vmul.f32 %v1089_v37, %v2354_v30 }
 0x16c   : > { %v1043_v61 = vadd.f32 0.5, %v2691_v6  ;;  %v1170_v57 = vadd.f32 %v1154_v33, %v2625_v8  ;;  %v949_v51 = vadd.f32 0.5, %v933_v12  ;;  %v2725_v0 = vadd.s32 80, %v2381_v32 }
 0x16d   : > { %v1344_v21 = vmul.f32 %v1954_v4, %v1343_v36  ;;  %v1958_v3 = vpop.eup %1957  ;;  %v1813_v60 = vmul.f32 -1.442695, %v2666_v42  ;;  %v1209_v27 = vmul.f32 1.442695, %v2666_v42  ;;  %v1368_v59 = vor.u32 1.1754944e-38, %v1367_v46 }
 0x16e   : > { %v2688_v39 = vadd.f32 1.0, %v1958_v3  ;;  %v1960_v45 = vpop.eup %1959  ;;  %v980_v1 = vmul.f32 %v2416_v24, %v949_v51  ;;  %v934_v3 = vcvt.s32.f32 %v2725_v0 }
 0x16f   : > { %v1345_v55 = vadd.f32 %v1954_v4, %v1344_v21  ;;  %1963 = vpow2.f32 %v1813_v60  ;;  %v1357_v48 = vmul.f32 %v1960_v45, %v2642_v38  ;;  %vm1362_vm13 = vweird.f32 %v1960_v45 }
 0x170   : > { %1965 = vrcp.f32 %v2688_v39  ;;  %v1962_v22 = vpop.eup %1961  ;;  %vm1363_vm15 = vmor %vm1361_vm14, %vm1362_vm13  ;;  %v1382_v58 = vand.u32 2147483648, %v2688_v39  ;;  %vm1376_vm2 = vweird.f32 %v2688_v39 }
 0x171   : > { %v1349_v23 = vsel %vm1348_vm7, %v1954_v4, %v1345_v55  ;;  %v1358_v16 = vsub.f32 1.0, %v1357_v48  ;;  %v1365_v4 = vand.u32 2147483647, %v2642_v38  ;;  %1967 = vpow2.f32 %v1207_v50 }
 0x172   : > { %v1354_v11 = vsel %vm1351_vm8, %v1353_v63, %v1349_v23  ;;  %v873_v18 = vpop.f32.mrf.mxu1  ;;  %v1234_v36 = vmul.f32 %v1962_v22, %v2541_v47  ;;  %v1380_v55 = vand.u32 2147483647, %v2688_v39  ;;  %v1011_v50 = vmul.f32 %v2691_v6, %v2333_v7 }
 0x173   : > { %v1555_v13 = vsel %vm1552_vm12, %v1233_v2, %v1354_v11  ;;  %v2704_v54 = vadd.f32 %v2452_v40, %v873_v18  ;;  %v1359_v25 = vmul.f32 %v1960_v45, %v1358_v16  ;;  %vm1366_vm0 = vcmp.eq.f32.partialorder %v1365_v4, 8.507059e+37 }
 0x174   : > { %v1571_v41 = vsel %vm1551_vm11, %v1185_v34, %v1555_v13  ;;  %v1074_v34 = vmul.f32 %v2446_v35, %v1043_v61  ;;  %v1121_v2 = vsub.f32 %v2615_v28, %v2707_v15  ;;  %v2750_v18 = vfloor.f32 %v980_v1 }
 0x175   : > { %1587 = vst [vmem:[%s2605_s10 + $0x10] sm:$0xff] %v1571_v41  ;;  %v1814_v14 = vmul.f32 -1.442695, %v2704_v54  ;;  %v1964_v49 = vpop.eup %1963  ;;  %v1360_v31 = vadd.f32 %v1960_v45, %v1359_v25  ;;  %v1383_v41 = vor.u32 1.1754944e-38, %v1382_v58  ;;  %v950_v28 = vadd.f32 0.5, %v934_v3 }
 0x176   : > { %v1966_v56 = vpop.eup %1965  ;;  %v2722_v29 = vadd.f32 1.0, %v1964_v49  ;;  %v1090_v23 = vfloor.f32 %v1074_v34  ;;  %vm1381_vm4 = vcmp.eq.f32.partialorder %v1380_v55, 8.507059e+37  ;;  %v1171_v22 = vadd.f32 %v2670_v53, %v2666_v42 }
 0x177   : > { %v1372_v8 = vmul.f32 %v1966_v56, %v2688_v39  ;;  %1969 = vpow2.f32 %v1814_v14  ;;  %v1364_v33 = vsel %vm1363_vm15, %v1960_v45, %v1360_v31  ;;  %v1968_v44 = vpop.eup %1967  ;;  %vm1377_vm1 = vweird.f32 %v1966_v56 }
 0x178   : > { %1971 = vrcp.f32 %v2722_v29  ;;  %v1369_v38 = vsel %vm1366_vm0, %v1368_v59, %v1364_v33  ;;  %v1187_v45 = vmul.f32 %v2541_v47, %v1170_v57  ;;  %v1235_v16 = vmul.f32 %v1968_v44, %v2541_v47  ;;  %vm1378_vm3 = vmor %vm1376_vm2, %vm1377_vm1 }
 0x179   : > { %v1373_v43 = vsub.f32 1.0, %v1372_v8  ;;  %1973 = vpow2.f32 %v1209_v27  ;;  %v1556_v21 = vsel %vm1552_vm12, %v1234_v36, %v1369_v38  ;;  %v1106_v25 = vmul.f32 %v1090_v23, %v2354_v30 }
 0x17a   : > { %v875_v5 = vpop.f32.mrf.mxu1  ;;  %v1572_v60 = vsel %vm1551_vm11, %v1186_v20, %v1556_v21  ;;  %v1211_v49 = vmul.f32 1.442695, %v2704_v54  ;;  %v1044_v57 = vadd.f32 0.5, %v2750_v18  ;;  %v1395_v51 = vand.u32 2147483647, %v2722_v29 }
 0x17b   : > { %v2736_v26 = vadd.f32 %v2452_v40, %v875_v5  ;;  %v1374_v37 = vmul.f32 %v1966_v56, %v1373_v43  ;;  %1588 = vst [vmem:[%s2605_s10 + $0x18] sm:$0xff] %v1572_v60  ;;  %v981_v42 = vmul.f32 %v2416_v24, %v950_v28  ;;  %v1141_v31 = vsel %vm1133_vm9, %v1121_v2, 0.0 }
 0x17c   : > { %v2775_v36 = vadd.s32 88, %v2381_v32  ;;  %v1188_v59 = vmul.f32 %v2541_v47, %v1171_v22  ;;  %v1027_v33 = vsub.f32 %v932_v19, %v1011_v50  ;;  %v1122_v34 = vsub.f32 %v2691_v6, %v1106_v25 }
 0x17d   : > { %v1815_v63 = vmul.f32 -1.442695, %v2736_v26  ;;  %v1970_v48 = vpop.eup %1969  ;;  %v1375_v11 = vadd.f32 %v1966_v56, %v1374_v37  ;;  %vm1391_vm6 = vweird.f32 %v2722_v29  ;;  %v1075_v5 = vmul.f32 %v2446_v35, %v1044_v57 }
 0x17e   : > { %v1972_v13 = vpop.eup %1971  ;;  %v2753_v20 = vadd.f32 1.0, %v1970_v48  ;;  %vm1396_vm8 = vcmp.eq.f32.partialorder %v1395_v51, 8.507059e+37  ;;  %v2786_v60 = vfloor.f32 %v981_v42  ;;  %v1213_v55 = vmul.f32 1.442695, %v2736_v26 }
 0x17f   : > { %v1974_v15 = vpop.eup %1973  ;;  %v1379_v46 = vsel %vm1378_vm3, %v1966_v56, %v1375_v11  ;;  %v1387_v39 = vmul.f32 %v1972_v13, %v2722_v29  ;;  %1975 = vpow2.f32 %v1815_v63  ;;  %v1397_v56 = vand.u32 2147483648, %v2722_v29 }
 0x180   : > { %v1384_v61 = vsel %vm1381_vm4, %v1383_v41, %v1379_v46  ;;  %1977 = vrcp.f32 %v2753_v20  ;;  %vm1392_vm5 = vweird.f32 %v1972_v13  ;;  %v1236_v8 = vmul.f32 %v1974_v15, %v2541_v47 }
 0x181   : > { %v1557_v4 = vsel %vm1552_vm12, %v1235_v16, %v1384_v61  ;;  %v1388_v14 = vsub.f32 1.0, %v1387_v39  ;;  %1979 = vpow2.f32 %v1211_v49  ;;  %vm1393_vm7 = vmor %vm1391_vm6, %vm1392_vm5  ;;  %v1398_v21 = vor.u32 1.1754944e-38, %v1397_v56 }
 0x182   : > { %v1573_v27 = vsel %vm1551_vm11, %v1187_v45, %v1557_v4  ;;  %v935_v29 = vcvt.s32.f32 %v2775_v36  ;;  %v1142_v45 = vsel %vm1133_vm9, %v1122_v34, 0.0  ;;  %v1410_v23 = vand.u32 2147483647, %v2753_v20 }
 0x183   : > { %1589 = vst [vmem:[%s2605_s10 + $0x20] sm:$0xff] %v1573_v27  ;;  %v1389_v53 = vmul.f32 %v1972_v13, %v1388_v14  ;;  %v1091_v48 = vfloor.f32 %v1075_v5  ;;  %v1412_v50 = vand.u32 2147483648, %v2753_v20  ;;  %v1045_v16 = vadd.f32 0.5, %v2786_v60 }
 0x184   : > { %v1157_v15 = vsel %vm1132_vm10, %v2698_v9, %v1141_v31  ;;  %v951_v46 = vadd.f32 0.5, %v935_v29  ;;  %v1172_v39 = vadd.f32 %v2676_v17, %v2704_v54  ;;  %v2815_v61 = vsel %vm1132_vm10, %v1027_v33, %v1142_v45 }
 0x185   : > { %v1976_v38 = vpop.eup %1975  ;;  %v1390_v43 = vadd.f32 %v1972_v13, %v1389_v53  ;;  %v1012_v22 = vmul.f32 %v2750_v18, %v2333_v7  ;;  %vm1406_vm14 = vweird.f32 %v2753_v20  ;;  %v1107_v9 = vmul.f32 %v1091_v48, %v2354_v30 }
 0x186   : > { %v1978_v1 = vpop.eup %1977  ;;  %v2784_v58 = vadd.f32 1.0, %v1976_v38  ;;  %vm1411_vm0 = vcmp.eq.f32.partialorder %v1410_v23, 8.507059e+37  ;;  %v1413_v17 = vor.u32 1.1754944e-38, %v1412_v50  ;;  %v1076_v49 = vmul.f32 %v2446_v35, %v1045_v16 }
 0x187   : > { %v1394_v10 = vsel %vm1393_vm7, %v1972_v13, %v1390_v43  ;;  %v1402_v19 = vmul.f32 %v1978_v1, %v2753_v20  ;;  %v1980_v41 = vpop.eup %1979  ;;  %vm1407_vm13 = vweird.f32 %v1978_v1  ;;  %v982_v20 = vmul.f32 %v2416_v24, %v951_v46 }
 0x188   : > { %v878_v44 = vpop.f32.mrf.mxu2  ;;  %v1399_v37 = vsel %vm1396_vm8, %v1398_v21, %v1394_v10  ;;  %1981 = vrcp.f32 %v2784_v58  ;;  %v1237_v14 = vmul.f32 %v1980_v41, %v2541_v47  ;;  %vm1408_vm15 = vmor %vm1406_vm14, %vm1407_vm13  ;;  %v1189_v56 = vmul.f32 %v2541_v47, %v1172_v39 }
 0x189   : > { %v2790_v6 = vadd.f32 %v2452_v40, %v878_v44  ;;  %v1558_v2 = vsel %vm1552_vm12, %v1236_v8, %v1399_v37  ;;  %v1403_v63 = vsub.f32 1.0, %v1402_v19  ;;  %1983 = vpow2.f32 %v1213_v55 }
 0x18a   : > { %v1574_v11 = vsel %vm1551_vm11, %v1188_v59, %v1558_v2  ;;  %v1028_v53 = vsub.f32 %v933_v12, %v1012_v22  ;;  %v2832_v31 = vadd.s32 96, %v2381_v32  ;;  %v1173_v8 = vadd.f32 %v1157_v15, %v2736_v26 }
 0x18b   : > { %v1816_v13 = vmul.f32 -1.442695, %v2790_v6  ;;  %1590 = vst [vmem:[%s2605_s10 + $0x28] sm:$0xff] %v1574_v11  ;;  %v1404_v28 = vmul.f32 %v1978_v1, %v1403_v63  ;;  %v1123_v34 = vsub.f32 %v2750_v18, %v1107_v9  ;;  %v1425_v5 = vand.u32 2147483647, %v2784_v58 }
 0x18c   : > { %v1427_v52 = vand.u32 2147483648, %v2784_v58  ;;  %v1092_v44 = vfloor.f32 %v1076_v49  ;;  %v2844_v10 = vfloor.f32 %v982_v20  ;;  %v936_v18 = vcvt.s32.f32 %v2832_v31 }
 0x18d   : > { %v1405_v25 = vadd.f32 %v1978_v1, %v1404_v28  ;;  %1985 = vpow2.f32 %v1816_v13  ;;  %v2850_v19 = vadd.s32 104, %v2381_v32  ;;  %v1190_v37 = vmul.f32 %v2541_v47, %v1173_v8 }
 0x18e   : > { %v1982_v4 = vpop.eup %1981  ;;  %vm1421_vm2 = vweird.f32 %v2784_v58  ;;  %v1215_v45 = vmul.f32 1.442695, %v2790_v6  ;;  %vm1426_vm4 = vcmp.eq.f32.partialorder %v1425_v5, 8.507059e+37  ;;  %v1428_v63 = vor.u32 1.1754944e-38, %v1427_v52 }
 0x18f   : > { %v1409_v57 = vsel %vm1408_vm15, %v1978_v1, %v1405_v25  ;;  %v1417_v27 = vmul.f32 %v1982_v4, %v2784_v58  ;;  %v1984_v38 = vpop.eup %1983  ;;  %vm1422_vm1 = vweird.f32 %v1982_v4  ;;  %v1108_v50 = vmul.f32 %v1092_v44, %v2354_v30 }
 0x190   : > { %v880_v54 = vpop.f32.mrf.mxu2  ;;  %v1414_v42 = vsel %vm1411_vm0, %v1413_v17, %v1409_v57  ;;  %v1238_v2 = vmul.f32 %v1984_v38, %v2541_v47  ;;  %vm1423_vm3 = vmor %vm1421_vm2, %vm1422_vm1  ;;  %v1046_v13 = vadd.f32 0.5, %v2844_v10  ;;  %v1143_v16 = vsel %vm1133_vm9, %v1123_v34, 0.0 }
 0x191   : > { %v2825_v51 = vadd.f32 %v2452_v40, %v880_v54  ;;  %v1559_v59 = vsel %vm1552_vm12, %v1237_v14, %v1414_v42  ;;  %v1418_v33 = vsub.f32 1.0, %v1417_v27  ;;  %v952_v41 = vadd.f32 0.5, %v936_v18 }
 0x192   : > { %v1575_v43 = vsel %vm1551_vm11, %v1189_v56, %v1559_v59  ;;  %v937_v28 = vcvt.s32.f32 %v2850_v19  ;;  %v1013_v46 = vmul.f32 %v2786_v60, %v2333_v7  ;;  %v1174_v9 = vadd.f32 %v2815_v61, %v2790_v6 }
 0x193   : > { %v1817_v12 = vmul.f32 -1.442695, %v2825_v51  ;;  %v1986_v1 = vpop.eup %1985  ;;  %1591 = vst [vmem:[%s2605_s10 + $0x30] sm:$0xff] %v1575_v43  ;;  %v1419_v21 = vmul.f32 %v1982_v4, %v1418_v33  ;;  %v1124_v17 = vsub.f32 %v2786_v60, %v1108_v50  ;;  %v1077_v54 = vmul.f32 %v2446_v35, %v1046_v13 }
 0x194   : > { %v2846_v26 = vadd.f32 1.0, %v1986_v1  ;;  %v1217_v57 = vmul.f32 1.442695, %v2825_v51  ;;  %v983_v27 = vmul.f32 %v2416_v24, %v952_v41  ;;  %v953_v20 = vadd.f32 0.5, %v937_v28 }
 0x195   : > { %1987 = vpow2.f32 %v1817_v12  ;;  %v1420_v55 = vadd.f32 %v1982_v4, %v1419_v21  ;;  %v1029_v61 = vsub.f32 %v934_v3, %v1013_v46  ;;  %v1191_v60 = vmul.f32 %v2541_v47, %v1174_v9 }
 0x196   : > { %1989 = vrcp.f32 %v2846_v26  ;;  %v2896_v59 = vadd.s32 112, %v2381_v32  ;;  %v1144_v34 = vsel %vm1133_vm9, %v1124_v17, 0.0  ;;  %v1093_v0 = vfloor.f32 %v1077_v54 }
 0x197   : > { %v1424_v48 = vsel %vm1423_vm3, %v1982_v4, %v1420_v55  ;;  %1991 = vpow2.f32 %v1215_v45  ;;  %v1159_v4 = vsel %vm1132_vm10, %v1028_v53, %v1143_v16  ;;  %v1014_v53 = vmul.f32 %v2844_v10, %v2333_v7 }
 0x198   : > { %v883_v23 = vpop.f32.mrf.mxu2  ;;  %v1429_v58 = vsel %vm1426_vm4, %v1428_v63, %v1424_v48  ;;  %v1175_v56 = vadd.f32 %v1159_v4, %v2825_v51  ;;  %v1442_v3 = vand.u32 2147483648, %v2846_v26  ;;  %v2904_v51 = vfloor.f32 %v983_v27 }
 0x199   : > { %v2858_v11 = vadd.f32 %v2452_v40, %v883_v23  ;;  %v1560_v15 = vsel %vm1552_vm12, %v1238_v2, %v1429_v58  ;;  %v984_v43 = vmul.f32 %v2416_v24, %v953_v20  ;;  %v1440_v52 = vand.u32 2147483647, %v2846_v26 }
 0x19a   : > { %v1576_v25 = vsel %vm1551_vm11, %v1190_v37, %v1560_v15  ;;  %v1192_v44 = vmul.f32 %v2541_v47, %v1175_v56  ;;  %v1160_v37 = vsel %vm1132_vm10, %v1029_v61, %v1144_v34  ;;  %v1030_v55 = vsub.f32 %v935_v29, %v1014_v53 }
 0x19b   : > { %v1818_v39 = vmul.f32 -1.442695, %v2858_v11  ;;  %v1988_v22 = vpop.eup %1987  ;;  %1592 = vst [vmem:[%s2605_s10 + $0x38] sm:$0xff] %v1576_v25  ;;  %vm1436_vm6 = vweird.f32 %v2846_v26  ;;  %v1109_v23 = vmul.f32 %v1093_v0, %v2354_v30  ;;  %v1443_v48 = vor.u32 1.1754944e-38, %v1442_v3 }
 0x19c   : > { %v2879_v14 = vadd.f32 1.0, %v1988_v22  ;;  %v1990_v49 = vpop.eup %1989  ;;  %v2920_v13 = vfloor.f32 %v984_v43  ;;  %vm1441_vm8 = vcmp.eq.f32.partialorder %v1440_v52, 8.507059e+37  ;;  %v1047_v36 = vadd.f32 0.5, %v2904_v51 }
 0x19d   : > { %1993 = vpow2.f32 %v1818_v39  ;;  %v1432_v6 = vmul.f32 %v1990_v49, %v2846_v26  ;;  %v1992_v8 = vpop.eup %1991  ;;  %vm1437_vm5 = vweird.f32 %v1990_v49  ;;  %v1219_v41 = vmul.f32 1.442695, %v2858_v11 }
 0x19e   : > { %1995 = vrcp.f32 %v2879_v14  ;;  %v1239_v21 = vmul.f32 %v1992_v8, %v2541_v47  ;;  %vm1438_vm7 = vmor %vm1436_vm6, %vm1437_vm5  ;;  %v938_v46 = vcvt.s32.f32 %v2896_v59  ;;  %v1457_v22 = vand.u32 2147483648, %v2879_v14 }
 0x19f   : > { %v1433_v33 = vsub.f32 1.0, %v1432_v6  ;;  %1997 = vpow2.f32 %v1217_v57  ;;  %v1125_v25 = vsub.f32 %v2844_v10, %v1109_v23  ;;  %v1455_v54 = vand.u32 2147483647, %v2879_v14 }
 0x1a0   : > { %v885_v42 = vpop.f32.mrf.mxu2  ;;  %v1078_v57 = vmul.f32 %v2446_v35, %v1047_v36  ;;  %v2941_v20 = vadd.s32 120, %v2381_v32  ;;  %vm1451_vm14 = vweird.f32 %v2879_v14  ;;  %v1458_v56 = vor.u32 1.1754944e-38, %v1457_v22 }
 0x1a1   : > { %v2901_v38 = vadd.f32 %v2452_v40, %v885_v42  ;;  %v1434_v5 = vmul.f32 %v1990_v49, %v1433_v33  ;;  %v1048_v53 = vadd.f32 0.5, %v2920_v13  ;;  %vm1456_vm0 = vcmp.eq.f32.partialorder %v1455_v54, 8.507059e+37 }
 0x1a2   : > { %v954_v34 = vadd.f32 0.5, %v938_v46 }
 0x1a3   : > { %v1819_v12 = vmul.f32 -1.442695, %v2901_v38  ;;  %v1994_v1 = vpop.eup %1993  ;;  %v1435_v2 = vadd.f32 %v1990_v49, %v1434_v5  ;;  %v1015_v5 = vmul.f32 %v2904_v51, %v2333_v7 }
 0x1a4   : > { %v1996_v45 = vpop.eup %1995  ;;  %v2916_v63 = vadd.f32 1.0, %v1994_v1 }
 0x1a5   : > { %v1447_v50 = vmul.f32 %v1996_v45, %v2879_v14  ;;  %1999 = vpow2.f32 %v1819_v12  ;;  %v1439_v58 = vsel %vm1438_vm7, %v1990_v49, %v1435_v2  ;;  %v1998_v29 = vpop.eup %1997  ;;  %vm1452_vm13 = vweird.f32 %v1996_v45 }
 0x1a6   : > { %2001 = vrcp.f32 %v2916_v63  ;;  %v1444_v26 = vsel %vm1441_vm8, %v1443_v48, %v1439_v58  ;;  %v1176_v49 = vadd.f32 %v1160_v37, %v2858_v11  ;;  %v1240_v6 = vmul.f32 %v1998_v29, %v2541_v47  ;;  %vm1453_vm15 = vmor %vm1451_vm14, %vm1452_vm13 }
 0x1a7   : > { %v1448_v16 = vsub.f32 1.0, %v1447_v50  ;;  %v1561_v39 = vsel %vm1552_vm12, %v1239_v21, %v1444_v26  ;;  %2003 = vpow2.f32 %v1219_v41  ;;  %v1145_v11 = vsel %vm1133_vm9, %v1125_v25, 0.0 }
 0x1a8   : > { %v888_v15 = vpop.f32.mrf.mxu2  ;;  %v1577_v4 = vsel %vm1551_vm11, %v1191_v60, %v1561_v39  ;;  %v1094_v14 = vfloor.f32 %v1078_v57  ;;  %v1161_v43 = vsel %vm1132_vm10, %v1030_v55, %v1145_v11  ;;  %v1472_v1 = vand.u32 2147483648, %v2916_v63 }
 0x1a9   : > { %v2931_v9 = vadd.f32 %v2452_v40, %v888_v15  ;;  %v1449_v17 = vmul.f32 %v1996_v45, %v1448_v16  ;;  %1593 = vst [vmem:[%s2605_s10 + $0x40] sm:$0xff] %v1577_v4  ;;  %v1221_v21 = vmul.f32 1.442695, %v2901_v38  ;;  %v1193_v2 = vmul.f32 %v2541_v47, %v1176_v49 }
 0x1aa   : > { %v1470_v55 = vand.u32 2147483647, %v2916_v63  ;;  %v1110_v48 = vmul.f32 %v1094_v14, %v2354_v30  ;;  %v1079_v50 = vmul.f32 %v2446_v35, %v1048_v53  ;;  %v985_v58 = vmul.f32 %v2416_v24, %v954_v34 }
 0x1ab   : > { %v1820_v27 = vmul.f32 -1.442695, %v2931_v9  ;;  %v2000_v10 = vpop.eup %1999  ;;  %v1450_v61 = vadd.f32 %v1996_v45, %v1449_v17  ;;  %vm1466_vm2 = vweird.f32 %v2916_v63  ;;  %v939_v26 = vcvt.s32.f32 %v2941_v20 }
 0x1ac   : > { %v2002_v60 = vpop.eup %2001  ;;  %v2947_v42 = vadd.f32 1.0, %v2000_v10  ;;  %v1473_v15 = vor.u32 1.1754944e-38, %v1472_v1  ;;  %vm1471_vm4 = vcmp.eq.f32.partialorder %v1470_v55, 8.507059e+37  ;;  %v2983_v4 = vfloor.f32 %v985_v58 }
 0x1ad   : > { %v1454_v8 = vsel %vm1453_vm15, %v1996_v45, %v1450_v61  ;;  %v1462_v32 = vmul.f32 %v2002_v60, %v2916_v63  ;;  %2005 = vpow2.f32 %v1820_v27  ;;  %v2004_v45 = vpop.eup %2003  ;;  %vm1467_vm1 = vweird.f32 %v2002_v60  ;;  %v2033_v61 = vld [vmem:[%s2156_s21] ss:$0 sm:$0xff] }
 0x1ae   : > { %v1459_v33 = vsel %vm1456_vm0, %v1458_v56, %v1454_v8  ;;  %2007 = vrcp.f32 %v2947_v42  ;;  %v1241_v41 = vmul.f32 %v2004_v45, %v2541_v47  ;;  %vm1468_vm3 = vmor %vm1466_vm2, %vm1467_vm1  ;;  %v1095_v49 = vfloor.f32 %v1079_v50 }
 0x1af   : > { %v1562_v0 = vsel %vm1552_vm12, %v1240_v6, %v1459_v33  ;;  %v1463_v3 = vsub.f32 1.0, %v1462_v32  ;;  %2009 = vpow2.f32 %v1221_v21  ;;  %v955_v27 = vadd.f32 0.5, %v939_v26 }
 0x1b0   : > { %v890_v52 = vpop.f32.mrf.mxu2  ;;  %v1578_v12 = vsel %vm1551_vm11, %v1192_v44, %v1562_v0  ;;  %v1487_v6 = vand.u32 2147483648, %v2947_v42  ;;  %v1485_v11 = vand.u32 2147483647, %v2947_v42  ;;  %v1031_v53 = vsub.f32 %v936_v18, %v1015_v5 }
 0x1b1   : > { %v2965_v37 = vadd.f32 %v2452_v40, %v890_v52  ;;  %1594 = vst [vmem:[%s2605_s10 + $0x48] sm:$0xff] %v1578_v12  ;;  %v1464_v23 = vmul.f32 %v2002_v60, %v1463_v3  ;;  %v1177_v40 = vadd.f32 %v1161_v43, %v2901_v38  ;;  %v1126_v38 = vsub.f32 %v2904_v51, %v1110_v48 }
 0x1b2   : > { %v1223_v51 = vmul.f32 1.442695, %v2931_v9  ;;  %v1016_v14 = vmul.f32 %v2920_v13, %v2333_v7  ;;  %v1049_v34 = vadd.f32 0.5, %v2983_v4  ;;  %vm1481_vm6 = vweird.f32 %v2947_v42 }
 0x1b3   : > { %v1821_v44 = vmul.f32 -1.442695, %v2965_v37  ;;  %v2006_v36 = vpop.eup %2005  ;;  %v1465_v29 = vadd.f32 %v2002_v60, %v1464_v23  ;;  %v1194_v32 = vmul.f32 %v2541_v47, %v1177_v40  ;;  %v1146_v33 = vsel %vm1133_vm9, %v1126_v38, 0.0 }
 0x1b4   : > { %v2008_v16 = vpop.eup %2007  ;;  %v2978_v39 = vadd.f32 1.0, %v2006_v36  ;;  %v1111_v43 = vmul.f32 %v1095_v49, %v2354_v30  ;;  %v986_v31 = vmul.f32 %v2416_v24, %v955_v27  ;;  %v1488_v5 = vor.u32 1.1754944e-38, %v1487_v6 }
 0x1b5   : > { %v1469_v22 = vsel %vm1468_vm3, %v2002_v60, %v1465_v29  ;;  %v1477_v25 = vmul.f32 %v2008_v16, %v2947_v42  ;;  %2011 = vpow2.f32 %v1821_v44  ;;  %vm1482_vm5 = vweird.f32 %v2008_v16  ;;  %v2010_v8 = vpop.eup %2009 }
 0x1b6   : > { %v1474_v63 = vsel %vm1471_vm4, %v1473_v15, %v1469_v22  ;;  %2013 = vrcp.f32 %v2978_v39  ;;  %vm1483_vm7 = vmor %vm1481_vm6, %vm1482_vm5  ;;  %v1242_v1 = vmul.f32 %v2010_v8, %v2541_v47  ;;  %vm1486_vm8 = vcmp.eq.f32.partialorder %v1485_v11, 8.507059e+37 }
 0x1b7   : > { %v1563_v17 = vsel %vm1552_vm12, %v1241_v41, %v1474_v63  ;;  %v1478_v54 = vsub.f32 1.0, %v1477_v25  ;;  %2015 = vpow2.f32 %v1223_v51  ;;  %v1080_v24 = vmul.f32 %v2446_v35, %v1049_v34 }
 0x1b8   : > { %v893_v57 = vpop.f32.mrf.mxu2  ;;  %v1579_v10 = vsel %vm1551_vm11, %v1193_v2, %v1563_v17  ;;  %v1162_v2 = vsel %vm1132_vm10, %v1031_v53, %v1146_v33  ;;  %v1127_v48 = vsub.f32 %v2920_v13, %v1111_v43  ;;  %v3021_v44 = vfloor.f32 %v986_v31 }
 0x1b9   : > { %v2994_v60 = vadd.f32 %v2033_v61, %v893_v57  ;;  %1595 = vst [vmem:[%s2605_s10 + $0x50] sm:$0xff] %v1579_v10  ;;  %v1479_v56 = vmul.f32 %v2008_v16, %v1478_v54  ;;  %v1502_v36 = vand.u32 2147483648, %v2978_v39  ;;  %v1225_v29 = vmul.f32 1.442695, %v2965_v37 }
 0x1ba   : > { %v1178_v13 = vadd.f32 %v1162_v2, %v2931_v9  ;;  %v1032_v22 = vsub.f32 %v937_v28, %v1016_v14  ;;  %v1096_v25 = vfloor.f32 %v1080_v24  ;;  %vm1496_vm14 = vweird.f32 %v2978_v39 }
 0x1bb   : > { %v2012_v0 = vpop.eup %2011  ;;  %v1480_v3 = vadd.f32 %v2008_v16, %v1479_v56  ;;  %v1822_v12 = vmul.f32 -1.442695, %v2994_v60  ;;  %v1147_v38 = vsel %vm1133_vm9, %v1127_v48, 0.0  ;;  %v1050_v17 = vadd.f32 0.5, %v3021_v44 }
 0x1bc   : > { %v2014_v18 = vpop.eup %2013  ;;  %v3009_v52 = vadd.f32 1.0, %v2012_v0  ;;  %v1503_v49 = vor.u32 1.1754944e-38, %v1502_v36  ;;  %v1163_v6 = vsel %vm1132_vm10, %v1032_v22, %v1147_v38  ;;  %v1112_v51 = vmul.f32 %v1096_v25, %v2354_v30 }
 0x1bd   : > { %v1484_v21 = vsel %vm1483_vm7, %v2008_v16, %v1480_v3  ;;  %v1492_v45 = vmul.f32 %v2014_v18, %v2978_v39  ;;  %vm1497_vm13 = vweird.f32 %v2014_v18  ;;  %v1500_v16 = vand.u32 2147483647, %v2978_v39  ;;  %v2016_v15 = vpop.eup %2015 }
 0x1be   : > { %v1489_v42 = vsel %vm1486_vm8, %v1488_v5, %v1484_v21  ;;  %2017 = vrcp.f32 %v3009_v52  ;;  %vm1498_vm15 = vmor %vm1496_vm14, %vm1497_vm13  ;;  %v1243_v9 = vmul.f32 %v2016_v15, %v2541_v47  ;;  %v1195_v39 = vmul.f32 %v2541_v47, %v1178_v13 }
 0x1bf   : > { %v1564_v23 = vsel %vm1552_vm12, %v1242_v1, %v1489_v42  ;;  %v1493_v55 = vsub.f32 1.0, %v1492_v45  ;;  %2019 = vpow2.f32 %v1822_v12  ;;  %vm1501_vm0 = vcmp.eq.f32.partialorder %v1500_v16, 8.507059e+37 }
 0x1c0   : > { %v895_v50 = vpop.f32.mrf.mxu2  ;;  %v1580_v58 = vsel %vm1551_vm11, %v1194_v32, %v1564_v23  ;;  %2021 = vpow2.f32 %v1225_v29  ;;  %v1081_v53 = vmul.f32 %v2446_v35, %v1050_v17  ;;  %v1517_v32 = vand.u32 2147483648, %v3009_v52 }
 0x1c1   : > { %1596 = vst [vmem:[%s2605_s10 + $0x58] sm:$0xff] %v1580_v58  ;;  %v1494_v40 = vmul.f32 %v2014_v18, %v1493_v55  ;;  %v3029_v41 = vadd.f32 %v2033_v61, %v895_v50  ;;  %v1515_v14 = vand.u32 2147483647, %v3009_v52  ;;  %v1179_v0 = vadd.f32 %v1163_v6, %v2965_v37 }
 0x1c2   : > { %v1017_v3 = vmul.f32 %v2983_v4, %v2333_v7  ;;  %v1227_v35 = vmul.f32 1.442695, %v2994_v60  ;;  %vm1511_vm2 = vweird.f32 %v3009_v52  ;;  %v1128_v31 = vsub.f32 %v2983_v4, %v1112_v51 }
 0x1c3   : > { %v1495_v63 = vadd.f32 %v2014_v18, %v1494_v40  ;;  %v1823_v57 = vmul.f32 -1.442695, %v3029_v41  ;;  %v1518_v5 = vor.u32 1.1754944e-38, %v1517_v32  ;;  %vm1516_vm4 = vcmp.eq.f32.partialorder %v1515_v14, 8.507059e+37 }
 0x1c4   : > { %v2018_v54 = vpop.eup %2017  ;;  %v1196_v37 = vmul.f32 %v2541_v47, %v1179_v0  ;;  %v1033_v42 = vsub.f32 %v938_v46, %v1017_v3  ;;  %v1018_v50 = vmul.f32 %v3021_v44, %v2333_v7  ;;  %v1229_v29 = vmul.f32 1.442695, %v3029_v41 }
 0x1c5   : > { %v1499_v19 = vsel %vm1498_vm15, %v2014_v18, %v1495_v63  ;;  %v1507_v28 = vmul.f32 %v2018_v54, %v3009_v52  ;;  %v2020_v27 = vpop.eup %2019  ;;  %2023 = vpow2.f32 %v1823_v57  ;;  %vm1512_vm1 = vweird.f32 %v2018_v54 }
 0x1c6   : > { %v1504_v10 = vsel %vm1501_vm0, %v1503_v49, %v1499_v19  ;;  %v1309_v11 = vadd.f32 1.0, %v2020_v27  ;;  %v2022_v34 = vpop.eup %2021  ;;  %v1097_v18 = vfloor.f32 %v1081_v53  ;;  %vm1513_vm3 = vmor %vm1511_vm2, %vm1512_vm1  ;;  %v1148_v52 = vsel %vm1133_vm9, %v1128_v31, 0.0 }
 0x1c7   : > { %v1565_v61 = vsel %vm1552_vm12, %v1243_v9, %v1504_v10  ;;  %v1508_v56 = vsub.f32 1.0, %v1507_v28  ;;  %v1244_v12 = vmul.f32 %v2022_v34, %v2541_v47  ;;  %v1164_v59 = vsel %vm1132_vm10, %v1033_v42, %v1148_v52 }
 0x1c8   : > { %v1581_v8 = vsel %vm1551_vm11, %v1195_v39, %v1565_v61  ;;  %2025 = vrcp.f32 %v1309_v11  ;;  %v1113_v24 = vmul.f32 %v1097_v18, %v2354_v30  ;;  %v1532_v58 = vand.u32 2147483648, %v1309_v11 }
 0x1c9   : > { %1597 = vst [vmem:[%s2605_s10 + $0x60] sm:$0xff] %v1581_v8  ;;  %v1509_v33 = vmul.f32 %v2018_v54, %v1508_v56  ;;  %2027 = vpow2.f32 %v1227_v35  ;;  %v1530_v16 = vand.u32 2147483647, %v1309_v11  ;;  %v1180_v15 = vadd.f32 %v1164_v59, %v2994_v60 }
 0x1ca   : > { %v1129_v36 = vsub.f32 %v3021_v44, %v1113_v24  ;;  %vm1526_vm6 = vweird.f32 %v1309_v11  ;;  %v1034_v22 = vsub.f32 %v939_v26, %v1018_v50  ;;  %v1533_v7 = vor.u32 1.1754944e-38, %v1532_v58 }
 0x1cb   : > { %v1510_v43 = vadd.f32 %v2018_v54, %v1509_v33  ;;  %v2024_v21 = vpop.eup %2023  ;;  %vm1531_vm8 = vcmp.eq.f32.partialorder %v1530_v16, 8.507059e+37  ;;  %v1197_v60 = vmul.f32 %v2541_v47, %v1180_v15 }
 0x1cc   : > { %v1310_v23 = vadd.f32 1.0, %v2024_v21  ;;  %v1149_v44 = vsel %vm1133_vm9, %v1129_v36, 0.0 }
 0x1cd   : > { %v1514_v1 = vsel %vm1513_vm3, %v2018_v54, %v1510_v43  ;;  %v1165_v26 = vsel %vm1132_vm10, %v1034_v22, %v1149_v44 }
 0x1ce   : > { %v1519_v45 = vsel %vm1516_vm4, %v1518_v5, %v1514_v1  ;;  %v2026_v2 = vpop.eup %2025  ;;  %2029 = vrcp.f32 %v1310_v23  ;;  %v1547_v9 = vand.u32 2147483648, %v1310_v23  ;;  %v1545_v28 = vand.u32 2147483647, %v1310_v23 }
 0x1cf   : > { %v1566_v4 = vsel %vm1552_vm12, %v1244_v12, %v1519_v45  ;;  %v1522_v48 = vmul.f32 %v2026_v2, %v1309_v11  ;;  %v2028_v30 = vpop.eup %2027  ;;  %vm1527_vm5 = vweird.f32 %v2026_v2  ;;  %2031 = vpow2.f32 %v1229_v29 }
 0x1d0   : > { %v1582_v55 = vsel %vm1551_vm11, %v1196_v37, %v1566_v4  ;;  %vm1528_vm7 = vmor %vm1526_vm6, %vm1527_vm5  ;;  %v1245_v63 = vmul.f32 %v2028_v30, %v2541_v47  ;;  %v1181_v39 = vadd.f32 %v1165_v26, %v3029_v41  ;;  %vm1541_vm13 = vweird.f32 %v1310_v23 }
 0x1d1   : > { %1598 = vst [vmem:[%s2605_s10 + $0x68] sm:$0xff] %v1582_v55  ;;  %v1523_v46 = vsub.f32 1.0, %v1522_v48  ;;  %v1548_v6 = vor.u32 1.1754944e-38, %v1547_v9  ;;  %vm1546_vm10 = vcmp.eq.f32.partialorder %v1545_v28, 8.507059e+37 }
 0x1d2   : > { %v1198_v56 = vmul.f32 %v2541_v47, %v1181_v39 }
 0x1d3   : > { %v1524_v40 = vmul.f32 %v2026_v2, %v1523_v46 }
 0x1d4   : > { %v2030_v25 = vpop.eup %2029 }
 0x1d5   : > { %v1525_v13 = vadd.f32 %v2026_v2, %v1524_v40  ;;  %v1537_v17 = vmul.f32 %v2030_v25, %v1310_v23  ;;  %vm1542_vm9 = vweird.f32 %v2030_v25  ;;  %v2032_v27 = vpop.eup %2031 }
 0x1d6   : > { %vm1543_vm14 = vmor %vm1541_vm13, %vm1542_vm9  ;;  %v1246_v51 = vmul.f32 %v2032_v27, %v2541_v47 }
 0x1d7   : > { %v1529_v38 = vsel %vm1528_vm7, %v2026_v2, %v1525_v13  ;;  %v1538_v49 = vsub.f32 1.0, %v1537_v17 }
 0x1d8   : > { %v1534_v54 = vsel %vm1531_vm8, %v1533_v7, %v1529_v38 }
 0x1d9   : > { %v1567_v20 = vsel %vm1552_vm12, %v1245_v63, %v1534_v54  ;;  %v1539_v19 = vmul.f32 %v2030_v25, %v1538_v49 }
 0x1da   : > { %v1583_v57 = vsel %vm1551_vm11, %v1197_v60, %v1567_v20 }
 0x1db   : > { %1599 = vst [vmem:[%s2605_s10 + $0x70] sm:$0xff] %v1583_v57  ;;  %v1540_v10 = vadd.f32 %v2030_v25, %v1539_v19 }
 0x1dd   : > { %v1544_v61 = vsel %vm1543_vm14, %v2030_v25, %v1540_v10 }
 0x1de   : > { %v1549_v11 = vsel %vm1546_vm10, %v1548_v6, %v1544_v61 }
 0x1df   : > { %v1568_v53 = vsel %vm1552_vm12, %v1246_v51, %v1549_v11 }
 0x1e0   : > { %v1584_v8 = vsel %vm1551_vm11, %v1198_v56, %v1568_v53 }
 0x1e1   : > { %1600 = vst [vmem:[%s2605_s10 + $0x78] sm:$0xff] %v1584_v8 }
 0x1e2 PF: > { %s24_s25 = sadd.s32 1, %s2054_s25  }
 0x1e3   : > { %p21_p4 = scmp.ge.s32.totalorder %s24_s25, 5  }
 0x1e5   :  { %23 = sbr.rel (!%p21_p4) target bundleno = 7 (0x7), region = 82 }

</bundles_post_ra>
